<compile_context>
chip_gen: v5e
topology: v5e:2x2
jax: 0.10.0
libtpu: 0.0.40
codegen_flags: <defaults>
</compile_context>

<pallas_src>
import functools

import jax
import jax.numpy as jnp
from jax import lax
from jax.experimental import pallas as pl
from jax.experimental.pallas import tpu as pltpu

LANE = 128


def _round_up(a, b):
    return (a + b - 1) // b * b


def _pad_to(a, shape):
    pads = [(0, t - s) for s, t in zip(a.shape, shape)]
    if all(p == (0, 0) for p in pads):
        return a
    return jnp.pad(a, pads)


# ------------------------------ fused kernel --------------------------------

def _cnn_block_kernel(x_ref, w1_ref, b1_ref,
                      w2_ref, b2_ref,
                      se_w1_ref, se_b1_ref, se_w2_ref, se_b2_ref,
                      w3_ref, b3_ref,
                      o_ref, *, H, W):
    HW = H * W
    bf16 = jnp.bfloat16
    f32 = jnp.float32

    x = x_ref[...]                                             # (HW, Cp) f32

    # ---- stage 1: 1x1 conv (BN scale folded into w1) + shift + ReLU ---------
    y1 = jnp.dot(x.astype(bf16), w1_ref[...], preferred_element_type=f32)
    y1 = jnp.maximum(y1 + b1_ref[...], 0.0)                    # (HW, Mp) f32

    # ---- stage 2: grouped 3x3 conv (pad 1), dense block-diag weight ---------
    # Each tap (ky,kx) reads pixel (y+ky-1, x+kx-1).  In the flat (HW, C)
    # layout that is y1 shifted by d = (ky-1)*W + (kx-1) rows, realized as a
    # cyclic pltpu.roll on the sublane axis; positions where the cyclic wrap
    # or the zero padding would be read are masked to 0 (hoisted masks below),
    # so no halo buffer / zero-fill / misaligned slice is needed.
    idx = lax.broadcasted_iota(jnp.int32, (HW, 1), 0)
    col = idx % W
    m_l = col > 0                    # kx = 0 tap valid iff x > 0
    m_r = col < (W - 1)              # kx = 2 tap valid iff x < W-1
    m_u = idx >= W                   # ky = 0 tap valid iff y > 0
    m_d = idx < (HW - W)             # ky = 2 tap valid iff y < H-1

    # Center tap initializes the accumulator directly from in-register y1.
    acc = jnp.dot(y1.astype(bf16), w2_ref[4], preferred_element_type=f32)

    for ky in range(3):
        for kx in range(3):
            if ky == 1 and kx == 1:
                continue
            d = (ky - 1) * W + (kx - 1)
            patch = pltpu.roll(y1, shift=(-d) % HW, axis=0)
            masks = []
            if ky == 0:
                masks.append(m_u)
            elif ky == 2:
                masks.append(m_d)
            if kx == 0:
                masks.append(m_l)
            elif kx == 2:
                masks.append(m_r)
            mask = masks[0] if len(masks) == 1 else jnp.logical_and(*masks)
            patch = jnp.where(mask, patch, 0.0)
            acc = acc + jnp.dot(patch.astype(bf16), w2_ref[ky * 3 + kx],
                                preferred_element_type=f32)
    y2 = jnp.maximum(acc + b2_ref[...], 0.0)                   # (HW, Mp) f32

    # ---- stage 3: Squeeze-Excite (global mean from in-register y2) ----------
    mean = jnp.sum(y2, axis=0, keepdims=True) * (1.0 / HW)     # (1, Mp)
    h = jnp.dot(mean.astype(bf16), se_w1_ref[...], preferred_element_type=f32)
    h = jnp.maximum(h + se_b1_ref[...], 0.0)                   # (1, Hp)
    g = jnp.dot(h.astype(bf16), se_w2_ref[...], preferred_element_type=f32)
    g = jax.nn.sigmoid(g + se_b2_ref[...])                     # (1, Mp)
    y3 = y2 * g

    # ---- stage 4: 1x1 conv (BN scale folded into w3) + shift + residual -----
    y4 = jnp.dot(y3.astype(bf16), w3_ref[...], preferred_element_type=f32)
    o_ref[...] = (y4 + b3_ref[...] + x).astype(o_ref.dtype)


# ------------------------- parameter folding / padding -----------------------

def fold_bn(p):
    """Fold eval-mode BN scales into conv output channels (exact, in f32)."""
    return dict(
        w1=p["w1"] * p["s1"],            # (Cin, mid) * (1, mid)
        b1=p["b1"],
        w2=p["w2"] * p["s2"][0],         # (3,3,mid,mid) * (mid,) on output axis
        b2=p["b2"],
        se_w1=p["se_w1"], se_b1=p["se_b1"],
        se_w2=p["se_w2"], se_b2=p["se_b2"],
        w3=p["w3"] * p["s3"],            # (mid, Cout) * (1, Cout)
        b3=p["b3"],
    )


def _prep_kernel_params(p):
    """Fold BN, zero-pad channel dims to multiples of 128, cast weights bf16."""
    q = fold_bn(p)
    cin, mid = q["w1"].shape
    hidden = q["se_w1"].shape[1]
    cout = q["w3"].shape[1]
    Cp, Mp = _round_up(cin, LANE), _round_up(mid, LANE)
    Hp, Op = _round_up(hidden, LANE), _round_up(cout, LANE)
    bf16 = jnp.bfloat16
    kp = dict(
        w1=_pad_to(q["w1"], (Cp, Mp)).astype(bf16),
        b1=_pad_to(q["b1"], (1, Mp)),
        w2=_pad_to(q["w2"].reshape(9, mid, mid), (9, Mp, Mp)).astype(bf16),
        b2=_pad_to(q["b2"], (1, Mp)),
        se_w1=_pad_to(q["se_w1"], (Mp, Hp)).astype(bf16),
        se_b1=_pad_to(q["se_b1"], (1, Hp)),
        se_w2=_pad_to(q["se_w2"], (Hp, Mp)).astype(bf16),
        se_b2=_pad_to(q["se_b2"], (1, Mp)),
        w3=_pad_to(q["w3"], (Mp, Op)).astype(bf16),
        b3=_pad_to(q["b3"], (1, Op)),
    )
    return kp, (Cp, Mp, Hp, Op)


# -------------------------------- wrappers -----------------------------------

def cnn_block_forward_nhwc(x_nhwc, p):
    N, H, W, Cin = x_nhwc.shape
    Cout = p["w3"].shape[1]
    assert Cin == Cout, "stride=1 identity skip requires in_planes == out_planes"
    HW = H * W

    kp, (Cp, Mp, Hp, Op) = _prep_kernel_params(p)
    assert Cp == Op
    x2 = _pad_to(x_nhwc.reshape(N, HW, Cin).astype(jnp.float32), (N, HW, Cp))

    kernel = functools.partial(_cnn_block_kernel, H=H, W=W)

    def const_spec(shape):
        nd = len(shape)
        return pl.BlockSpec(shape, lambda n, _nd=nd: (0,) * _nd)

    out2 = pl.pallas_call(
        kernel,
        out_shape=jax.ShapeDtypeStruct((N, HW, Op), jnp.float32),
        grid_spec=pltpu.PrefetchScalarGridSpec(
            num_scalar_prefetch=0,
            grid=(N,),
            in_specs=[
                pl.BlockSpec((None, HW, Cp), lambda n: (n, 0, 0)),   # x (per batch)
                const_spec((Cp, Mp)), const_spec((1, Mp)),           # w1, b1
                const_spec((9, Mp, Mp)), const_spec((1, Mp)),        # w2, b2
                const_spec((Mp, Hp)), const_spec((1, Hp)),           # se_w1, se_b1
                const_spec((Hp, Mp)), const_spec((1, Mp)),           # se_w2, se_b2
                const_spec((Mp, Op)), const_spec((1, Op)),           # w3, b3
            ],
            out_specs=pl.BlockSpec((None, HW, Op), lambda n: (n, 0, 0)),
        ),
        compiler_params=pltpu.CompilerParams(
            dimension_semantics=("parallel",),
            vmem_limit_bytes=32 * 1024 * 1024,
        ),
    )(x2, kp["w1"], kp["b1"], kp["w2"], kp["b2"],
      kp["se_w1"], kp["se_b1"], kp["se_w2"], kp["se_b2"], kp["w3"], kp["b3"])

    return out2[:, :, :Cout].reshape(N, H, W, Cout)


def cnn_block_forward(x_nchw, p):
    # NCHW wrapper matching the PyTorch module interface.  When stacking
    # blocks, keep activations NHWC and call cnn_block_forward_nhwc directly so
    # the transposes / channel pads amortize over the whole network.
    x = jnp.transpose(x_nchw, (0, 2, 3, 1))
    y = cnn_block_forward_nhwc(x, p)
    return jnp.transpose(y, (0, 3, 1, 2))


# --------------------------- parameters (eval-mode BN) -----------------------

def init_params(key, in_planes, out_planes, ratio=1.0):
    mid = int(out_planes * ratio)
    assert mid % 4 == 0, "grouped 3x3 conv requires mid_planes % 4 == 0"
    hidden = max(8, mid // 8)
    groups = mid // 4
    cpg = mid // groups
    ks = jax.random.split(key, 12)

    def conv1x1_w(k, cin, cout):
        return jax.random.normal(k, (cin, cout), jnp.float32) * (2.0 / cin) ** 0.5

    def bn_fold(k, c):
        kg, kb, km, kv = jax.random.split(k, 4)
        gamma = jax.random.uniform(kg, (c,), jnp.float32, minval=0.5, maxval=1.5)
        beta = jax.random.normal(kb, (c,), jnp.float32) * 0.1
        mean = jax.random.normal(km, (c,), jnp.float32) * 0.1
        var = jax.random.uniform(kv, (c,), jnp.float32, minval=0.5, maxval=1.5)
        scale = gamma / jnp.sqrt(var + 1e-5)
        shift = beta - mean * scale
        return scale.reshape(1, c), shift.reshape(1, c)

    # 1) 1x1 conv (in -> mid), BN
    w1 = conv1x1_w(ks[0], in_planes, mid)
    s1, b1 = bn_fold(ks[1], mid)

    # 2) grouped 3x3 conv (mid -> mid, groups=mid//4), BN.  Stored as a dense
    #    block-diagonal HWIO weight (3, 3, mid, mid) — fine at toy widths.
    w2 = jnp.zeros((3, 3, mid, mid), jnp.float32)
    gkeys = jax.random.split(ks[2], groups)
    std2 = (2.0 / (9 * cpg)) ** 0.5
    for g in range(groups):
        wg = jax.random.normal(gkeys[g], (3, 3, cpg, cpg), jnp.float32) * std2
        w2 = w2.at[:, :, g * cpg:(g + 1) * cpg, g * cpg:(g + 1) * cpg].set(wg)
    s2, b2 = bn_fold(ks[3], mid)

    # 3) SE: 1x1 (mid -> hidden) + bias, ReLU, 1x1 (hidden -> mid) + bias
    se_w1 = conv1x1_w(ks[4], mid, hidden)
    se_b1 = (jax.random.normal(ks[5], (hidden,), jnp.float32) * 0.05).reshape(1, hidden)
    se_w2 = conv1x1_w(ks[6], hidden, mid)
    se_b2 = (jax.random.normal(ks[7], (mid,), jnp.float32) * 0.05).reshape(1, mid)

    # 4) 1x1 conv (mid -> out), BN
    w3 = conv1x1_w(ks[8], mid, out_planes)
    s3, b3 = bn_fold(ks[9], out_planes)

    return dict(w1=w1, s1=s1, b1=b1, w2=w2, s2=s2, b2=b2,
                se_w1=se_w1, se_b1=se_b1, se_w2=se_w2, se_b2=se_b2,
                w3=w3, s3=s3, b3=b3)


# ------------------------------ pure-JAX reference ---------------------------
# Mirrors the kernel numerics (BN folded in f32, bf16 MXU inputs, f32
# accumulation, f32 elementwise) so the comparison isolates kernel bugs —
# in particular the roll/mask tap logic vs. a real padded convolution.

def ref_forward(x_nchw, p):
    bf16 = jnp.bfloat16
    q = fold_bn(p)
    x = jnp.transpose(x_nchw, (0, 2, 3, 1)).astype(jnp.float32)
    y = jnp.einsum("nhwc,cd->nhwd", x.astype(bf16), q["w1"].astype(bf16),
                   preferred_element_type=jnp.float32)
    y = jnp.maximum(y + q["b1"][0], 0.0)
    y = lax.conv_general_dilated(
        y.astype(bf16), q["w2"].astype(bf16), (1, 1), "SAME",
        dimension_numbers=("NHWC", "HWIO", "NHWC"),
        preferred_element_type=jnp.float32)
    y = jnp.maximum(y + q["b2"][0], 0.0)
    m = jnp.mean(y, axis=(1, 2))
    h = jnp.maximum(
        jnp.dot(m.astype(bf16), q["se_w1"].astype(bf16),
                preferred_element_type=jnp.float32) + q["se_b1"][0], 0.0)
    g = jax.nn.sigmoid(
        jnp.dot(h.astype(bf16), q["se_w2"].astype(bf16),
                preferred_element_type=jnp.float32) + q["se_b2"][0])
    y = y * g[:, None, None, :]
    y = jnp.einsum("nhwc,cd->nhwd", y.astype(bf16), q["w3"].astype(bf16),
                   preferred_element_type=jnp.float32)
    out = y + q["b3"][0] + x
    return jnp.transpose(out, (0, 3, 1, 2))


# ---------------------------------- main --------------------------------------

if __name__ == "__main__":
    key = jax.random.PRNGKey(0)
    kx, kp = jax.random.split(key)

    N, C, H, W = 2, 32, 16, 16          # in_planes = out_planes = 32, stride = 1
    x = jax.random.normal(kx, (N, C, H, W), jnp.float32)
    params = init_params(kp, C, C, ratio=1.0)

    out = jax.jit(cnn_block_forward)(x, params)
    out = jax.block_until_ready(out)

    assert out.shape == (N, C, H, W)
    ref = ref_forward(x, params)
    err = float(jnp.max(jnp.abs(out - ref)))
    # Kernel and reference share the same folded bf16 weights and dtype policy;
    # only f32 accumulation order differs, so the error is O(1e-4).
    assert err < 2e-2, f"max abs err too large: {err}"

    print("KERNEL_OK")
</pallas_src>

<mosaic_0001>
module attributes {stable_mosaic.version = 11 : i64} {
  func.func @_cnn_block_kernel(%arg0: i32, %arg1: memref<1x256x128xf32, #tpu.memory_space<vmem>>, %arg2: memref<128x128xbf16, #tpu.memory_space<vmem>>, %arg3: memref<1x128xf32, #tpu.memory_space<vmem>>, %arg4: memref<9x128x128xbf16, #tpu.memory_space<vmem>>, %arg5: memref<1x128xf32, #tpu.memory_space<vmem>>, %arg6: memref<128x128xbf16, #tpu.memory_space<vmem>>, %arg7: memref<1x128xf32, #tpu.memory_space<vmem>>, %arg8: memref<128x128xbf16, #tpu.memory_space<vmem>>, %arg9: memref<1x128xf32, #tpu.memory_space<vmem>>, %arg10: memref<128x128xbf16, #tpu.memory_space<vmem>>, %arg11: memref<1x128xf32, #tpu.memory_space<vmem>>, %arg12: memref<1x256x128xf32, #tpu.memory_space<vmem>>) attributes {dimension_semantics = [#tpu.dimension_semantics<parallel>], iteration_bounds = array<i64: 2>, scalar_prefetch = 0 : i64, scratch_operands = 0 : i64, tpu.core_type = #tpu.core_type<tc>, window_params = [{transform_indices = @transform_0, window_bounds = array<i64: 1, 256, 128>}, {pipeline_mode = #tpu.pipeline_mode<synchronous>, transform_indices = @transform_1, window_bounds = array<i64: 128, 128>}, {pipeline_mode = #tpu.pipeline_mode<synchronous>, transform_indices = @transform_2, window_bounds = array<i64: 1, 128>}, {pipeline_mode = #tpu.pipeline_mode<synchronous>, transform_indices = @transform_3, window_bounds = array<i64: 9, 128, 128>}, {pipeline_mode = #tpu.pipeline_mode<synchronous>, transform_indices = @transform_4, window_bounds = array<i64: 1, 128>}, {pipeline_mode = #tpu.pipeline_mode<synchronous>, transform_indices = @transform_5, window_bounds = array<i64: 128, 128>}, {pipeline_mode = #tpu.pipeline_mode<synchronous>, transform_indices = @transform_6, window_bounds = array<i64: 1, 128>}, {pipeline_mode = #tpu.pipeline_mode<synchronous>, transform_indices = @transform_7, window_bounds = array<i64: 128, 128>}, {pipeline_mode = #tpu.pipeline_mode<synchronous>, transform_indices = @transform_8, window_bounds = array<i64: 1, 128>}, {pipeline_mode = #tpu.pipeline_mode<synchronous>, transform_indices = @transform_9, window_bounds = array<i64: 128, 128>}, {pipeline_mode = #tpu.pipeline_mode<synchronous>, transform_indices = @transform_10, window_bounds = array<i64: 1, 128>}, {transform_indices = @transform_11, window_bounds = array<i64: 1, 256, 128>}]} {
    %c0 = arith.constant 0 : index
    %c0_0 = arith.constant 0 : index
    %c0_1 = arith.constant 0 : index
    %0 = vector.load %arg1[%c0, %c0_0, %c0_1] : memref<1x256x128xf32, #tpu.memory_space<vmem>>, vector<1x256x128xf32>
    %1 = vector.shape_cast %0 : vector<1x256x128xf32> to vector<256x128xf32>
    %2 = arith.truncf %1 : vector<256x128xf32> to vector<256x128xbf16>
    %c0_2 = arith.constant 0 : index
    %c0_3 = arith.constant 0 : index
    %3 = vector.load %arg2[%c0_2, %c0_3] : memref<128x128xbf16, #tpu.memory_space<vmem>>, vector<128x128xbf16>
    %cst = arith.constant dense<0.000000e+00> : vector<256x128xf32>
    %4 = tpu.matmul %2, %3, %cst {dimension_numbers = #tpu.dot_dimension_numbers<[1], [0], [0], [1], [0, 0, 1, 1], [], []>} : vector<256x128xbf16>, vector<128x128xbf16>, vector<256x128xf32> -> vector<256x128xf32>
    %c0_4 = arith.constant 0 : index
    %c0_5 = arith.constant 0 : index
    %5 = vector.load %arg3[%c0_4, %c0_5] : memref<1x128xf32, #tpu.memory_space<vmem>>, vector<1x128xf32>
    %6 = vector.broadcast %5 : vector<1x128xf32> to vector<256x128xf32>
    %7 = arith.addf %4, %6 : vector<256x128xf32>
    %cst_6 = arith.constant 0.000000e+00 : f32
    %8 = vector.broadcast %cst_6 : f32 to vector<256x128xf32>
    %9 = arith.maximumf %7, %8 : vector<256x128xf32>
    %10 = tpu.iota {dimensions = array<i32: 0>} : vector<256x1xi32>
    %c16_i32 = arith.constant 16 : i32
    %c0_i32 = arith.constant 0 : i32
    %11 = arith.cmpi eq, %c16_i32, %c0_i32 : i32
    %c1_i32 = arith.constant 1 : i32
    %12 = arith.select %11, %c1_i32, %c16_i32 : i32
    %13 = vector.broadcast %12 : i32 to vector<256x1xi32>
    %14 = arith.remsi %10, %13 : vector<256x1xi32>
    %c0_i32_7 = arith.constant 0 : i32
    %15 = vector.broadcast %c0_i32_7 : i32 to vector<256x1xi32>
    %16 = arith.cmpi ne, %14, %15 : vector<256x1xi32>
    %c0_i32_8 = arith.constant 0 : i32
    %17 = vector.broadcast %c0_i32_8 : i32 to vector<256x1xi32>
    %18 = arith.cmpi slt, %14, %17 : vector<256x1xi32>
    %c0_i32_9 = arith.constant 0 : i32
    %19 = arith.cmpi slt, %12, %c0_i32_9 : i32
    %20 = vector.broadcast %19 : i1 to vector<256x1xi1>
    %21 = vector.broadcast %20 : vector<256x1xi1> to vector<256x1xi1>
    %22 = arith.xori %18, %21 : vector<256x1xi1>
    %23 = arith.andi %22, %16 : vector<256x1xi1>
    %24 = vector.broadcast %12 : i32 to vector<256x1xi32>
    %25 = arith.addi %14, %24 : vector<256x1xi32>
    %26 = arith.select %23, %25, %14 : vector<256x1xi1>, vector<256x1xi32>
    %c0_i32_10 = arith.constant 0 : i32
    %27 = vector.broadcast %c0_i32_10 : i32 to vector<256x1xi32>
    %28 = arith.cmpi sgt, %26, %27 : vector<256x1xi32>
    %c15_i32 = arith.constant 15 : i32
    %29 = vector.broadcast %c15_i32 : i32 to vector<256x1xi32>
    %30 = arith.cmpi slt, %26, %29 : vector<256x1xi32>
    %c16_i32_11 = arith.constant 16 : i32
    %31 = vector.broadcast %c16_i32_11 : i32 to vector<256x1xi32>
    %32 = arith.cmpi sge, %10, %31 : vector<256x1xi32>
    %c240_i32 = arith.constant 240 : i32
    %33 = vector.broadcast %c240_i32 : i32 to vector<256x1xi32>
    %34 = arith.cmpi slt, %10, %33 : vector<256x1xi32>
    %35 = arith.truncf %9 : vector<256x128xf32> to vector<256x128xbf16>
    %c4 = arith.constant 4 : index
    %c0_12 = arith.constant 0 : index
    %c0_13 = arith.constant 0 : index
    %36 = vector.load %arg4[%c4, %c0_12, %c0_13] : memref<9x128x128xbf16, #tpu.memory_space<vmem>>, vector<1x128x128xbf16>
    %37 = vector.shape_cast %36 : vector<1x128x128xbf16> to vector<128x128xbf16>
    %cst_14 = arith.constant dense<0.000000e+00> : vector<256x128xf32>
    %38 = tpu.matmul %35, %37, %cst_14 {dimension_numbers = #tpu.dot_dimension_numbers<[1], [0], [0], [1], [0, 0, 1, 1], [], []>} : vector<256x128xbf16>, vector<128x128xbf16>, vector<256x128xf32> -> vector<256x128xf32>
    %c17_i32 = arith.constant 17 : i32
    %39 = tpu.dynamic_rotate %9 by %c17_i32 dim 0 : vector<256x128xf32>, i32 -> vector<256x128xf32>
    %40 = arith.andi %32, %28 : vector<256x1xi1>
    %cst_15 = arith.constant 0.000000e+00 : f32
    %41 = vector.shape_cast %40 : vector<256x1xi1> to vector<256x1xi1>
    %42 = vector.broadcast %41 : vector<256x1xi1> to vector<256x128xi1>
    %43 = vector.broadcast %cst_15 : f32 to vector<256x128xf32>
    %44 = arith.select %42, %39, %43 : vector<256x128xi1>, vector<256x128xf32>
    %45 = arith.truncf %44 : vector<256x128xf32> to vector<256x128xbf16>
    %c0_16 = arith.constant 0 : index
    %c0_17 = arith.constant 0 : index
    %c0_18 = arith.constant 0 : index
    %46 = vector.load %arg4[%c0_16, %c0_17, %c0_18] : memref<9x128x128xbf16, #tpu.memory_space<vmem>>, vector<1x128x128xbf16>
    %47 = vector.shape_cast %46 : vector<1x128x128xbf16> to vector<128x128xbf16>
    %cst_19 = arith.constant dense<0.000000e+00> : vector<256x128xf32>
    %48 = tpu.matmul %45, %47, %cst_19 {dimension_numbers = #tpu.dot_dimension_numbers<[1], [0], [0], [1], [0, 0, 1, 1], [], []>} : vector<256x128xbf16>, vector<128x128xbf16>, vector<256x128xf32> -> vector<256x128xf32>
    %49 = arith.addf %38, %48 : vector<256x128xf32>
    %c16_i32_20 = arith.constant 16 : i32
    %50 = tpu.dynamic_rotate %9 by %c16_i32_20 dim 0 : vector<256x128xf32>, i32 -> vector<256x128xf32>
    %cst_21 = arith.constant 0.000000e+00 : f32
    %51 = vector.shape_cast %32 : vector<256x1xi1> to vector<256x1xi1>
    %52 = vector.broadcast %51 : vector<256x1xi1> to vector<256x128xi1>
    %53 = vector.broadcast %cst_21 : f32 to vector<256x128xf32>
    %54 = arith.select %52, %50, %53 : vector<256x128xi1>, vector<256x128xf32>
    %55 = arith.truncf %54 : vector<256x128xf32> to vector<256x128xbf16>
    %c1 = arith.constant 1 : index
    %c0_22 = arith.constant 0 : index
    %c0_23 = arith.constant 0 : index
    %56 = vector.load %arg4[%c1, %c0_22, %c0_23] : memref<9x128x128xbf16, #tpu.memory_space<vmem>>, vector<1x128x128xbf16>
    %57 = vector.shape_cast %56 : vector<1x128x128xbf16> to vector<128x128xbf16>
    %cst_24 = arith.constant dense<0.000000e+00> : vector<256x128xf32>
    %58 = tpu.matmul %55, %57, %cst_24 {dimension_numbers = #tpu.dot_dimension_numbers<[1], [0], [0], [1], [0, 0, 1, 1], [], []>} : vector<256x128xbf16>, vector<128x128xbf16>, vector<256x128xf32> -> vector<256x128xf32>
    %59 = arith.addf %49, %58 : vector<256x128xf32>
    %c15_i32_25 = arith.constant 15 : i32
    %60 = tpu.dynamic_rotate %9 by %c15_i32_25 dim 0 : vector<256x128xf32>, i32 -> vector<256x128xf32>
    %61 = arith.andi %32, %30 : vector<256x1xi1>
    %cst_26 = arith.constant 0.000000e+00 : f32
    %62 = vector.shape_cast %61 : vector<256x1xi1> to vector<256x1xi1>
    %63 = vector.broadcast %62 : vector<256x1xi1> to vector<256x128xi1>
    %64 = vector.broadcast %cst_26 : f32 to vector<256x128xf32>
    %65 = arith.select %63, %60, %64 : vector<256x128xi1>, vector<256x128xf32>
    %66 = arith.truncf %65 : vector<256x128xf32> to vector<256x128xbf16>
    %c2 = arith.constant 2 : index
    %c0_27 = arith.constant 0 : index
    %c0_28 = arith.constant 0 : index
    %67 = vector.load %arg4[%c2, %c0_27, %c0_28] : memref<9x128x128xbf16, #tpu.memory_space<vmem>>, vector<1x128x128xbf16>
    %68 = vector.shape_cast %67 : vector<1x128x128xbf16> to vector<128x128xbf16>
    %cst_29 = arith.constant dense<0.000000e+00> : vector<256x128xf32>
    %69 = tpu.matmul %66, %68, %cst_29 {dimension_numbers = #tpu.dot_dimension_numbers<[1], [0], [0], [1], [0, 0, 1, 1], [], []>} : vector<256x128xbf16>, vector<128x128xbf16>, vector<256x128xf32> -> vector<256x128xf32>
    %70 = arith.addf %59, %69 : vector<256x128xf32>
    %c1_i32_30 = arith.constant 1 : i32
    %71 = tpu.dynamic_rotate %9 by %c1_i32_30 dim 0 : vector<256x128xf32>, i32 -> vector<256x128xf32>
    %cst_31 = arith.constant 0.000000e+00 : f32
    %72 = vector.shape_cast %28 : vector<256x1xi1> to vector<256x1xi1>
    %73 = vector.broadcast %72 : vector<256x1xi1> to vector<256x128xi1>
    %74 = vector.broadcast %cst_31 : f32 to vector<256x128xf32>
    %75 = arith.select %73, %71, %74 : vector<256x128xi1>, vector<256x128xf32>
    %76 = arith.truncf %75 : vector<256x128xf32> to vector<256x128xbf16>
    %c3 = arith.constant 3 : index
    %c0_32 = arith.constant 0 : index
    %c0_33 = arith.constant 0 : index
    %77 = vector.load %arg4[%c3, %c0_32, %c0_33] : memref<9x128x128xbf16, #tpu.memory_space<vmem>>, vector<1x128x128xbf16>
    %78 = vector.shape_cast %77 : vector<1x128x128xbf16> to vector<128x128xbf16>
    %cst_34 = arith.constant dense<0.000000e+00> : vector<256x128xf32>
    %79 = tpu.matmul %76, %78, %cst_34 {dimension_numbers = #tpu.dot_dimension_numbers<[1], [0], [0], [1], [0, 0, 1, 1], [], []>} : vector<256x128xbf16>, vector<128x128xbf16>, vector<256x128xf32> -> vector<256x128xf32>
    %80 = arith.addf %70, %79 : vector<256x128xf32>
    %c255_i32 = arith.constant 255 : i32
    %81 = tpu.dynamic_rotate %9 by %c255_i32 dim 0 : vector<256x128xf32>, i32 -> vector<256x128xf32>
    %cst_35 = arith.constant 0.000000e+00 : f32
    %82 = vector.shape_cast %30 : vector<256x1xi1> to vector<256x1xi1>
    %83 = vector.broadcast %82 : vector<256x1xi1> to vector<256x128xi1>
    %84 = vector.broadcast %cst_35 : f32 to vector<256x128xf32>
    %85 = arith.select %83, %81, %84 : vector<256x128xi1>, vector<256x128xf32>
    %86 = arith.truncf %85 : vector<256x128xf32> to vector<256x128xbf16>
    %c5 = arith.constant 5 : index
    %c0_36 = arith.constant 0 : index
    %c0_37 = arith.constant 0 : index
    %87 = vector.load %arg4[%c5, %c0_36, %c0_37] : memref<9x128x128xbf16, #tpu.memory_space<vmem>>, vector<1x128x128xbf16>
    %88 = vector.shape_cast %87 : vector<1x128x128xbf16> to vector<128x128xbf16>
    %cst_38 = arith.constant dense<0.000000e+00> : vector<256x128xf32>
    %89 = tpu.matmul %86, %88, %cst_38 {dimension_numbers = #tpu.dot_dimension_numbers<[1], [0], [0], [1], [0, 0, 1, 1], [], []>} : vector<256x128xbf16>, vector<128x128xbf16>, vector<256x128xf32> -> vector<256x128xf32>
    %90 = arith.addf %80, %89 : vector<256x128xf32>
    %c241_i32 = arith.constant 241 : i32
    %91 = tpu.dynamic_rotate %9 by %c241_i32 dim 0 : vector<256x128xf32>, i32 -> vector<256x128xf32>
    %92 = arith.andi %34, %28 : vector<256x1xi1>
    %cst_39 = arith.constant 0.000000e+00 : f32
    %93 = vector.shape_cast %92 : vector<256x1xi1> to vector<256x1xi1>
    %94 = vector.broadcast %93 : vector<256x1xi1> to vector<256x128xi1>
    %95 = vector.broadcast %cst_39 : f32 to vector<256x128xf32>
    %96 = arith.select %94, %91, %95 : vector<256x128xi1>, vector<256x128xf32>
    %97 = arith.truncf %96 : vector<256x128xf32> to vector<256x128xbf16>
    %c6 = arith.constant 6 : index
    %c0_40 = arith.constant 0 : index
    %c0_41 = arith.constant 0 : index
    %98 = vector.load %arg4[%c6, %c0_40, %c0_41] : memref<9x128x128xbf16, #tpu.memory_space<vmem>>, vector<1x128x128xbf16>
    %99 = vector.shape_cast %98 : vector<1x128x128xbf16> to vector<128x128xbf16>
    %cst_42 = arith.constant dense<0.000000e+00> : vector<256x128xf32>
    %100 = tpu.matmul %97, %99, %cst_42 {dimension_numbers = #tpu.dot_dimension_numbers<[1], [0], [0], [1], [0, 0, 1, 1], [], []>} : vector<256x128xbf16>, vector<128x128xbf16>, vector<256x128xf32> -> vector<256x128xf32>
    %101 = arith.addf %90, %100 : vector<256x128xf32>
    %c240_i32_43 = arith.constant 240 : i32
    %102 = tpu.dynamic_rotate %9 by %c240_i32_43 dim 0 : vector<256x128xf32>, i32 -> vector<256x128xf32>
    %cst_44 = arith.constant 0.000000e+00 : f32
    %103 = vector.shape_cast %34 : vector<256x1xi1> to vector<256x1xi1>
    %104 = vector.broadcast %103 : vector<256x1xi1> to vector<256x128xi1>
    %105 = vector.broadcast %cst_44 : f32 to vector<256x128xf32>
    %106 = arith.select %104, %102, %105 : vector<256x128xi1>, vector<256x128xf32>
    %107 = arith.truncf %106 : vector<256x128xf32> to vector<256x128xbf16>
    %c7 = arith.constant 7 : index
    %c0_45 = arith.constant 0 : index
    %c0_46 = arith.constant 0 : index
    %108 = vector.load %arg4[%c7, %c0_45, %c0_46] : memref<9x128x128xbf16, #tpu.memory_space<vmem>>, vector<1x128x128xbf16>
    %109 = vector.shape_cast %108 : vector<1x128x128xbf16> to vector<128x128xbf16>
    %cst_47 = arith.constant dense<0.000000e+00> : vector<256x128xf32>
    %110 = tpu.matmul %107, %109, %cst_47 {dimension_numbers = #tpu.dot_dimension_numbers<[1], [0], [0], [1], [0, 0, 1, 1], [], []>} : vector<256x128xbf16>, vector<128x128xbf16>, vector<256x128xf32> -> vector<256x128xf32>
    %111 = arith.addf %101, %110 : vector<256x128xf32>
    %c239_i32 = arith.constant 239 : i32
    %112 = tpu.dynamic_rotate %9 by %c239_i32 dim 0 : vector<256x128xf32>, i32 -> vector<256x128xf32>
    %113 = arith.andi %34, %30 : vector<256x1xi1>
    %cst_48 = arith.constant 0.000000e+00 : f32
    %114 = vector.shape_cast %113 : vector<256x1xi1> to vector<256x1xi1>
    %115 = vector.broadcast %114 : vector<256x1xi1> to vector<256x128xi1>
    %116 = vector.broadcast %cst_48 : f32 to vector<256x128xf32>
    %117 = arith.select %115, %112, %116 : vector<256x128xi1>, vector<256x128xf32>
    %118 = arith.truncf %117 : vector<256x128xf32> to vector<256x128xbf16>
    %c8 = arith.constant 8 : index
    %c0_49 = arith.constant 0 : index
    %c0_50 = arith.constant 0 : index
    %119 = vector.load %arg4[%c8, %c0_49, %c0_50] : memref<9x128x128xbf16, #tpu.memory_space<vmem>>, vector<1x128x128xbf16>
    %120 = vector.shape_cast %119 : vector<1x128x128xbf16> to vector<128x128xbf16>
    %cst_51 = arith.constant dense<0.000000e+00> : vector<256x128xf32>
    %121 = tpu.matmul %118, %120, %cst_51 {dimension_numbers = #tpu.dot_dimension_numbers<[1], [0], [0], [1], [0, 0, 1, 1], [], []>} : vector<256x128xbf16>, vector<128x128xbf16>, vector<256x128xf32> -> vector<256x128xf32>
    %122 = arith.addf %111, %121 : vector<256x128xf32>
    %c0_52 = arith.constant 0 : index
    %c0_53 = arith.constant 0 : index
    %123 = vector.load %arg5[%c0_52, %c0_53] : memref<1x128xf32, #tpu.memory_space<vmem>>, vector<1x128xf32>
    %124 = vector.broadcast %123 : vector<1x128xf32> to vector<256x128xf32>
    %125 = arith.addf %122, %124 : vector<256x128xf32>
    %cst_54 = arith.constant 0.000000e+00 : f32
    %126 = vector.broadcast %cst_54 : f32 to vector<256x128xf32>
    %127 = arith.maximumf %125, %126 : vector<256x128xf32>
    %cst_55 = arith.constant dense<0.000000e+00> : vector<128xf32>
    %128 = vector.multi_reduction <add>, %127, %cst_55 [0] : vector<256x128xf32> to vector<128xf32>
    %129 = vector.shape_cast %128 : vector<128xf32> to vector<1x128xf32>
    %cst_56 = arith.constant 3.906250e-03 : f32
    %130 = vector.broadcast %cst_56 : f32 to vector<1x128xf32>
    %131 = arith.mulf %129, %130 : vector<1x128xf32>
    %132 = arith.truncf %131 : vector<1x128xf32> to vector<1x128xbf16>
    %c0_57 = arith.constant 0 : index
    %c0_58 = arith.constant 0 : index
    %133 = vector.load %arg6[%c0_57, %c0_58] : memref<128x128xbf16, #tpu.memory_space<vmem>>, vector<128x128xbf16>
    %cst_59 = arith.constant dense<0.000000e+00> : vector<1x128xf32>
    %134 = tpu.matmul %132, %133, %cst_59 {dimension_numbers = #tpu.dot_dimension_numbers<[1], [0], [0], [1], [0, 0, 1, 1], [], []>} : vector<1x128xbf16>, vector<128x128xbf16>, vector<1x128xf32> -> vector<1x128xf32>
    %c0_60 = arith.constant 0 : index
    %c0_61 = arith.constant 0 : index
    %135 = vector.load %arg7[%c0_60, %c0_61] : memref<1x128xf32, #tpu.memory_space<vmem>>, vector<1x128xf32>
    %136 = arith.addf %134, %135 : vector<1x128xf32>
    %cst_62 = arith.constant 0.000000e+00 : f32
    %137 = vector.broadcast %cst_62 : f32 to vector<1x128xf32>
    %138 = arith.maximumf %136, %137 : vector<1x128xf32>
    %139 = arith.truncf %138 : vector<1x128xf32> to vector<1x128xbf16>
    %c0_63 = arith.constant 0 : index
    %c0_64 = arith.constant 0 : index
    %140 = vector.load %arg8[%c0_63, %c0_64] : memref<128x128xbf16, #tpu.memory_space<vmem>>, vector<128x128xbf16>
    %cst_65 = arith.constant dense<0.000000e+00> : vector<1x128xf32>
    %141 = tpu.matmul %139, %140, %cst_65 {dimension_numbers = #tpu.dot_dimension_numbers<[1], [0], [0], [1], [0, 0, 1, 1], [], []>} : vector<1x128xbf16>, vector<128x128xbf16>, vector<1x128xf32> -> vector<1x128xf32>
    %c0_66 = arith.constant 0 : index
    %c0_67 = arith.constant 0 : index
    %142 = vector.load %arg9[%c0_66, %c0_67] : memref<1x128xf32, #tpu.memory_space<vmem>>, vector<1x128xf32>
    %143 = arith.addf %141, %142 : vector<1x128xf32>
    %144 = arith.negf %143 : vector<1x128xf32>
    %145 = math.exp %144 : vector<1x128xf32>
    %cst_68 = arith.constant 1.000000e+00 : f32
    %146 = vector.broadcast %cst_68 : f32 to vector<1x128xf32>
    %147 = arith.addf %146, %145 : vector<1x128xf32>
    %148 = arith.divf %146, %147 : vector<1x128xf32>
    %149 = vector.broadcast %148 : vector<1x128xf32> to vector<256x128xf32>
    %150 = arith.mulf %127, %149 : vector<256x128xf32>
    %151 = arith.truncf %150 : vector<256x128xf32> to vector<256x128xbf16>
    %c0_69 = arith.constant 0 : index
    %c0_70 = arith.constant 0 : index
    %152 = vector.load %arg10[%c0_69, %c0_70] : memref<128x128xbf16, #tpu.memory_space<vmem>>, vector<128x128xbf16>
    %cst_71 = arith.constant dense<0.000000e+00> : vector<256x128xf32>
    %153 = tpu.matmul %151, %152, %cst_71 {dimension_numbers = #tpu.dot_dimension_numbers<[1], [0], [0], [1], [0, 0, 1, 1], [], []>} : vector<256x128xbf16>, vector<128x128xbf16>, vector<256x128xf32> -> vector<256x128xf32>
    %c0_72 = arith.constant 0 : index
    %c0_73 = arith.constant 0 : index
    %154 = vector.load %arg11[%c0_72, %c0_73] : memref<1x128xf32, #tpu.memory_space<vmem>>, vector<1x128xf32>
    %155 = vector.broadcast %154 : vector<1x128xf32> to vector<256x128xf32>
    %156 = arith.addf %153, %155 : vector<256x128xf32>
    %157 = arith.addf %156, %1 : vector<256x128xf32>
    %c0_74 = arith.constant 0 : index
    %c0_75 = arith.constant 0 : index
    %c0_76 = arith.constant 0 : index
    %158 = vector.load %arg12[%c0_74, %c0_75, %c0_76] : memref<1x256x128xf32, #tpu.memory_space<vmem>>, vector<1x256x128xf32>
    %159 = vector.shape_cast %158 : vector<1x256x128xf32> to vector<256x128xf32>
    %160 = vector.shape_cast %157 : vector<256x128xf32> to vector<1x256x128xf32>
    tpu.vector_store %arg12[%c0_74, %c0_75, %c0_76], %160 {strides = array<i32>} : memref<1x256x128xf32, #tpu.memory_space<vmem>>, vector<1x256x128xf32>,
    return
  }
  func.func @transform_0(%arg0: i32) -> (i32, i32, i32) {
    %c0_i32 = arith.constant 0 : i32
    %c0_i32_0 = arith.constant 0 : i32
    %c0_i32_1 = arith.constant 0 : i32
    return %arg0, %c0_i32, %c0_i32_0 : i32, i32, i32
  }
  func.func @transform_1(%arg0: i32) -> (i32, i32) {
    %c0_i32 = arith.constant 0 : i32
    %c0_i32_0 = arith.constant 0 : i32
    %c0_i32_1 = arith.constant 0 : i32
    return %c0_i32, %c0_i32_0 : i32, i32
  }
  func.func @transform_2(%arg0: i32) -> (i32, i32) {
    %c0_i32 = arith.constant 0 : i32
    %c0_i32_0 = arith.constant 0 : i32
    %c0_i32_1 = arith.constant 0 : i32
    return %c0_i32, %c0_i32_0 : i32, i32
  }
  func.func @transform_3(%arg0: i32) -> (i32, i32, i32) {
    %c0_i32 = arith.constant 0 : i32
    %c0_i32_0 = arith.constant 0 : i32
    %c0_i32_1 = arith.constant 0 : i32
    %c0_i32_2 = arith.constant 0 : i32
    return %c0_i32, %c0_i32_0, %c0_i32_1 : i32, i32, i32
  }
  func.func @transform_4(%arg0: i32) -> (i32, i32) {
    %c0_i32 = arith.constant 0 : i32
    %c0_i32_0 = arith.constant 0 : i32
    %c0_i32_1 = arith.constant 0 : i32
    return %c0_i32, %c0_i32_0 : i32, i32
  }
  func.func @transform_5(%arg0: i32) -> (i32, i32) {
    %c0_i32 = arith.constant 0 : i32
    %c0_i32_0 = arith.constant 0 : i32
    %c0_i32_1 = arith.constant 0 : i32
    return %c0_i32, %c0_i32_0 : i32, i32
  }
  func.func @transform_6(%arg0: i32) -> (i32, i32) {
    %c0_i32 = arith.constant 0 : i32
    %c0_i32_0 = arith.constant 0 : i32
    %c0_i32_1 = arith.constant 0 : i32
    return %c0_i32, %c0_i32_0 : i32, i32
  }
  func.func @transform_7(%arg0: i32) -> (i32, i32) {
    %c0_i32 = arith.constant 0 : i32
    %c0_i32_0 = arith.constant 0 : i32
    %c0_i32_1 = arith.constant 0 : i32
    return %c0_i32, %c0_i32_0 : i32, i32
  }
  func.func @transform_8(%arg0: i32) -> (i32, i32) {
    %c0_i32 = arith.constant 0 : i32
    %c0_i32_0 = arith.constant 0 : i32
    %c0_i32_1 = arith.constant 0 : i32
    return %c0_i32, %c0_i32_0 : i32, i32
  }
  func.func @transform_9(%arg0: i32) -> (i32, i32) {
    %c0_i32 = arith.constant 0 : i32
    %c0_i32_0 = arith.constant 0 : i32
    %c0_i32_1 = arith.constant 0 : i32
    return %c0_i32, %c0_i32_0 : i32, i32
  }
  func.func @transform_10(%arg0: i32) -> (i32, i32) {
    %c0_i32 = arith.constant 0 : i32
    %c0_i32_0 = arith.constant 0 : i32
    %c0_i32_1 = arith.constant 0 : i32
    return %c0_i32, %c0_i32_0 : i32, i32
  }
  func.func @transform_11(%arg0: i32) -> (i32, i32, i32) {
    %c0_i32 = arith.constant 0 : i32
    %c0_i32_0 = arith.constant 0 : i32
    %c0_i32_1 = arith.constant 0 : i32
    return %arg0, %c0_i32, %c0_i32_0 : i32, i32, i32
  }
}

</mosaic_0001>

<bundles_post_ra>
// kernel: cnn_block_forward.1
= control target key start
LH: loop header
LB: loop body
LE: loop exit
PB: predicated region body
PF: predicated region fallthrough
CT: control target
= control target key end

     0   :  { %s8317_s0 = inlined_call_operand.vmem [shape: f32[2,256,128], index: 0, kind: input, shape index: {}]   ;;  %s8318_s1 = inlined_call_operand.vmem [shape: bf16[128,128], index: 1, kind: input, shape index: {}]   ;;  %s8319_s2 = inlined_call_operand.vmem [shape: f32[1,128], index: 2, kind: input, shape index: {}]   ;;  %s8320_s3 = inlined_call_operand.vmem [shape: bf16[9,128,128], index: 3, kind: input, shape index: {}]   ;;  %s8321_s4 = inlined_call_operand.vmem [shape: f32[1,128], index: 4, kind: input, shape index: {}]   ;;  %s8322_s5 = inlined_call_operand.vmem [shape: bf16[128,128], index: 5, kind: input, shape index: {}]   ;;  %s8323_s6 = inlined_call_operand.vmem [shape: f32[1,128], index: 6, kind: input, shape index: {}]   ;;  %s8324_s7 = inlined_call_operand.vmem [shape: bf16[128,128], index: 7, kind: input, shape index: {}]   ;;  %s8325_s8 = inlined_call_operand.vmem [shape: f32[1,128], index: 8, kind: input, shape index: {}]   ;;  %s8326_s9 = inlined_call_operand.vmem [shape: bf16[128,128], index: 9, kind: input, shape index: {}]   ;;  %s8327_s10 = inlined_call_operand.vmem [shape: f32[1,128], index: 10, kind: input, shape index: {}]   ;;  %s8328_s11 = inlined_call_operand.hbm [shape: f32[2,256,128], index: 11, kind: output, shape index: {}]  }
   0x1   :  { %8458 = sst [smem:[#allocation123_spill]] %s8317_s0 }
   0x2   :  { %16 = vsyncpa [#allocation3], 0 }
   0x3   :  { %18 = vsyncpa [#allocation3 + $0x1], 0  ;;  %s5751_s17 = smov 0   ;;  %s5753_s18 = smov 0  }
   0x4   :  { %s5755_s19 = smov 0   ;;  %s5757_s20 = smov 0  }
   0x5 LB: > { %s5772_s21 = sadd.s32 4294967295, %s5685_s20   ;;  %s4578_s22 = sadd.s32 4294967294, %s5685_s20   ;;  %s5685_s20 = sphi %s5757_s20, %s8980_s20   ;;  %s5681_s19 = sphi %s5755_s19, %s8979_s19   ;;  %s5677_s18 = sphi %s5753_s18, %s8978_s18   ;;  %s5673_s17 = sphi %s5751_s17, %s8977_s17  }
   0x6   : > { %s5776_s23 = sadd.s32 1, %s5685_s20   ;;  %s267_s24 = sadd.s32 1, %s5681_s19 }
   0x7   : > { %s264_s25 = ssub.s32 %s5685_s20, %s5776_s23  ;;  %p277_p0 = scmp.ne.s32.totalorder %s5681_s19, %s5677_s18 }
   0x8   : > { %p265_p1 = scmp.eq.s32.totalorder %s264_s25, 0  ;;  %p278_p2 = scmp.eq.s32.totalorder %s5772_s21, 1 }
   0x9   : > { %p283_p3 = scmp.ne.s32.totalorder %s5677_s18, %s5673_s17  ;;  %p284_p4 = scmp.eq.s32.totalorder %s4578_s22, 1 }
   0xa   : > { %s5787_s26 = scalar_select %p265_p1, %s5681_s19, %s267_s24  }
   0xb   : > { %p5789_p5 = por %p278_p2, %p277_p0  ;;  %p5793_p6 = por %p284_p4, %p283_p3 }
   0xc   : > { %8459 = sst [smem:[#allocation5_spill]] %s5787_s26  ;;  %p4581_p7 = scmp.ge.s32.totalorder %s5685_s20, 1 }
   0xd   : > { %p340_p8 = scmp.lt.s32.totalorder %s5685_s20, 3 }
   0xf   : > { %p341_p9 = pnand %p4581_p7, %p340_p8 }
  0x11   : > { %344 = sbr.rel (%p341_p9) target bundleno = 1875 (0x753), region = 64 }
  0x16   : > { %v5419_v0 = vld [vmem:[%s8318_s1 + $0x38] sm:$0xff]  ;;  %v5418_v1 = vld [vmem:[%s8318_s1 + $0x30] sm:$0xff]  ;;  %v5417_v2 = vld [vmem:[%s8318_s1 + $0x28] sm:$0xff]  ;;  %p380_p10 = scmp.lt.s32.totalorder %s5772_s21, 1  ;;  %s8462_s0 = sld [smem:[#allocation123_spill]]  ;;  %v8329_v57 = vmov 0.0|0.0   ;;  %v622_v63 = vlaneseq }
  0x17   : > { %501 = vmatpush.bf16.msra.mxu0 %v5419_v0  ;;  %5517 = vmatpush.bf16.msra.mxu3 %v5419_v0  ;;  %v5416_v3 = vld [vmem:[%s8318_s1 + $0x20] sm:$0xff]  ;;  %v5415_v4 = vld [vmem:[%s8318_s1 + $0x18] sm:$0xff]  ;;  %v5414_v5 = vld [vmem:[%s8318_s1 + $0x10] sm:$0xff]  ;;  %vm8371_vm3 = vmmov 1   ;;  %s5516_s15 = sshll.u32 %s5772_s21, 8  ;;  %s5643_s22 = scalar_lea.hbm %s8328_s11, 512 }
  0x18   : > { %s381_s29 = scalar_select %p380_p10, %s5772_s21, 1  ;;  %v5413_v6 = vld [vmem:[%s8318_s1 + $0x8] sm:$0xff]  ;;  %v5412_v7 = vld [vmem:[%s8318_s1] sm:$0xff]  ;;  %v5427_v32 = vld [vmem:[%s8320_s3 + $0x138] sm:$0xff] }
  0x19   : > { %1610 = vmatpush.bf16.msra.mxu2 %v5427_v32  ;;  %v5426_v36 = vld [vmem:[%s8320_s3 + $0x130] sm:$0xff]  ;;  %v5435_v37 = vld [vmem:[%s8320_s3 + $0x38] sm:$0xff]  ;;  %v5425_v38 = vld [vmem:[%s8320_s3 + $0x128] sm:$0xff]  ;;  %s4512_s24 = scalar_lea.hbm %s8328_s11, %s5516_s15 }
  0x1a   : > { %s5411_s13 = sshll.u32 %s381_s29, 8  ;;  %1473 = vmatpush.bf16.msra.mxu1 %v5435_v37  ;;  %v5434_v39 = vld [vmem:[%s8320_s3 + $0x30] sm:$0xff]  ;;  %v5424_v40 = vld [vmem:[%s8320_s3 + $0x120] sm:$0xff]  ;;  %v5433_v41 = vld [vmem:[%s8320_s3 + $0x28] sm:$0xff]  ;;  %s377_s29 = sand.u32 1, %s5677_s18  }
  0x1b   : > { %502 = vmatpush.bf16.msra.mxu0 %v5418_v1  ;;  %5518 = vmatpush.bf16.msra.mxu3 %v5418_v1  ;;  %v5423_v44 = vld [vmem:[%s8320_s3 + $0x118] sm:$0xff]  ;;  %v5432_v46 = vld [vmem:[%s8320_s3 + $0x20] sm:$0xff]  ;;  %v5422_v47 = vld [vmem:[%s8320_s3 + $0x110] sm:$0xff]  ;;  %s4515_s30 = sshll.u32 %s4512_s24, 4  ;;  %s4501_s21 = scalar_lea.sflag [#allocation3], %s377_s29  ;;  %s4516_s30 = int_to_ptr.hbm [resolvable:$true] %s4515_s30 }
  0x1c   : > { %s5825_s26 = scalar_lea.vmem %s8462_s0, %s5411_s13  ;;  %v5431_v48 = vld [vmem:[%s8320_s3 + $0x18] sm:$0xff]  ;;  %v5421_v49 = vld [vmem:[%s8320_s3 + $0x108] sm:$0xff]  ;;  %v5430_v50 = vld [vmem:[%s8320_s3 + $0x10] sm:$0xff]  ;;  %s4582_s13 = sshll.u32 %s377_s29, 8 }
  0x1d   : > { %v385_v8 = vld [vmem:[%s5825_s26] sm:$0xff]  ;;  %v386_v9 = vld [vmem:[%s5825_s26 + $0x8] sm:$0xff]  ;;  %v411_v10 = vld [vmem:[%s5825_s26 + $0xd0] sm:$0xff]  ;;  %1611 = vmatpush.bf16.msra.mxu2 %v5426_v36  ;;  %s8145_s14 = scalar_lea.vmem [#allocation2], %s4582_s13  ;;  %s5637_s12 = sshra.s32 %s4516_s30, 4  ;;  %s5638_s12 = int_to_ptr.hbm [resolvable:$true] %s5637_s12 }
  0x1e   : > { %v412_v11 = vld [vmem:[%s5825_s26 + $0xd8] sm:$0xff]  ;;  %v417_v12 = vpack.c.bf16 %v386_v9, %v385_v8  ;;  %v387_v14 = vld [vmem:[%s5825_s26 + $0x10] sm:$0xff]  ;;  %v413_v16 = vld [vmem:[%s5825_s26 + $0xe0] sm:$0xff]  ;;  %1474 = vmatpush.bf16.msra.mxu1 %v5434_v39  ;;  %s4513_s25 = sshll.u32 %s8145_s14, 4  ;;  %s5639_s13 = scalar_lea.hbm %s5638_s12, 256  ;;  %s4514_s25 = int_to_ptr.vmem [resolvable:$true] %s4513_s25 }
  0x1f   : > { %503 = vmatpush.bf16.msra.mxu0 %v5417_v2  ;;  %5519 = vmatpush.bf16.msra.mxu3 %v5417_v2  ;;  %v430_v13 = vpack.c.bf16 %v412_v11, %v411_v10  ;;  %v388_v15 = vld [vmem:[%s5825_s26 + $0x18] sm:$0xff]  ;;  %v414_v17 = vld [vmem:[%s5825_s26 + $0xe8] sm:$0xff]  ;;  %v389_v20 = vld [vmem:[%s5825_s26 + $0x20] sm:$0xff]  ;;  %p5640_p11 = scmp.ne.s32.totalorder %s5638_s12, %s5639_s13  ;;  %p5644_p0 = scmp.lt.s32.totalorder %s5638_s12, %s8328_s11 }
  0x20   : > { %v418_v18 = vpack.c.bf16 %v388_v15, %v387_v14  ;;  %v431_v19 = vpack.c.bf16 %v414_v17, %v413_v16  ;;  %v390_v21 = vld [vmem:[%s5825_s26 + $0x28] sm:$0xff]  ;;  %v415_v22 = vld [vmem:[%s5825_s26 + $0xf0] sm:$0xff]  ;;  %v416_v23 = vld [vmem:[%s5825_s26 + $0xf8] sm:$0xff]  ;;  %p5645_p1 = scmp.lt.s32.totalorder %s5643_s22, %s5639_s13 }
  0x21   : > { %v419_v24 = vpack.c.bf16 %v390_v21, %v389_v20  ;;  %v432_v25 = vpack.c.bf16 %v416_v23, %v415_v22  ;;  %v391_v26 = vld [vmem:[%s5825_s26 + $0x30] sm:$0xff]  ;;  %v392_v27 = vld [vmem:[%s5825_s26 + $0x38] sm:$0xff]  ;;  %v393_v29 = vld [vmem:[%s5825_s26 + $0x40] sm:$0xff]  ;;  %1612 = vmatpush.bf16.msra.mxu2 %v5425_v38  ;;  %p5641_p12 = pnand %p5640_p11, %p5789_p5 }
  0x22   : > { %v420_v28 = vpack.c.bf16 %v392_v27, %v391_v26  ;;  %v394_v30 = vld [vmem:[%s5825_s26 + $0x48] sm:$0xff]  ;;  %v395_v33 = vld [vmem:[%s5825_s26 + $0x50] sm:$0xff]  ;;  %v396_v34 = vld [vmem:[%s5825_s26 + $0x58] sm:$0xff]  ;;  %1475 = vmatpush.bf16.msra.mxu1 %v5433_v41  ;;  %p5646_p2 = por %p5645_p1, %p5644_p0 }
  0x23   : > { %504 = vmatpush.bf16.msra.mxu0 %v5416_v3  ;;  %5520 = vmatpush.bf16.msra.mxu3 %v5416_v3  ;;  %v421_v31 = vpack.c.bf16 %v394_v30, %v393_v29  ;;  %v422_v35 = vpack.c.bf16 %v396_v34, %v395_v33  ;;  %v397_v42 = vld [vmem:[%s5825_s26 + $0x60] sm:$0xff]  ;;  %v398_v43 = vld [vmem:[%s5825_s26 + $0x68] sm:$0xff]  ;;  %v399_v52 = vld [vmem:[%s5825_s26 + $0x70] sm:$0xff]  ;;  %v5911_v3 = vshrl.u32 %v622_v63, 7  ;;  %p5642_p13 = pneg %p5641_p12 }
  0x24   : > { %v423_v45 = vpack.c.bf16 %v398_v43, %v397_v42  ;;  %v5420_v51 = vld [vmem:[%s8320_s3 + $0x100] sm:$0xff]  ;;  %v400_v53 = vld [vmem:[%s5825_s26 + $0x78] sm:$0xff]  ;;  %v5429_v54 = vld [vmem:[%s8320_s3 + $0x8] sm:$0xff] }
  0x25   : > { %1613 = vmatpush.bf16.msra.mxu2 %v5424_v40  ;;  %v424_v55 = vpack.c.bf16 %v400_v53, %v399_v52  ;;  %v5428_v56 = vld [vmem:[%s8320_s3] sm:$0xff]  ;;  %v402_v59 = vld [vmem:[%s5825_s26 + $0x88] sm:$0xff]  ;;  %v404_v8 = vld [vmem:[%s5825_s26 + $0x98] sm:$0xff]  ;;  %vm8337_vm0 = vcmp.lt.s32.totalorder %v5911_v3, 7  ;;  %vm8336_vm2 = vcmp.lt.s32.totalorder %v5911_v3, 1  ;;  %p5647_p3 = pnand %p5646_p2, %p5642_p13 }
  0x26   : > { %1476 = vmatpush.bf16.msra.mxu1 %v5432_v46  ;;  %v401_v58 = vld [vmem:[%s5825_s26 + $0x80] sm:$0xff]  ;;  %v5451_v17 = vld [vmem:[%s8320_s3 + $0xb8] sm:$0xff]  ;;  %v5450_v21 = vld [vmem:[%s8320_s3 + $0xb0] sm:$0xff] }
  0x27   : > { %505 = vmatpush.bf16.msra.mxu0 %v5415_v4  ;;  %5521 = vmatpush.bf16.msra.mxu3 %v5415_v4  ;;  %v425_v60 = vpack.c.bf16 %v402_v59, %v401_v58  ;;  %v5906_v62 = vld [vmem:[%s8319_s2] ss:$0 sm:$0xff]  ;;  %v5449_v26 = vld [vmem:[%s8320_s3 + $0xa8] sm:$0xff]  ;;  %v5446_v42 = vld [vmem:[%s8320_s3 + $0x90] sm:$0xff] }
  0x28   : > { %v406_v29 = vld [vmem:[%s5825_s26 + $0xa8] sm:$0xff]  ;;  %v5448_v33 = vld [vmem:[%s8320_s3 + $0xa0] sm:$0xff]  ;;  %v408_v52 = vld [vmem:[%s5825_s26 + $0xb8] sm:$0xff] }
  0x29   : > { %1614 = vmatpush.bf16.msra.mxu2 %v5423_v44  ;;  %v5444_v59 = vld [vmem:[%s8320_s3 + $0x80] sm:$0xff] }
  0x2a   : > { %1477 = vmatpush.bf16.msra.mxu1 %v5431_v48 }
  0x2b   : > { %506 = vmatpush.bf16.msra.mxu0 %v5414_v5  ;;  %5522 = vmatpush.bf16.msra.mxu3 %v5414_v5 }
  0x2d   : > { %1615 = vmatpush.bf16.msra.mxu2 %v5422_v47 }
  0x2e   : > { %1478 = vmatpush.bf16.msra.mxu1 %v5430_v50 }
  0x2f   : > { %507 = vmatpush.bf16.msra.mxu0 %v5413_v6  ;;  %5523 = vmatpush.bf16.msra.mxu3 %v5413_v6 }
  0x31   : > { %1616 = vmatpush.bf16.msra.mxu2 %v5421_v49 }
  0x32   : > { %1479 = vmatpush.bf16.msra.mxu1 %v5429_v54 }
  0x33   : > { %508 = vmatpush.bf16.msra.mxu0 %v5412_v7  ;;  %5524 = vmatpush.bf16.msra.mxu3 %v5412_v7  ;;  %v403_v7 = vld [vmem:[%s5825_s26 + $0x90] sm:$0xff] }
  0x35   : > { %1617 = vmatpush.bf16.msra.mxu2 %v5420_v51 }
  0x36   : > { %509 = vmatmul.bf16.vlgmr.msra.gmra.mxu0 %v417_v12  ;;  %574 = vmatmul.bf16.vlgmr.msra.gmra.mxu3 %v430_v13  ;;  %v426_v13 = vpack.c.bf16 %v404_v8, %v403_v7 }
  0x37   : > { %5525 = vmatpush.bf16.msrb.mxu3 %v5435_v37  ;;  %1480 = vmatpush.bf16.msra.mxu1 %v5428_v56 }
  0x38   : > { %2271 = vmatpush.bf16.msrb.mxu0 %v5451_v17 }
  0x3a   : > { %1481 = vmatmul.bf16.vlgmr.msra.gmra.mxu1 %v8329_v57 }
  0x3b   : > { %5526 = vmatpush.bf16.msrb.mxu3 %v5434_v39 }
  0x3c   : > { %2272 = vmatpush.bf16.msrb.mxu0 %v5450_v21 }
  0x3f   : > { %5527 = vmatpush.bf16.msrb.mxu3 %v5433_v41 }
  0x40   : > { %2273 = vmatpush.bf16.msrb.mxu0 %v5449_v26 }
  0x43   : > { %5528 = vmatpush.bf16.msrb.mxu3 %v5432_v46 }
  0x44   : > { %2274 = vmatpush.bf16.msrb.mxu0 %v5448_v33  ;;  %v627_v33 = vadd.s32 32, %v5911_v3 }
  0x46   : > { %514 = vmatmul.bf16.gmra.mxu0 %v418_v18  ;;  %579 = vmatmul.bf16.gmra.mxu3 %v431_v19 }
  0x47   : > { %5529 = vmatpush.bf16.msrb.mxu3 %v5431_v48  ;;  %v625_v48 = vadd.s32 16, %v5911_v3 }
  0x49   : > { %v673_v58 = vand.u32 15, %v625_v48 }
  0x4b   : > { %5530 = vmatpush.bf16.msrb.mxu3 %v5430_v50  ;;  %vm1041_vm1 = vcmp.gt.s32.totalorder %v673_v58, 0  ;;  %v629_v58 = vadd.s32 48, %v5911_v3 }
  0x4c   : > { %vm6028_vm4 = vmpackc.low %vm8371_vm3, %vm1041_vm1 }
  0x4f   : > { %5531 = vmatpush.bf16.msrb.mxu3 %v5429_v54 }
  0x53   : > { %5532 = vmatpush.bf16.msrb.mxu3 %v5428_v56 }
  0x56   : > { %519 = vmatmul.bf16.gmra.mxu0 %v419_v24  ;;  %584 = vmatmul.bf16.gmra.mxu3 %v432_v25 }
  0x57   : > { %5533 = vmatpush.bf16.msra.mxu3 %v5427_v32 }
  0x5b   : > { %5534 = vmatpush.bf16.msra.mxu3 %v5426_v36 }
  0x5f   : > { %5535 = vmatpush.bf16.msra.mxu3 %v5425_v38  ;;  %v5447_v38 = vld [vmem:[%s8320_s3 + $0x98] sm:$0xff] }
  0x60   : > { %2275 = vmatpush.bf16.msrb.mxu0 %v5447_v38 }
  0x63   : > { %5536 = vmatpush.bf16.msra.mxu3 %v5424_v40 }
  0x64   : > { %2276 = vmatpush.bf16.msrb.mxu0 %v5446_v42 }
  0x66   : > { %524 = vmatmul.bf16.gmra.mxu0 %v420_v28  ;;  %v405_v28 = vld [vmem:[%s5825_s26 + $0xa0] sm:$0xff] }
  0x67   : > { %5537 = vmatpush.bf16.msra.mxu3 %v5423_v44  ;;  %v427_v34 = vpack.c.bf16 %v406_v29, %v405_v28 }
  0x6b   : > { %5538 = vmatpush.bf16.msra.mxu3 %v5422_v47 }
  0x6f   : > { %5539 = vmatpush.bf16.msra.mxu3 %v5421_v49  ;;  %v5445_v49 = vld [vmem:[%s8320_s3 + $0x88] sm:$0xff] }
  0x70   : > { %2277 = vmatpush.bf16.msrb.mxu0 %v5445_v49  ;;  %v8472_v49 = vmov 0 }
  0x73   : > { %5540 = vmatpush.bf16.msra.mxu3 %v5420_v51  ;;  %v407_v51 = vld [vmem:[%s5825_s26 + $0xb0] sm:$0xff] }
  0x74   : > { %2278 = vmatpush.bf16.msrb.mxu0 %v5444_v59 }
  0x76   : > { %529 = vmatmul.bf16.gmra.mxu0 %v421_v31 }
  0x86   : > { %534 = vmatmul.bf16.gmra.mxu0 %v422_v35 }
  0x96   : > { %539 = vmatmul.bf16.gmra.mxu0 %v423_v45 }
  0xa6   : > { %544 = vmatmul.bf16.gmra.mxu0 %v424_v55 }
  0xb3   : > { %v510_v61 = vpop.f32.mrf.mxu0 }
  0xb4   : > { %v511_v0 = vadd.f32 %v5906_v62, %v510_v61  ;;  %v428_v61 = vpack.c.bf16 %v408_v52, %v407_v51 }
  0xb6   : > { %549 = vmatmul.bf16.gmra.mxu0 %v425_v60  ;;  %v5913_v4 = vmax.f32 %v511_v0, 0.0 }
  0xb8   : > { %v1997_v9 = vrot.slane %v5913_v4, 1 }
  0xb9   : > { %v5909_v1 = vpop.f32.mrf.mxu3 }
  0xbb   : > { %v512_v2 = vpop.f32.mrf.mxu0 }
  0xbc   : > { %v513_v5 = vadd.f32 %v5906_v62, %v512_v2 }
  0xbe   : > { %v5916_v6 = vmax.f32 %v513_v5, 0.0 }
  0xc0   : > { %v1998_v10 = vrot.slane %v5916_v6, 1  ;;  %v5925_v11 = vpack.c.bf16 %v5916_v6, %v5913_v4  ;;  %v1201_v2 = vrot.slane %v5916_v6, 7 }
  0xc1   : > { %v5927_v12 = vpop.f32.mrf.mxu3 }
  0xc2   : > { %8463 = vst [vmem:[#allocation6_spill] sm:$0xff] %v5925_v11  ;;  %1618 = vmatmul.bf16.vlgmr.msra.gmra.mxu2 %v5925_v11  ;;  %v2060_v14 = vsel %vm8337_vm0, %v1997_v9, %v1998_v10 }
  0xc3   : > { %v515_v15 = vpop.f32.mrf.mxu0 }
  0xc4   : > { %v516_v16 = vadd.f32 %v5906_v62, %v515_v15 }
  0xc6   : > { %v5938_v18 = vmax.f32 %v516_v16, 0.0  ;;  %554 = vmatmul.bf16.gmra.mxu0 %v426_v13 }
  0xc8   : > { %v1999_v19 = vrot.slane %v5938_v18, 1 }
  0xc9   : > { %v5941_v20 = vpop.f32.mrf.mxu3 }
  0xca   : > { %v2059_v22 = vsel %vm8337_vm0, %v1998_v10, %v1999_v19  ;;  %v1200_v10 = vrot.slane %v5913_v4, 7 }
  0xcb   : > { %v517_v23 = vpop.f32.mrf.mxu0  ;;  %v5948_v24 = vpack.c.bf16 %v2059_v22, %v2060_v14 }
  0xcc   : > { %v518_v25 = vadd.f32 %v5906_v62, %v517_v23  ;;  %v1263_v16 = vsel %vm8336_vm2, %v1200_v10, %v1201_v2 }
  0xce   : > { %v5954_v27 = vmax.f32 %v518_v25, 0.0 }
  0xd0   : > { %v2000_v30 = vrot.slane %v5954_v27, 1  ;;  %v5961_v31 = vpack.c.bf16 %v5954_v27, %v5938_v18  ;;  %v1203_v38 = vrot.slane %v5954_v27, 7 }
  0xd1   : > { %v5963_v32 = vpop.f32.mrf.mxu3 }
  0xd2   : > { %8464 = vst [vmem:[#allocation7_spill] sm:$0xff] %v5961_v31  ;;  %1623 = vmatmul.bf16.gmra.mxu2 %v5961_v31  ;;  %v2058_v35 = vsel %vm8337_vm0, %v1999_v19, %v2000_v30  ;;  %v8466_v19 = vmov 0 }
  0xd3   : > { %v520_v36 = vpop.f32.mrf.mxu0  ;;  %v8467_v19 = vsel %vm6028_vm4, 4294967295, %v8466_v19 }
  0xd4   : > { %v521_v37 = vadd.f32 %v5906_v62, %v520_v36  ;;  %8468 = vst [vmem:[#allocation9_spill] sm:$0xff] %v8467_v19 }
  0xd6   : > { %v5975_v39 = vmax.f32 %v521_v37, 0.0  ;;  %559 = vmatmul.bf16.gmra.mxu0 %v427_v34  ;;  %v409_v34 = vld [vmem:[%s5825_s26 + $0xc0] sm:$0xff]  ;;  %v687_v37 = vand.u32 15, %v627_v33  ;;  %v583_v33 = vadd.f32 %v5906_v62, %v5963_v32 }
  0xd8   : > { %v2001_v40 = vrot.slane %v5975_v39, 1  ;;  %vm1043_vm5 = vcmp.gt.s32.totalorder %v687_v37, 0 }
  0xd9   : > { %v585_v41 = vpop.f32.mrf.mxu3  ;;  %vm6076_vm6 = vmpackc.low %vm8371_vm3, %vm1043_vm5 }
  0xda   : > { %v2057_v43 = vsel %vm8337_vm0, %v2000_v30, %v2001_v40  ;;  %v586_v46 = vadd.f32 %v5906_v62, %v585_v41  ;;  %v8473_v49 = vsel %vm6076_vm6, 4294967295, %v8472_v49 }
  0xdb   : > { %v522_v44 = vpop.f32.mrf.mxu0  ;;  %v5983_v45 = vpack.c.bf16 %v2057_v43, %v2058_v35  ;;  %v1202_v43 = vrot.slane %v5938_v18, 7  ;;  %8474 = vst [vmem:[#allocation13_spill] sm:$0xff] %v8473_v49 }
  0xdc   : > { %v523_v47 = vadd.f32 %v5906_v62, %v522_v44  ;;  %v5995_v53 = vmax.f32 %v586_v46, 0.0 }
  0xdd   : > { %v1262_v48 = vsel %vm8336_vm2, %v1201_v2, %v1202_v43 }
  0xde   : > { %v5991_v50 = vmax.f32 %v523_v47, 0.0  ;;  %v8331_v5 = vrot.slane %v5995_v53, 1  ;;  %v1261_v47 = vsel %vm8336_vm2, %v1202_v43, %v1203_v38 }
  0xdf   : > { %v6080_v18 = vpack.c.bf16 %v1261_v47, %v1262_v48 }
  0xe0   : > { %v2002_v54 = vrot.slane %v5991_v50, 1  ;;  %v6000_v55 = vpack.c.bf16 %v5991_v50, %v5975_v39 }
  0xe1   : > { %v587_v56 = vpop.f32.mrf.mxu3  ;;  %8475 = vst [vmem:[#allocation14_spill] sm:$0xff] %v6080_v18 }
  0xe2   : > { %8465 = vst [vmem:[#allocation8_spill] sm:$0xff] %v6000_v55  ;;  %v588_v60 = vadd.f32 %v5906_v62, %v587_v56  ;;  %1628 = vmatmul.bf16.gmra.mxu2 %v6000_v55  ;;  %v2056_v63 = vsel %vm8337_vm0, %v2001_v40, %v2002_v54 }
  0xe3   : > { %v525_v0 = vpop.f32.mrf.mxu0 }
  0xe4   : > { %v6011_v7 = vmax.f32 %v588_v60, 0.0  ;;  %v526_v8 = vadd.f32 %v5906_v62, %v525_v0  ;;  %v1205_v0 = vrot.slane %v5991_v50, 7 }
  0xe6   : > { %v1231_v13 = vrot.slane %v6011_v7, 7  ;;  %v2028_v14 = vrot.slane %v6011_v7, 1  ;;  %v6018_v15 = vmax.f32 %v526_v8, 0.0  ;;  %564 = vmatmul.bf16.gmra.mxu0 %v428_v61 }
  0xe8   : > { %v2003_v6 = vrot.slane %v6018_v15, 1  ;;  %v1264_v17 = vsel %vm8336_vm2, %v1231_v13, %v1200_v10  ;;  %v2030_v21 = vsel %vm8337_vm0, %v8331_v5, %v2028_v14  ;;  %v2061_v23 = vsel %vm8337_vm0, %v2028_v14, %v1997_v9  ;;  %v410_v9 = vld [vmem:[%s5825_s26 + $0xc8] sm:$0xff] }
  0xe9   : > { %v6036_v22 = vpack.c.bf16 %v1263_v16, %v1264_v17  ;;  %v6044_v26 = vpack.c.bf16 %v2061_v23, %v2030_v21  ;;  %v429_v40 = vpack.c.bf16 %v410_v9, %v409_v34  ;;  %v1204_v10 = vrot.slane %v5975_v39, 7 }
  0xea   : > { %v2055_v25 = vsel %vm8337_vm0, %v2002_v54, %v2003_v6  ;;  %v8477_v21 = vmov 0  ;;  %v626_v39 = vadd.s32 24, %v5911_v3 }
  0xeb   : > { %8469 = vst [vmem:[#allocation10_spill] sm:$0xff] %v6044_v26  ;;  %v527_v28 = vpop.f32.mrf.mxu0  ;;  %4667 = vmatmul.msk.bf16.gmra.mxu1 %vm6028_vm4, %v6036_v22  ;;  %v6049_v29 = vpack.c.bf16 %v2055_v25, %v2056_v63  ;;  %v701_v63 = vand.u32 15, %v629_v58  ;;  %v1259_v16 = vsel %vm8336_vm2, %v1204_v10, %v1205_v0  ;;  %v1260_v17 = vsel %vm8336_vm2, %v1203_v38, %v1204_v10 }
  0xec   : > { %v528_v30 = vadd.f32 %v5906_v62, %v527_v28  ;;  %v6118_v23 = vpack.c.bf16 %v1259_v16, %v1260_v17  ;;  %v680_v9 = vand.u32 15, %v626_v39  ;;  %v6133_v38 = vmax.f32 %v583_v33, 0.0 }
  0xed   : > { %8470 = vst [vmem:[#allocation11_spill] sm:$0xff] %v6049_v29  ;;  %vm1045_vm7 = vcmp.gt.s32.totalorder %v701_v63, 0  ;;  %v633_v39 = vadd.s32 80, %v5911_v3 }
  0xee   : > { %v6053_v4 = vmax.f32 %v528_v30, 0.0  ;;  %vm6113_vm8 = vmpackc.low %vm8371_vm3, %vm1045_vm7  ;;  %8480 = vst [vmem:[#allocation17_spill] sm:$0xff] %v6118_v23  ;;  %vm1074_vm9 = vcmp.lt.s32.totalorder %v680_v9, 15  ;;  %v8332_v48 = vrot.slane %v6133_v38, 7 }
  0xef   : > { %v8478_v21 = vsel %vm6113_vm8, 4294967295, %v8477_v21  ;;  %vm6146_vm10 = vmpackc.low %vm1074_vm9, %vm8371_vm3  ;;  %v729_v9 = vand.u32 15, %v633_v39 }
  0xf0   : > { %v2004_v35 = vrot.slane %v6053_v4, 1  ;;  %v6060_v36 = vpack.c.bf16 %v6053_v4, %v6018_v15  ;;  %8479 = vst [vmem:[#allocation16_spill] sm:$0xff] %v8478_v21  ;;  %v1207_v32 = vrot.slane %v6053_v4, 7  ;;  %v5491_v21 = vld [vmem:[%s8320_s3 + $0x238] sm:$0xff] }
  0xf1   : > { %vm1049_vm15 = vcmp.gt.s32.totalorder %v729_v9, 0 }
  0xf2   : > { %8471 = vst [vmem:[#allocation12_spill] sm:$0xff] %v6060_v36  ;;  %1633 = vmatmul.bf16.gmra.mxu2 %v6060_v36  ;;  %v2054_v41 = vsel %vm8337_vm0, %v2003_v6, %v2004_v35  ;;  %vm6222_vm1 = vmpackc.low %vm8371_vm3, %vm1049_vm15 }
  0xf3   : > { %v530_v42 = vpop.f32.mrf.mxu0 }
  0xf4   : > { %v531_v44 = vadd.f32 %v5906_v62, %v530_v42  ;;  %v1230_v42 = vrot.slane %v5995_v53, 7 }
  0xf6   : > { %v6068_v46 = vmax.f32 %v531_v44, 0.0  ;;  %569 = vmatmul.bf16.gmra.mxu0 %v429_v40  ;;  %v1233_v4 = vsel %vm8336_vm2, %v1230_v42, %v1231_v13 }
  0xf8   : > { %v2005_v27 = vrot.slane %v6068_v46, 1 }
  0xfa   : > { %v2053_v51 = vsel %vm8337_vm0, %v2004_v35, %v2005_v27  ;;  %v631_v35 = vadd.s32 64, %v5911_v3 }
  0xfb   : > { %v532_v52 = vpop.f32.mrf.mxu0  ;;  %4670 = vmatmul.msk.bf16.gmra.mxu1 %vm6076_vm6, %v6080_v18  ;;  %v6087_v54 = vpack.c.bf16 %v2053_v51, %v2054_v41  ;;  %v1206_v51 = vrot.slane %v6018_v15, 7  ;;  %v1234_v15 = vsel %vm8336_vm2, %v8332_v48, %v1230_v42 }
  0xfc   : > { %v533_v56 = vadd.f32 %v5906_v62, %v532_v52  ;;  %v715_v43 = vand.u32 15, %v631_v35 }
  0xfd   : > { %v1257_v58 = vsel %vm8336_vm2, %v1206_v51, %v1207_v32  ;;  %v1258_v13 = vsel %vm8336_vm2, %v1205_v0, %v1206_v51 }
  0xfe   : > { %v6091_v59 = vmax.f32 %v533_v56, 0.0  ;;  %vm1047_vm11 = vcmp.gt.s32.totalorder %v715_v43, 0  ;;  %v6179_v10 = vpack.c.bf16 %v1257_v58, %v1258_v13  ;;  %v8491_v43 = vmov 0 }
  0xff   : > { %vm6174_vm12 = vmpackc.low %vm8371_vm3, %vm1047_vm11  ;;  %v630_v58 = vadd.s32 56, %v5911_v3 }
 0x100   : > { %v2006_v60 = vrot.slane %v6091_v59, 1  ;;  %v6096_v61 = vpack.c.bf16 %v6091_v59, %v6068_v46  ;;  %8489 = vst [vmem:[#allocation22_spill] sm:$0xff] %v6179_v10  ;;  %v1209_v35 = vrot.slane %v6091_v59, 7 }
 0x102   : > { %8476 = vst [vmem:[#allocation15_spill] sm:$0xff] %v6096_v61  ;;  %1638 = vmatmul.bf16.gmra.mxu2 %v6096_v61  ;;  %v2052_v2 = vsel %vm8337_vm0, %v2005_v27, %v2006_v60  ;;  %v8482_v27 = vmov 0 }
 0x103   : > { %v535_v8 = vpop.f32.mrf.mxu0  ;;  %v8483_v27 = vsel %vm6146_vm10, 4294967295, %v8482_v27 }
 0x104   : > { %v536_v14 = vadd.f32 %v5906_v62, %v535_v8  ;;  %8484 = vst [vmem:[#allocation19_spill] sm:$0xff] %v8483_v27  ;;  %v628_v8 = vadd.s32 40, %v5911_v3 }
 0x106   : > { %v6104_v6 = vmax.f32 %v536_v14, 0.0  ;;  %2279 = vmatmul.bf16.vlgmr.msrb.gmra.mxu0 %v8329_v57  ;;  %v694_v17 = vand.u32 15, %v628_v8 }
 0x108   : > { %v2007_v50 = vrot.slane %v6104_v6, 1  ;;  %vm1076_vm13 = vcmp.lt.s32.totalorder %v694_v17, 15 }
 0x109   : > { %vm6205_vm14 = vmpackc.low %vm1076_vm13, %vm8371_vm3 }
 0x10a   : > { %v2051_v25 = vsel %vm8337_vm0, %v2006_v60, %v2007_v50  ;;  %v6168_v60 = vpack.c.bf16 %v1233_v4, %v1234_v15  ;;  %v8492_v43 = vsel %vm6205_vm14, 4294967295, %v8491_v43 }
 0x10b   : > { %v537_v28 = vpop.f32.mrf.mxu0  ;;  %4673 = vmatmul.msk.bf16.gmra.mxu1 %vm6113_vm8, %v6118_v23  ;;  %v6125_v30 = vpack.c.bf16 %v2051_v25, %v2052_v2  ;;  %v8486_v2 = vmov 0  ;;  %8493 = vst [vmem:[#allocation24_spill] sm:$0xff] %v8492_v43  ;;  %v8593_v43 = vmov 0 }
 0x10c   : > { %v538_v34 = vadd.f32 %v5906_v62, %v537_v28  ;;  %8485 = vst [vmem:[#allocation20_spill] sm:$0xff] %v6168_v60  ;;  %v8487_v2 = vsel %vm6174_vm12, 4294967295, %v8486_v2  ;;  %v5460_v60 = vld [vmem:[%s8320_s3 + $0x140] sm:$0xff] }
 0x10d   : > { %8488 = vst [vmem:[#allocation21_spill] sm:$0xff] %v8487_v2 }
 0x10e   : > { %v6131_v37 = vmax.f32 %v538_v34, 0.0  ;;  %v5459_v34 = vld [vmem:[%s8320_s3 + $0xf8] sm:$0xff] }
 0x10f   : > { %2569 = vmatpush.bf16.msrb.mxu1 %v5459_v34  ;;  %v5467_v34 = vld [vmem:[%s8320_s3 + $0x178] sm:$0xff] }
 0x110   : > { %v2008_v40 = vrot.slane %v6131_v37, 1  ;;  %v6138_v41 = vpack.c.bf16 %v6131_v37, %v6104_v6  ;;  %v1211_v9 = vrot.slane %v6131_v37, 7  ;;  %2867 = vmatpush.bf16.msrb.mxu2 %v5467_v34  ;;  %v5466_v37 = vld [vmem:[%s8320_s3 + $0x170] sm:$0xff] }
 0x112   : > { %8481 = vst [vmem:[#allocation18_spill] sm:$0xff] %v6138_v41  ;;  %1643 = vmatmul.bf16.gmra.mxu2 %v6138_v41  ;;  %v2050_v44 = vsel %vm8337_vm0, %v2007_v50, %v2008_v40  ;;  %v641_v41 = vadd.s32 144, %v5911_v3 }
 0x113   : > { %v540_v47 = vpop.f32.mrf.mxu0 }
 0x114   : > { %v541_v52 = vadd.f32 %v5906_v62, %v540_v47  ;;  %2868 = vmatpush.bf16.msrb.mxu2 %v5466_v37  ;;  %v5464_v37 = vld [vmem:[%s8320_s3 + $0x160] sm:$0xff] }
 0x116   : > { %v6157_v56 = vmax.f32 %v541_v52, 0.0  ;;  %4840 = vmatmul.msk.bf16.gmra.mxu0 %vm6146_vm10, %v5948_v24 }
 0x118   : > { %v2009_v63 = vrot.slane %v6157_v56, 1 }
 0x11a   : > { %v2049_v14 = vsel %vm8337_vm0, %v2008_v40, %v2009_v63 }
 0x11b   : > { %v542_v16 = vpop.f32.mrf.mxu0  ;;  %4676 = vmatmul.msk.bf16.gmra.mxu1 %vm6174_vm12, %v6179_v10  ;;  %v6186_v50 = vpack.c.bf16 %v2049_v14, %v2050_v44  ;;  %v1208_v44 = vrot.slane %v6068_v46, 7  ;;  %v8494_v46 = vmov 0  ;;  %v708_v14 = vand.u32 15, %v630_v58 }
 0x11c   : > { %v543_v0 = vadd.f32 %v5906_v62, %v542_v16  ;;  %v8495_v46 = vsel %vm6222_vm1, 4294967295, %v8494_v46  ;;  %v635_v16 = vadd.s32 96, %v5911_v3 }
 0x11d   : > { %v1255_v59 = vsel %vm8336_vm2, %v1208_v44, %v1209_v35  ;;  %v1256_v4 = vsel %vm8336_vm2, %v1207_v32, %v1208_v44  ;;  %8496 = vst [vmem:[#allocation25_spill] sm:$0xff] %v8495_v46  ;;  %vm1078_vm5 = vcmp.lt.s32.totalorder %v708_v14, 15  ;;  %v8499_v44 = vmov 0 }
 0x11e   : > { %v6190_v25 = vmax.f32 %v543_v0, 0.0  ;;  %v6227_v15 = vpack.c.bf16 %v1255_v59, %v1256_v4  ;;  %vm6253_vm7 = vmpackc.low %vm1078_vm5, %vm8371_vm3 }
 0x11f   : > { %v8500_v44 = vsel %vm6253_vm7, 4294967295, %v8499_v44 }
 0x120   : > { %v2010_v28 = vrot.slane %v6190_v25, 1  ;;  %v6195_v33 = vpack.c.bf16 %v6190_v25, %v6157_v56  ;;  %8497 = vst [vmem:[#allocation26_spill] sm:$0xff] %v6227_v15 }
 0x121   : > { %8501 = vst [vmem:[#allocation28_spill] sm:$0xff] %v8500_v44 }
 0x122   : > { %8490 = vst [vmem:[#allocation23_spill] sm:$0xff] %v6195_v33  ;;  %1648 = vmatmul.bf16.gmra.mxu2 %v6195_v33  ;;  %v2048_v40 = vsel %vm8337_vm0, %v2009_v63, %v2010_v28 }
 0x123   : > { %v545_v42 = vpop.f32.mrf.mxu0 }
 0x124   : > { %v546_v47 = vadd.f32 %v5906_v62, %v545_v42 }
 0x126   : > { %v6211_v51 = vmax.f32 %v546_v47, 0.0  ;;  %4843 = vmatmul.msk.bf16.gmra.mxu0 %vm6205_vm14, %v5983_v45  ;;  %v1210_v47 = vrot.slane %v6104_v6, 7 }
 0x128   : > { %v2011_v52 = vrot.slane %v6211_v51, 1  ;;  %v1254_v6 = vsel %vm8336_vm2, %v1209_v35, %v1210_v47 }
 0x12a   : > { %v2047_v63 = vsel %vm8337_vm0, %v2010_v28, %v2011_v52  ;;  %v743_v28 = vand.u32 15, %v635_v16  ;;  %v5465_v16 = vld [vmem:[%s8320_s3 + $0x168] sm:$0xff] }
 0x12b   : > { %v547_v13 = vpop.f32.mrf.mxu0  ;;  %4679 = vmatmul.msk.bf16.gmra.mxu1 %vm6222_vm1, %v6227_v15  ;;  %v6234_v8 = vpack.c.bf16 %v2047_v63, %v2048_v40  ;;  %v8502_v63 = vmov 0  ;;  %2869 = vmatpush.bf16.msrb.mxu2 %v5465_v16 }
 0x12c   : > { %v548_v32 = vadd.f32 %v5906_v62, %v547_v13  ;;  %vm1051_vm9 = vcmp.gt.s32.totalorder %v743_v28, 0  ;;  %v632_v13 = vadd.s32 72, %v5911_v3 }
 0x12d   : > { %vm6273_vm11 = vmpackc.low %vm8371_vm3, %vm1051_vm9 }
 0x12e   : > { %v6238_v0 = vmax.f32 %v548_v32, 0.0  ;;  %v8503_v63 = vsel %vm6273_vm11, 4294967295, %v8502_v63  ;;  %v5458_v32 = vld [vmem:[%s8320_s3 + $0xf0] sm:$0xff] }
 0x12f   : > { %8504 = vst [vmem:[#allocation29_spill] sm:$0xff] %v8503_v63  ;;  %2570 = vmatpush.bf16.msrb.mxu1 %v5458_v32  ;;  %2870 = vmatpush.bf16.msrb.mxu2 %v5464_v37  ;;  %v1213_v32 = vrot.slane %v6190_v25, 7  ;;  %v5462_v25 = vld [vmem:[%s8320_s3 + $0x150] sm:$0xff]  ;;  %v645_v63 = vadd.s32 176, %v5911_v3 }
 0x130   : > { %v2012_v17 = vrot.slane %v6238_v0, 1  ;;  %v6243_v39 = vpack.c.bf16 %v6238_v0, %v6211_v51 }
 0x132   : > { %8498 = vst [vmem:[#allocation27_spill] sm:$0xff] %v6243_v39  ;;  %1653 = vmatmul.bf16.gmra.mxu2 %v6243_v39  ;;  %v2046_v40 = vsel %vm8337_vm0, %v2011_v52, %v2012_v17  ;;  %v1253_v52 = vsel %vm8336_vm2, %v1210_v47, %v1211_v9  ;;  %v722_v47 = vand.u32 15, %v632_v13  ;;  %v5463_v13 = vld [vmem:[%s8320_s3 + $0x158] sm:$0xff] }
 0x133   : > { %v550_v42 = vpop.f32.mrf.mxu0  ;;  %v6281_v14 = vpack.c.bf16 %v1253_v52, %v1254_v6  ;;  %2871 = vmatpush.bf16.msrb.mxu2 %v5463_v13 }
 0x134   : > { %v551_v59 = vadd.f32 %v5906_v62, %v550_v42  ;;  %vm1080_vm13 = vcmp.lt.s32.totalorder %v722_v47, 15  ;;  %v1212_v47 = vrot.slane %v6157_v56, 7 }
 0x135   : > { %8505 = vst [vmem:[#allocation30_spill] sm:$0xff] %v6281_v14  ;;  %vm6313_vm15 = vmpackc.low %vm1080_vm13, %vm8371_vm3 }
 0x136   : > { %v6262_v4 = vmax.f32 %v551_v59, 0.0  ;;  %4846 = vmatmul.msk.bf16.gmra.mxu0 %vm6253_vm7, %v6049_v29  ;;  %v637_v59 = vadd.s32 112, %v5911_v3  ;;  %v1251_v13 = vsel %vm8336_vm2, %v1212_v47, %v1213_v32 }
 0x137   : > { %2872 = vmatpush.bf16.msrb.mxu2 %v5462_v25 }
 0x138   : > { %v2013_v58 = vrot.slane %v6262_v4, 1 }
 0x13a   : > { %v2045_v35 = vsel %vm8337_vm0, %v2012_v17, %v2013_v58 }
 0x13b   : > { %v552_v28 = vpop.f32.mrf.mxu0  ;;  %4682 = vmatmul.msk.bf16.gmra.mxu1 %vm6273_vm11, %v6281_v14  ;;  %v6291_v34 = vpack.c.bf16 %v2045_v35, %v2046_v40  ;;  %v757_v40 = vand.u32 15, %v637_v59 }
 0x13c   : > { %v553_v42 = vadd.f32 %v5906_v62, %v552_v28  ;;  %v1482_v28 = vpop.f32.mrf.mxu1 }
 0x13d   : > { %vm1053_vm5 = vcmp.gt.s32.totalorder %v757_v40, 0  ;;  %v1252_v40 = vsel %vm8336_vm2, %v1211_v9, %v1212_v47 }
 0x13e   : > { %v6298_v52 = vmax.f32 %v553_v42, 0.0  ;;  %vm6335_vm9 = vmpackc.low %vm8371_vm3, %vm1053_vm5 }
 0x140   : > { %v2014_v17 = vrot.slane %v6298_v52, 1  ;;  %v6303_v6 = vpack.c.bf16 %v6298_v52, %v6262_v4 }
 0x142   : > { %8506 = vst [vmem:[#allocation31_spill] sm:$0xff] %v6303_v6  ;;  %1658 = vmatmul.bf16.gmra.mxu2 %v6303_v6  ;;  %v2044_v16 = vsel %vm8337_vm0, %v2013_v58, %v2014_v17 }
 0x143   : > { %v555_v35 = vpop.f32.mrf.mxu0 }
 0x144   : > { %v556_v59 = vadd.f32 %v5906_v62, %v555_v35  ;;  %v8510_v35 = vmov 0 }
 0x145   : > { %v1619_v37 = vpop.f32.mrf.mxu2  ;;  %v8511_v35 = vsel %vm6335_vm9, 4294967295, %v8510_v35 }
 0x146   : > { %v6322_v57 = vmax.f32 %v556_v59, 0.0  ;;  %v6324_v58 = vadd.f32 %v1619_v37, %v1482_v28  ;;  %4849 = vmatmul.msk.bf16.gmra.mxu0 %vm6313_vm15, %v6087_v54  ;;  %8512 = vst [vmem:[#allocation33_spill] sm:$0xff] %v8511_v35  ;;  %v634_v28 = vadd.s32 88, %v5911_v3  ;;  %v6340_v59 = vpack.c.bf16 %v1251_v13, %v1252_v40  ;;  %v5461_v37 = vld [vmem:[%s8320_s3 + $0x148] sm:$0xff] }
 0x147   : > { %2873 = vmatpush.bf16.msrb.mxu2 %v5461_v37  ;;  %v639_v40 = vadd.s32 128, %v5911_v3 }
 0x148   : > { %8509 = vst [vmem:[#allocation32_spill] sm:$0xff] %v6324_v58  ;;  %v2015_v56 = vrot.slane %v6322_v57, 1  ;;  %v736_v48 = vand.u32 15, %v634_v28  ;;  %v1215_v28 = vrot.slane %v6238_v0, 7 }
 0x149   : > { %8513 = vst [vmem:[#allocation34_spill] sm:$0xff] %v6340_v59 }
 0x14a   : > { %v2043_v25 = vsel %vm8337_vm0, %v2014_v17, %v2015_v56  ;;  %vm1082_vm13 = vcmp.lt.s32.totalorder %v736_v48, 15 }
 0x14b   : > { %v557_v5 = vpop.f32.mrf.mxu0  ;;  %4685 = vmatmul.msk.bf16.gmra.mxu1 %vm6335_vm9, %v6340_v59  ;;  %v6350_v9 = vpack.c.bf16 %v2043_v25, %v2044_v16  ;;  %2874 = vmatpush.bf16.msrb.mxu2 %v5460_v60  ;;  %vm6371_vm5 = vmpackc.low %vm1082_vm13, %vm8371_vm3  ;;  %v1214_v60 = vrot.slane %v6211_v51, 7  ;;  %v8520_v51 = vmov 0 }
 0x14c   : > { %v558_v47 = vadd.f32 %v5906_v62, %v557_v5  ;;  %v771_v5 = vand.u32 15, %v639_v40 }
 0x14d   : > { %v6353_v13 = vpop.f32.mrf.mxu2 }
 0x14e   : > { %8514 = vst [vmem:[#allocation35_spill] sm:$0xff] %v6353_v13  ;;  %v6359_v17 = vmax.f32 %v558_v47, 0.0  ;;  %vm1055_vm2 = vcmp.gt.s32.totalorder %v771_v5, 0  ;;  %v5457_v5 = vld [vmem:[%s8320_s3 + $0xe8] sm:$0xff] }
 0x14f   : > { %vm6388_vm9 = vmpackc.low %vm8371_vm3, %vm1055_vm2  ;;  %2571 = vmatpush.bf16.msrb.mxu1 %v5457_v5  ;;  %v785_v5 = vand.u32 15, %v641_v41 }
 0x150   : > { %v2016_v58 = vrot.slane %v6359_v17, 1  ;;  %v6364_v16 = vpack.c.bf16 %v6359_v17, %v6322_v57  ;;  %v8521_v51 = vsel %vm6388_vm9, 4294967295, %v8520_v51 }
 0x151   : > { %8522 = vst [vmem:[#allocation37_spill] sm:$0xff] %v8521_v51 }
 0x152   : > { %8515 = vst [vmem:[#allocation36_spill] sm:$0xff] %v6364_v16  ;;  %1663 = vmatmul.bf16.gmra.mxu2 %v6364_v16  ;;  %v2042_v37 = vsel %vm8337_vm0, %v2015_v56, %v2016_v58  ;;  %vm8518_vm0 = vcmp.lt.s32.totalorder %v5911_v3, 1 }
 0x153   : > { %v560_v25 = vpop.f32.mrf.mxu0  ;;  %v1249_v0 = vsel %vm8518_vm0, %v1214_v60, %v1215_v28  ;;  %vm8519_vm13 = vmmov %vm8518_vm0  ;;  %vm8524_vm0 = vcmp.lt.s32.totalorder %v5911_v3, 7 }
 0x154   : > { %v561_v13 = vadd.f32 %v5906_v62, %v560_v25  ;;  %v1250_v40 = vsel %vm8519_vm13, %v1213_v32, %v1214_v60  ;;  %vm8527_vm13 = vmmov %vm8524_vm0 }
 0x155   : > { %v1624_v6 = vpop.f32.mrf.mxu2  ;;  %v6396_v25 = vpack.c.bf16 %v1249_v0, %v1250_v40  ;;  %v6409_v0 = vpop.f32.mrf.mxu1 }
 0x156   : > { %v6377_v48 = vmax.f32 %v561_v13, 0.0  ;;  %4852 = vmatmul.msk.bf16.gmra.mxu0 %vm6371_vm5, %v6125_v30  ;;  %v636_v13 = vadd.s32 104, %v5911_v3  ;;  %8525 = vst [vmem:[#allocation39_spill] sm:$0xff] %v6409_v0 }
 0x157   : > { %8523 = vst [vmem:[#allocation38_spill] sm:$0xff] %v6396_v25 }
 0x158   : > { %v2017_v56 = vrot.slane %v6377_v48, 1  ;;  %v750_v26 = vand.u32 15, %v636_v13  ;;  %v8528_v13 = vmov 0 }
 0x15a   : > { %v2041_v16 = vsel %vm8524_vm0, %v2016_v58, %v2017_v56  ;;  %vm1084_vm2 = vcmp.lt.s32.totalorder %v750_v26, 15  ;;  %v624_v26 = vadd.s32 8, %v5911_v3 }
 0x15b   : > { %v562_v39 = vpop.f32.mrf.mxu0  ;;  %4688 = vmatmul.msk.bf16.gmra.mxu1 %vm6388_vm9, %v6396_v25  ;;  %v6403_v32 = vpack.c.bf16 %v2041_v16, %v2042_v37  ;;  %v1217_v16 = vrot.slane %v6298_v52, 7  ;;  %vm6421_vm0 = vmpackc.low %vm1084_vm2, %vm8371_vm3  ;;  %vm1057_vm9 = vcmp.gt.s32.totalorder %v785_v5, 0  ;;  %v638_v5 = vadd.s32 120, %v5911_v3 }
 0x15c   : > { %v563_v60 = vadd.f32 %v5906_v62, %v562_v39  ;;  %v8529_v13 = vsel %vm6421_vm0, 4294967295, %v8528_v13  ;;  %vm6439_vm11 = vmpackc.low %vm8371_vm3, %vm1057_vm9 }
 0x15d   : > { %v1626_v33 = vpop.f32.mrf.mxu2  ;;  %8530 = vst [vmem:[#allocation41_spill] sm:$0xff] %v8529_v13 }
 0x15e   : > { %v6407_v61 = vmax.f32 %v563_v60, 0.0  ;;  %v1216_v60 = vrot.slane %v6262_v4, 7 }
 0x160   : > { %v2018_v40 = vrot.slane %v6407_v61, 1  ;;  %v6414_v58 = vpack.c.bf16 %v6407_v61, %v6377_v48 }
 0x162   : > { %8526 = vst [vmem:[#allocation40_spill] sm:$0xff] %v6414_v58  ;;  %1668 = vmatmul.bf16.gmra.mxu2 %v6414_v58  ;;  %v2040_v39 = vsel %vm8527_vm13, %v2017_v56, %v2018_v40  ;;  %vm8531_vm13 = vcmp.lt.s32.totalorder %v5911_v3, 1 }
 0x163   : > { %v565_v37 = vpop.f32.mrf.mxu0  ;;  %v1247_v56 = vsel %vm8531_vm13, %v1216_v60, %v1217_v16  ;;  %vm8532_vm2 = vmmov %vm8531_vm13  ;;  %vm8538_vm13 = vcmp.lt.s32.totalorder %v5911_v3, 7 }
 0x164   : > { %v566_v0 = vadd.f32 %v5906_v62, %v565_v37  ;;  %v1248_v4 = vsel %vm8532_vm2, %v1215_v28, %v1216_v60  ;;  %v8533_v37 = vmov 0  ;;  %v764_v60 = vand.u32 15, %v638_v5 }
 0x165   : > { %v1629_v41 = vpop.f32.mrf.mxu2  ;;  %v8534_v37 = vsel %vm6439_vm11, 4294967295, %v8533_v37  ;;  %v6446_v35 = vpack.c.bf16 %v1247_v56, %v1248_v4  ;;  %v8376_v4 = vrot.slane %v6359_v17, 7  ;;  %v8543_v5 = vmov 0 }
 0x166   : > { %v6428_v52 = vmax.f32 %v566_v0, 0.0  ;;  %4855 = vmatmul.msk.bf16.gmra.mxu0 %vm6421_vm0, %v6186_v50  ;;  %8535 = vst [vmem:[#allocation42_spill] sm:$0xff] %v8534_v37  ;;  %v666_v0 = vand.u32 15, %v624_v26  ;;  %v643_v26 = vadd.s32 160, %v5911_v3 }
 0x167   : > { %8537 = vst [vmem:[#allocation44_spill] sm:$0xff] %v6446_v35 }
 0x168   : > { %v2019_v58 = vrot.slane %v6428_v52, 1  ;;  %v1487_v51 = vpop.f32.mrf.mxu1  ;;  %vm1072_vm9 = vcmp.lt.s32.totalorder %v666_v0, 15 }
 0x169   : > { %v6444_v36 = vadd.f32 %v1624_v6, %v1487_v51  ;;  %v5456_v6 = vld [vmem:[%s8320_s3 + $0xe0] sm:$0xff]  ;;  %vm6461_vm2 = vmpackc.low %vm1072_vm9, %vm8371_vm3 }
 0x16a   : > { %v2039_v25 = vsel %vm8538_vm13, %v2018_v40, %v2019_v58  ;;  %v8539_v40 = vmov 0  ;;  %2572 = vmatpush.bf16.msrb.mxu1 %v5456_v6  ;;  %vm1086_vm13 = vcmp.lt.s32.totalorder %v764_v60, 15  ;;  %v1218_v6 = vrot.slane %v6322_v57, 7 }
 0x16b   : > { %8536 = vst [vmem:[#allocation43_spill] sm:$0xff] %v6444_v36  ;;  %v567_v55 = vpop.f32.mrf.mxu0  ;;  %4691 = vmatmul.msk.bf16.gmra.mxu1 %vm6439_vm11, %v6446_v35  ;;  %v6453_v28 = vpack.c.bf16 %v2039_v25, %v2040_v39  ;;  %v8540_v40 = vsel %vm6461_vm2, 4294967295, %v8539_v40  ;;  %v799_v39 = vand.u32 15, %v643_v26  ;;  %vm6474_vm9 = vmpackc.low %vm1086_vm13, %vm8371_vm3  ;;  %vm8545_vm13 = vcmp.lt.s32.totalorder %v5911_v3, 1 }
 0x16c   : > { %v568_v51 = vadd.f32 %v5906_v62, %v567_v55  ;;  %8541 = vst [vmem:[#allocation45_spill] sm:$0xff] %v8540_v40  ;;  %v8544_v5 = vsel %vm6474_vm9, 4294967295, %v8543_v5  ;;  %v576_v57 = vadd.f32 %v5906_v62, %v5909_v1  ;;  %vm8546_vm3 = vmmov %vm8545_vm13  ;;  %v5455_v1 = vld [vmem:[%s8320_s3 + $0xd8] sm:$0xff] }
 0x16d   : > { %v1631_v11 = vpop.f32.mrf.mxu2  ;;  %vm1059_vm11 = vcmp.gt.s32.totalorder %v799_v39, 0 }
 0x16e   : > { %v6468_v0 = vmax.f32 %v568_v51, 0.0  ;;  %2573 = vmatpush.bf16.msrb.mxu1 %v5455_v1 }
 0x170   : > { %v1489_v56 = vpop.f32.mrf.mxu1  ;;  %v2020_v26 = vrot.slane %v6468_v0, 1 }
 0x171   : > { %v6465_v25 = vadd.f32 %v1626_v33, %v1489_v56  ;;  %v649_v56 = vadd.s32 208, %v5911_v3 }
 0x172   : > { %5029 = vmatmul.msk.bf16.vlgmr.msrb.gmra.mxu2 %vm6461_vm2, %v5948_v24  ;;  %v1245_v24 = vsel %vm8545_vm13, %v1218_v6, %v8376_v4  ;;  %vm8547_vm2 = vmmov 1   ;;  %vm8553_vm13 = vcmp.lt.s32.totalorder %v5911_v3, 7 }
 0x173   : > { %8542 = vst [vmem:[#allocation46_spill] sm:$0xff] %v6465_v25  ;;  %v570_v55 = vpop.f32.mrf.mxu0  ;;  %vm6497_vm1 = vmpackc.low %vm8547_vm2, %vm1059_vm11  ;;  %v8548_v25 = vmov 0  ;;  %vm8558_vm11 = vcmp.lt.s32.totalorder %v5911_v3, 1 }
 0x174   : > { %v571_v33 = vadd.f32 %v5906_v62, %v570_v55  ;;  %v640_v55 = vadd.s32 136, %v5911_v3  ;;  %v8549_v25 = vsel %vm6497_vm1, 4294967295, %v8548_v25  ;;  %vm8554_vm12 = vmmov %vm8553_vm13 }
 0x175   : > { %v6480_v60 = vpop.f32.mrf.mxu2  ;;  %8550 = vst [vmem:[#allocation47_spill] sm:$0xff] %v8549_v25  ;;  %v2038_v35 = vsel %vm8554_vm12, %v2019_v58, %v2020_v26  ;;  %v5454_v58 = vld [vmem:[%s8320_s3 + $0xd0] sm:$0xff] }
 0x176   : > { %v614_v51 = vmax.f32 %v571_v33, 0.0  ;;  %4858 = vmatmul.msk.bf16.gmra.mxu0 %vm6474_vm9, %v6234_v8  ;;  %v1246_v33 = vsel %vm8546_vm3, %v1217_v16, %v1218_v6  ;;  %v6512_v16 = vmax.f32 %v576_v57, 0.0  ;;  %2574 = vmatpush.bf16.msrb.mxu1 %v5454_v58  ;;  %v578_v57 = vadd.f32 %v5906_v62, %v5927_v12 }
 0x177   : > { %v6503_v4 = vpack.c.bf16 %v1245_v24, %v1246_v33 }
 0x178   : > { %v2021_v39 = vrot.slane %v614_v51, 1  ;;  %v1492_v40 = vpop.f32.mrf.mxu1  ;;  %v1224_v59 = vrot.slane %v614_v51, 7 }
 0x179   : > { %v6501_v36 = vadd.f32 %v1629_v41, %v1492_v40  ;;  %8552 = vst [vmem:[#allocation49_spill] sm:$0xff] %v6503_v4  ;;  %v841_v41 = vand.u32 15, %v649_v56  ;;  %v778_v40 = vand.u32 15, %v640_v55 }
 0x17a   : > { %v2037_v37 = vsel %vm8553_vm13, %v2020_v26, %v2021_v39  ;;  %v8395_v26 = vrot.slane %v6512_v16, 1  ;;  %vm8559_vm13 = vmmov %vm8558_vm11 }
 0x17b   : > { %8551 = vst [vmem:[#allocation48_spill] sm:$0xff] %v6501_v36  ;;  %v572_v6 = vpop.f32.mrf.mxu0  ;;  %4694 = vmatmul.msk.bf16.gmra.mxu1 %vm6497_vm1, %v6503_v4  ;;  %v6517_v24 = vpack.c.bf16 %v2037_v37, %v2038_v35  ;;  %vm1065_vm3 = vcmp.gt.s32.totalorder %v841_v41, 0  ;;  %vm6525_vm12 = vcmp.lt.s32.totalorder %v778_v40, 15  ;;  %v8394_v35 = vrot.slane %v6468_v0, 7 }
 0x17c   : > { %v573_v33 = vadd.f32 %v5906_v62, %v572_v6  ;;  %vm6545_vm1 = vmpackc.low %vm8547_vm2, %vm1065_vm3 }
 0x17d   : > { %v1636_v36 = vpop.f32.mrf.mxu2  ;;  %v1240_v40 = vsel %vm8559_vm13, %v8394_v35, %v1224_v59  ;;  %vm6563_vm3 = vmpackc.low %vm6525_vm12, %vm8547_vm2  ;;  %v1220_v35 = vrot.slane %v6377_v48, 7 }
 0x17e   : > { %v615_v31 = vmax.f32 %v573_v33, 0.0  ;;  %v813_v33 = vand.u32 15, %v645_v63  ;;  %vm8570_vm12 = vmmov %vm8559_vm13 }
 0x17f   : > { %vm8572_vm13 = vmmov %vm8570_vm12 }
 0x180   : > { %v1225_v37 = vrot.slane %v615_v31, 7  ;;  %v2022_v56 = vrot.slane %v615_v31, 1  ;;  %v1494_v55 = vpop.f32.mrf.mxu1  ;;  %v6530_v1 = vpack.c.bf16 %v615_v31, %v614_v51  ;;  %v8560_v31 = vmov 0 }
 0x181   : > { %v6532_v6 = vadd.f32 %v1631_v11, %v1494_v55  ;;  %v8561_v31 = vsel %vm6545_vm1, 4294967295, %v8560_v31  ;;  %v5453_v11 = vld [vmem:[%s8320_s3 + $0xc8] sm:$0xff] }
 0x182   : > { %5032 = vmatmul.msk.bf16.gmra.mxu2 %vm6146_vm10, %v5983_v45  ;;  %v1239_v41 = vsel %vm8558_vm11, %v1224_v59, %v1225_v37  ;;  %8562 = vst [vmem:[#allocation51_spill] sm:$0xff] %v8561_v31  ;;  %vm8563_vm10 = vcmp.lt.s32.totalorder %v5911_v3, 7  ;;  %2575 = vmatpush.bf16.msrb.mxu1 %v5453_v11 }
 0x183   : > { %8557 = vst [vmem:[#allocation50_spill] sm:$0xff] %v6532_v6  ;;  %v2035_v63 = vsel %vm8563_vm10, %v2022_v56, %v8395_v26  ;;  %v6556_v51 = vpop.f32.mrf.mxu0  ;;  %v6558_v58 = vpack.c.bf16 %v1239_v41, %v1240_v40  ;;  %vm8568_vm11 = vmmov %vm8563_vm10  ;;  %vm1061_vm10 = vcmp.gt.s32.totalorder %v813_v33, 0  ;;  %v651_v40 = vadd.s32 224, %v5911_v3 }
 0x184   : > { %8564 = vst [vmem:[#allocation52_spill] sm:$0xff] %v6556_v51  ;;  %v2036_v55 = vsel %vm8568_vm11, %v2021_v39, %v2022_v56  ;;  %v8569_v39 = vrot.slane %v6407_v61, 7  ;;  %v5452_v56 = vld [vmem:[%s8320_s3 + $0xc0] sm:$0xff]  ;;  %v8571_v33 = vrot.slane %v6359_v17, 7  ;;  %vm6593_vm11 = vmpackc.low %vm8547_vm2, %vm1061_vm10  ;;  %v6603_v51 = vmax.f32 %v578_v57, 0.0 }
 0x185   : > { %8565 = vst [vmem:[#allocation53_spill] sm:$0xff] %v6558_v58  ;;  %v6570_v25 = vpack.c.bf16 %v2035_v63, %v2036_v55  ;;  %4703 = vmatmul.msk.bf16.vlgmr.msrb.gmra.mxu3 %vm6545_vm1, %v6558_v58  ;;  %v1639_v41 = vpop.f32.mrf.mxu2  ;;  %v8573_v63 = vmov 0  ;;  %v642_v55 = vadd.s32 152, %v5911_v3  ;;  %v647_v6 = vadd.s32 192, %v5911_v3  ;;  %vm8580_vm1 = vmmov %vm8570_vm12 }
 0x186   : > { %4861 = vmatmul.msk.bf16.gmra.mxu0 %vm6563_vm3, %v6291_v34  ;;  %v1243_v48 = vsel %vm8570_vm12, %v1220_v35, %v8569_v39  ;;  %v1244_v12 = vsel %vm8572_vm13, %v8571_v33, %v1220_v35  ;;  %v8574_v63 = vsel %vm6593_vm11, 4294967295, %v8573_v63  ;;  %2576 = vmatpush.bf16.msrb.mxu1 %v5452_v56  ;;  %v855_v35 = vand.u32 15, %v651_v40 }
 0x187   : > { %8575 = vst [vmem:[#allocation54_spill] sm:$0xff] %v8574_v63  ;;  %v6601_v26 = vpack.c.bf16 %v1243_v48, %v1244_v12  ;;  %v792_v33 = vand.u32 15, %v642_v55  ;;  %v1226_v56 = vrot.slane %v6512_v16, 7  ;;  %v827_v12 = vand.u32 15, %v647_v6 }
 0x188   : > { %v1497_v11 = vpop.f32.mrf.mxu1  ;;  %vm1067_vm10 = vcmp.gt.s32.totalorder %v855_v35, 0  ;;  %v8581_v55 = vmov 0  ;;  %v1222_v6 = vrot.slane %v6428_v52, 7  ;;  %v2024_v13 = vrot.slane %v6603_v51, 1 }
 0x189   : > { %v6599_v39 = vadd.f32 %v6480_v60, %v1497_v11  ;;  %8577 = vst [vmem:[#allocation56_spill] sm:$0xff] %v6601_v26  ;;  %v1227_v60 = vrot.slane %v6603_v51, 7  ;;  %v1238_v57 = vsel %vm8570_vm12, %v1225_v37, %v1226_v56  ;;  %vm1090_vm13 = vcmp.lt.s32.totalorder %v792_v33, 15 }
 0x18a   : > { %vm6632_vm12 = vmpackc.low %vm1090_vm13, %vm8547_vm2  ;;  %v581_v37 = vadd.f32 %v5906_v62, %v5941_v20  ;;  %v653_v20 = vadd.s32 240, %v5911_v3  ;;  %3825 = vmatpush.bf16.msra.mxu1 %v5491_v21  ;;  %v6903_v21 = vpack.c.bf16 %v6011_v7, %v5995_v53 }
 0x18b   : > { %8576 = vst [vmem:[#allocation55_spill] sm:$0xff] %v6599_v39  ;;  %4697 = vmatmul.msk.bf16.gmra.mxu1 %vm6593_vm11, %v6601_v26  ;;  %v6608_v17 = vpop.f32.mrf.mxu0  ;;  %v1237_v40 = vsel %vm8580_vm1, %v1226_v56, %v1227_v60  ;;  %vm6623_vm11 = vmpackc.low %vm8547_vm2, %vm1067_vm10  ;;  %vm1063_vm1 = vcmp.gt.s32.totalorder %v827_v12, 0  ;;  %v5443_v56 = vld [vmem:[%s8320_s3 + $0x78] sm:$0xff]  ;;  %vm8590_vm10 = vcmp.lt.s32.totalorder %v5911_v3, 1  ;;  %v8591_v12 = vrot.slane %v6407_v61, 7  ;;  %v5442_v39 = vld [vmem:[%s8320_s3 + $0x70] sm:$0xff] }
 0x18c   : > { %8578 = vst [vmem:[#allocation57_spill] sm:$0xff] %v6608_v17  ;;  %v8582_v55 = vsel %vm6623_vm11, 4294967295, %v8581_v55  ;;  %v6629_v17 = vpack.c.bf16 %v1237_v40, %v1238_v57  ;;  %1876 = vmatpush.bf16.msrb.mxu3 %v5443_v56  ;;  %v6653_v57 = vmax.f32 %v581_v37, 0.0  ;;  %vm8592_vm13 = vmmov %vm8590_vm10  ;;  %v869_v61 = vand.u32 15, %v653_v20 }
 0x18d   : > { %v1641_v27 = vpop.f32.mrf.mxu2  ;;  %8583 = vst [vmem:[#allocation59_spill] sm:$0xff] %v8582_v55 }
 0x18e   : > { %8585 = vst [vmem:[#allocation61_spill] sm:$0xff] %v6629_v17 }
 0x190   : > { %v1499_v48 = vpop.f32.mrf.mxu1  ;;  %1877 = vmatpush.bf16.msrb.mxu3 %v5442_v39 }
 0x191   : > { %v6615_v11 = vadd.f32 %v1636_v36, %v1499_v48  ;;  %v8586_v36 = vmov 0  ;;  %v8589_v48 = vrot.slane %v6468_v0, 7 }
 0x192   : > { %5035 = vmatmul.msk.bf16.gmra.mxu2 %vm6205_vm14, %v6049_v29  ;;  %v8587_v36 = vsel %vm6632_vm12, 4294967295, %v8586_v36  ;;  %vm6660_vm14 = vmpackc.low %vm8547_vm2, %vm1063_vm1  ;;  %vm1069_vm1 = vcmp.gt.s32.totalorder %v869_v61, 0 }
 0x193   : > { %8579 = vst [vmem:[#allocation58_spill] sm:$0xff] %v6615_v11  ;;  %v6627_v35 = vpop.f32.mrf.mxu0  ;;  %v1241_v62 = vsel %vm8590_vm10, %v1222_v6, %v8589_v48  ;;  %v8594_v43 = vsel %vm6660_vm14, 4294967295, %v8593_v43  ;;  %v644_v11 = vadd.s32 168, %v5911_v3 }
 0x194   : > { %8584 = vst [vmem:[#allocation60_spill] sm:$0xff] %v6627_v35  ;;  %v1242_v35 = vsel %vm8592_vm13, %v8591_v12, %v1222_v6  ;;  %v1228_v6 = vrot.slane %v6653_v57, 7  ;;  %vm8599_vm13 = vmmov %vm8590_vm10 }
 0x195   : > { %8588 = vst [vmem:[#allocation62_spill] sm:$0xff] %v8587_v36  ;;  %4706 = vmatmul.msk.bf16.gmra.mxu3 %vm6623_vm11, %v6629_v17  ;;  %v1644_v33 = vpop.f32.mrf.mxu2  ;;  %v6667_v48 = vpack.c.bf16 %v1241_v62, %v1242_v35  ;;  %v806_v56 = vand.u32 15, %v644_v11  ;;  %v8598_v35 = vrot.slane %v6133_v38, 7  ;;  %v659_v11 = vand.u32 15, %v5911_v3 }
 0x196   : > { %4864 = vmatmul.msk.bf16.gmra.mxu0 %vm6632_vm12, %v6350_v9  ;;  %8595 = vst [vmem:[#allocation63_spill] sm:$0xff] %v8594_v43 }
 0x197   : > { %8596 = vst [vmem:[#allocation64_spill] sm:$0xff] %v6667_v48  ;;  %v1235_v62 = vsel %vm8590_vm10, %v1228_v6, %v8598_v35  ;;  %vm1092_vm11 = vcmp.lt.s32.totalorder %v806_v56, 15  ;;  %v8608_v56 = vmov 0 }
 0x198   : > { %v1502_v40 = vpop.f32.mrf.mxu1  ;;  %vm6700_vm10 = vmpackc.low %vm1092_vm11, %vm8547_vm2 }
 0x199   : > { %v6665_v29 = vadd.f32 %v1639_v41, %v1502_v40  ;;  %v1236_v40 = vsel %vm8599_vm13, %v1227_v60, %v1228_v6  ;;  %v8605_v60 = vmov 0  ;;  %vm1039_vm13 = vcmp.gt.s32.totalorder %v659_v11, 0 }
 0x19a   : > { %v6697_v35 = vpack.c.bf16 %v1235_v62, %v1236_v40  ;;  %v8606_v60 = vsel %vm6700_vm10, 4294967295, %v8605_v60  ;;  %v5441_v40 = vld [vmem:[%s8320_s3 + $0x68] sm:$0xff] }
 0x19b   : > { %4700 = vmatmul.msk.bf16.gmra.mxu1 %vm6660_vm14, %v6667_v48  ;;  %v6672_v37 = vpop.f32.mrf.mxu0  ;;  %vm6691_vm14 = vmpackc.low %vm8547_vm2, %vm1069_vm1  ;;  %8607 = vst [vmem:[#allocation69_spill] sm:$0xff] %v8606_v60  ;;  %1878 = vmatpush.bf16.msrb.mxu3 %v5441_v40 }
 0x19c   : > { %8597 = vst [vmem:[#allocation65_spill] sm:$0xff] %v6672_v37  ;;  %vm6711_vm1 = vmpackc.low %vm8547_vm2, %vm1039_vm13 }
 0x19d   : > { %v1646_v12 = vpop.f32.mrf.mxu2  ;;  %8604 = vst [vmem:[#allocation68_spill] sm:$0xff] %v6697_v35  ;;  %v8609_v56 = vsel %vm6711_vm1, 4294967295, %v8608_v56 }
 0x19e   : > { %8610 = vst [vmem:[#allocation70_spill] sm:$0xff] %v8609_v56 }
 0x1a0   : > { %v1504_v41 = vpop.f32.mrf.mxu1 }
 0x1a1   : > { %v6684_v20 = vadd.f32 %v1641_v27, %v1504_v41  ;;  %v646_v41 = vadd.s32 184, %v5911_v3 }
 0x1a2   : > { %5038 = vmatmul.msk.bf16.gmra.mxu2 %vm6253_vm7, %v6087_v54 }
 0x1a3   : > { %8600 = vst [vmem:[#allocation66_spill] sm:$0xff] %v6684_v20  ;;  %v6695_v61 = vpop.f32.mrf.mxu0 }
 0x1a4   : > { %8603 = vst [vmem:[#allocation67_spill] sm:$0xff] %v6695_v61  ;;  %v820_v61 = vand.u32 15, %v646_v41  ;;  %v8613_v41 = vmov 0 }
 0x1a5   : > { %4709 = vmatmul.msk.bf16.gmra.mxu3 %vm6691_vm14, %v6697_v35  ;;  %v1649_v27 = vpop.f32.mrf.mxu2 }
 0x1a6   : > { %4867 = vmatmul.msk.bf16.gmra.mxu0 %vm6700_vm10, %v6403_v32  ;;  %vm1094_vm11 = vcmp.lt.s32.totalorder %v820_v61, 15 }
 0x1a7   : > { %vm6741_vm13 = vmpackc.low %vm1094_vm11, %vm8547_vm2 }
 0x1a8   : > { %v1507_v6 = vpop.f32.mrf.mxu1  ;;  %v8614_v41 = vsel %vm6741_vm13, 4294967295, %v8613_v41 }
 0x1a9   : > { %v6716_v62 = vadd.f32 %v1644_v33, %v1507_v6  ;;  %v5440_v33 = vld [vmem:[%s8320_s3 + $0x60] sm:$0xff]  ;;  %v6736_v6 = vpack.c.bf16 %v6468_v0, %v6428_v52  ;;  %8615 = vst [vmem:[#allocation73_spill] sm:$0xff] %v8614_v41 }
 0x1aa   : > { %1879 = vmatpush.bf16.msrb.mxu3 %v5440_v33  ;;  %v5439_v33 = vld [vmem:[%s8320_s3 + $0x58] sm:$0xff] }
 0x1ab   : > { %v6721_v11 = vpop.f32.mrf.mxu0  ;;  %4933 = vmatmul.msk.bf16.vlgmr.msrb.gmra.mxu1 %vm6711_vm1, %v6036_v22 }
 0x1ac   : > { %8611 = vst [vmem:[#allocation71_spill] sm:$0xff] %v6721_v11 }
 0x1ad   : > { %v1651_v37 = vpop.f32.mrf.mxu2 }
 0x1ae   : > { %1880 = vmatpush.bf16.msrb.mxu3 %v5439_v33  ;;  %v650_v33 = vadd.s32 216, %v5911_v3 }
 0x1b0   : > { %v1509_v44 = vpop.f32.mrf.mxu1  ;;  %v848_v56 = vand.u32 15, %v650_v33 }
 0x1b1   : > { %v6726_v20 = vadd.f32 %v1646_v12, %v1509_v44  ;;  %v648_v12 = vadd.s32 200, %v5911_v3 }
 0x1b2   : > { %5041 = vmatmul.msk.bf16.gmra.mxu2 %vm6313_vm15, %v6125_v30 }
 0x1b3   : > { %v6738_v22 = vpop.f32.mrf.mxu0  ;;  %v834_v40 = vand.u32 15, %v648_v12 }
 0x1b4   : > { %8612 = vst [vmem:[#allocation72_spill] sm:$0xff] %v6738_v22 }
 0x1b5   : > { %1673 = vmatmul.bf16.vlgmr.msra.gmra.mxu3 %v6736_v6  ;;  %v1654_v52 = vpop.f32.mrf.mxu2  ;;  %vm1096_vm11 = vcmp.lt.s32.totalorder %v834_v40, 15 }
 0x1b6   : > { %4870 = vmatmul.msk.bf16.gmra.mxu0 %vm6741_vm13, %v6453_v28  ;;  %vm6768_vm1 = vmpackc.low %vm1096_vm11, %vm8547_vm2  ;;  %vm1098_vm11 = vcmp.lt.s32.totalorder %v848_v56, 15  ;;  %v6811_v56 = vpack.c.bf16 %v6603_v51, %v6512_v16 }
 0x1b8   : > { %v1512_v44 = vpop.f32.mrf.mxu1 }
 0x1b9   : > { %v6750_v61 = vadd.f32 %v1649_v27, %v1512_v44  ;;  %v8618_v44 = vmov 0 }
 0x1ba   : > { %v8619_v44 = vsel %vm6768_vm1, 4294967295, %v8618_v44 }
 0x1bb   : > { %v6752_v0 = vpop.f32.mrf.mxu0  ;;  %4936 = vmatmul.msk.bf16.gmra.mxu1 %vm6028_vm4, %v6080_v18  ;;  %8620 = vst [vmem:[#allocation76_spill] sm:$0xff] %v8619_v44  ;;  %v5481_v18 = vld [vmem:[%s8320_s3 + $0x1e8] sm:$0xff] }
 0x1bc   : > { %8616 = vst [vmem:[#allocation74_spill] sm:$0xff] %v6752_v0  ;;  %v5482_v0 = vld [vmem:[%s8320_s3 + $0x1f0] sm:$0xff] }
 0x1bd   : > { %v1656_v12 = vpop.f32.mrf.mxu2 }
 0x1c0   : > { %v1514_v22 = vpop.f32.mrf.mxu1 }
 0x1c1   : > { %v6760_v11 = vadd.f32 %v1651_v37, %v1514_v22  ;;  %v5438_v37 = vld [vmem:[%s8320_s3 + $0x50] sm:$0xff]  ;;  %v5483_v22 = vld [vmem:[%s8320_s3 + $0x1f8] sm:$0xff] }
 0x1c2   : > { %5044 = vmatmul.msk.bf16.gmra.mxu2 %vm6371_vm5, %v6186_v50  ;;  %1881 = vmatpush.bf16.msrb.mxu3 %v5438_v37 }
 0x1c3   : > { %v6765_v27 = vpop.f32.mrf.mxu0  ;;  %3495 = vmatpush.bf16.msra.mxu0 %v5483_v22 }
 0x1c4   : > { %8617 = vst [vmem:[#allocation75_spill] sm:$0xff] %v6765_v27 }
 0x1c5   : > { %1678 = vmatmul.bf16.gmra.mxu3 %v6530_v1  ;;  %v1659_v37 = vpop.f32.mrf.mxu2 }
 0x1c6   : > { %4873 = vmatmul.msk.bf16.gmra.mxu0 %vm6768_vm1, %v6517_v24 }
 0x1c7   : > { %3496 = vmatpush.bf16.msra.mxu0 %v5482_v0  ;;  %v5480_v0 = vld [vmem:[%s8320_s3 + $0x1e0] sm:$0xff] }
 0x1c8   : > { %v1517_v40 = vpop.f32.mrf.mxu1 }
 0x1c9   : > { %v6783_v27 = vadd.f32 %v1654_v52, %v1517_v40  ;;  %v5437_v40 = vld [vmem:[%s8320_s3 + $0x48] sm:$0xff] }
 0x1ca   : > { %1882 = vmatpush.bf16.msrb.mxu3 %v5437_v40  ;;  %v5436_v40 = vld [vmem:[%s8320_s3 + $0x40] sm:$0xff] }
 0x1cb   : > { %v6788_v19 = vpop.f32.mrf.mxu0  ;;  %4939 = vmatmul.msk.bf16.gmra.mxu1 %vm6076_vm6, %v6118_v23  ;;  %3497 = vmatpush.bf16.msra.mxu0 %v5481_v18  ;;  %vm6814_vm6 = vmpackc.low %vm1098_vm11, %vm8547_vm2  ;;  %v8815_v18 = vld [vmem:[#allocation37_spill] sm:$0xff] }
 0x1cc   : > { %8621 = vst [vmem:[#allocation77_spill] sm:$0xff] %v6788_v19 }
 0x1ce   : > { %1883 = vmatpush.bf16.msrb.mxu3 %v5436_v40 }
 0x1cf   : > { %3498 = vmatpush.bf16.msra.mxu0 %v5480_v0  ;;  %v5478_v0 = vld [vmem:[%s8320_s3 + $0x1d0] sm:$0xff] }
 0x1d0   : > { %v1519_v22 = vpop.f32.mrf.mxu1 }
 0x1d1   : > { %v6796_v52 = vadd.f32 %v1656_v12, %v1519_v22  ;;  %v5479_v12 = vld [vmem:[%s8320_s3 + $0x1d8] sm:$0xff]  ;;  %v1661_v22 = vpop.f32.mrf.mxu2 }
 0x1d2   : > { %5047 = vmatmul.msk.bf16.gmra.mxu2 %vm6421_vm0, %v6234_v8 }
 0x1d3   : > { %8622 = vst [vmem:[#allocation78_spill] sm:$0xff] %v6796_v52  ;;  %v6807_v33 = vpop.f32.mrf.mxu0  ;;  %3499 = vmatpush.bf16.msra.mxu0 %v5479_v12  ;;  %v5477_v12 = vld [vmem:[%s8320_s3 + $0x1c8] sm:$0xff] }
 0x1d4   : > { %8623 = vst [vmem:[#allocation79_spill] sm:$0xff] %v6807_v33  ;;  %v652_v33 = vadd.s32 232, %v5911_v3 }
 0x1d5   : > { %1683 = vmatmul.bf16.gmra.mxu3 %v6811_v56 }
 0x1d6   : > { %4876 = vmatmul.msk.bf16.gmra.mxu0 %vm6814_vm6, %v6570_v25  ;;  %v862_v23 = vand.u32 15, %v652_v33  ;;  %v8629_v33 = vrot.slane %v6512_v16, 1 }
 0x1d7   : > { %3500 = vmatpush.bf16.msra.mxu0 %v5478_v0 }
 0x1d8   : > { %v1522_v19 = vpop.f32.mrf.mxu1  ;;  %vm1100_vm11 = vcmp.lt.s32.totalorder %v862_v23, 15  ;;  %v5476_v23 = vld [vmem:[%s8320_s3 + $0x1c0] sm:$0xff] }
 0x1d9   : > { %v6826_v49 = vadd.f32 %v1659_v37, %v1522_v19  ;;  %v2025_v19 = vrot.slane %v6653_v57, 1  ;;  %v1664_v0 = vpop.f32.mrf.mxu2 }
 0x1db   : > { %8626 = vst [vmem:[#allocation80_spill] sm:$0xff] %v6826_v49  ;;  %4942 = vmatmul.msk.bf16.gmra.mxu1 %vm6113_vm8, %v6179_v10  ;;  %v6839_v37 = vpop.f32.mrf.mxu0  ;;  %3501 = vmatpush.bf16.msra.mxu0 %v5477_v12  ;;  %vm8628_vm8 = vcmp.lt.s32.totalorder %v5911_v3, 7 }
 0x1dc   : > { %8627 = vst [vmem:[#allocation81_spill] sm:$0xff] %v6839_v37  ;;  %v2033_v40 = vsel %vm8628_vm8, %v2024_v13, %v2025_v19  ;;  %vm8630_vm4 = vmmov %vm8628_vm8 }
 0x1dd   : > { %v2034_v51 = vsel %vm8630_vm4, %v8629_v33, %v2024_v13  ;;  %vm6863_vm8 = vmpackc.low %vm1100_vm11, %vm8547_vm2  ;;  %v5475_v13 = vld [vmem:[%s8320_s3 + $0x1b8] sm:$0xff]  ;;  %v654_v33 = vadd.s32 248, %v5911_v3  ;;  %vm8635_vm4 = vnez %v8487_v2 }
 0x1de   : > { %v6867_v16 = vpack.c.bf16 %v2033_v40, %v2034_v51  ;;  %3197 = vmatpush.bf16.msra.mxu3 %v5475_v13 }
 0x1df   : > { %3502 = vmatpush.bf16.msra.mxu0 %v5476_v23  ;;  %v876_v51 = vand.u32 15, %v654_v33  ;;  %v2026_v23 = vrot.slane %v6133_v38, 1 }
 0x1e0   : > { %v1524_v49 = vpop.f32.mrf.mxu1 }
 0x1e1   : > { %v6844_v52 = vadd.f32 %v1661_v22, %v1524_v49  ;;  %v6860_v49 = vpack.c.bf16 %v6133_v38, %v6653_v57  ;;  %v8631_v22 = vmov 0  ;;  %v1666_v40 = vpop.f32.mrf.mxu2  ;;  %vm1102_vm11 = vcmp.lt.s32.totalorder %v876_v51, 15  ;;  %v5487_v38 = vld [vmem:[%s8320_s3 + $0x218] sm:$0xff] }
 0x1e2   : > { %5050 = vmatmul.msk.bf16.gmra.mxu2 %vm6474_vm9, %v6291_v34  ;;  %v8632_v22 = vsel %vm6863_vm8, 4294967295, %v8631_v22  ;;  %vm8638_vm9 = vcmp.lt.s32.totalorder %v5911_v3, 7  ;;  %vm6906_vm0 = vmpackc.low %vm1102_vm11, %vm8547_vm2  ;;  %vm8643_vm2 = vnez %v8495_v46 }
 0x1e3   : > { %8633 = vst [vmem:[#allocation82_spill] sm:$0xff] %v8632_v22  ;;  %v6876_v57 = vpop.f32.mrf.mxu0 }
 0x1e4   : > { %8634 = vst [vmem:[#allocation83_spill] sm:$0xff] %v6876_v57 }
 0x1e5   : > { %1688 = vmatmul.bf16.gmra.mxu3 %v6860_v49 }
 0x1e6   : > { %4879 = vmatmul.msk.bf16.gmra.mxu0 %vm6863_vm8, %v6867_v16 }
 0x1e8   : > { %v1527_v12 = vpop.f32.mrf.mxu1 }
 0x1e9   : > { %v6879_v37 = vadd.f32 %v1664_v0, %v1527_v12  ;;  %v8637_v0 = vrot.slane %v5995_v53, 1 }
 0x1eb   : > { %4945 = vmatmul.msk.bf16.gmra.mxu1 %vm8635_vm4, %v6227_v15  ;;  %v6888_v13 = vpop.f32.mrf.mxu0  ;;  %v2031_v12 = vsel %vm8638_vm9, %v2026_v23, %v8637_v0  ;;  %vm8639_vm4 = vmmov %vm8638_vm9 }
 0x1ec   : > { %8636 = vst [vmem:[#allocation84_spill] sm:$0xff] %v6888_v13  ;;  %v2032_v33 = vsel %vm8639_vm4, %v2025_v19, %v2026_v23 }
 0x1f0   : > { %v1529_v57 = vpop.f32.mrf.mxu1 }
 0x1f1   : > { %v6890_v10 = vadd.f32 %v1666_v40, %v1529_v57  ;;  %v6910_v57 = vpack.c.bf16 %v2031_v12, %v2032_v33  ;;  %v1669_v40 = vpop.f32.mrf.mxu2  ;;  %v8645_v12 = vmov 0.0|0.0   ;;  %v5474_v33 = vld [vmem:[%s8320_s3 + $0x1b0] sm:$0xff] }
 0x1f2   : > { %5053 = vmatmul.msk.bf16.gmra.mxu2 %vm6563_vm3, %v6350_v9  ;;  %3198 = vmatpush.bf16.msra.mxu3 %v5474_v33  ;;  %v8653_v33 = vld [vmem:[#allocation6_spill] sm:$0xff] }
 0x1f3   : > { %v6918_v51 = vpop.f32.mrf.mxu0 }
 0x1f4   : > { %8642 = vst [vmem:[#allocation85_spill] sm:$0xff] %v6918_v51 }
 0x1f5   : > { %1693 = vmatmul.bf16.gmra.mxu3 %v6903_v21 }
 0x1f6   : > { %4882 = vmatmul.msk.bf16.gmra.mxu0 %vm6906_vm0, %v6910_v57 }
 0x1f8   : > { %v1532_v3 = vpop.f32.mrf.mxu1 }
 0x1f9   : > { %v6916_v19 = vadd.f32 %v1669_v40, %v1532_v3  ;;  %v1671_v53 = vpop.f32.mrf.mxu2  ;;  %v8646_v40 = vld [vmem:[#allocation7_spill] sm:$0xff] }
 0x1fb   : > { %4948 = vmatmul.msk.bf16.gmra.mxu1 %vm8643_vm2, %v6281_v14  ;;  %v6928_v0 = vpop.f32.mrf.mxu0 }
 0x1fc   : > { %8644 = vst [vmem:[#allocation86_spill] sm:$0xff] %v6928_v0  ;;  %v5490_v0 = vld [vmem:[%s8320_s3 + $0x230] sm:$0xff] }
 0x1fd   : > { %3826 = vmatpush.bf16.msra.mxu1 %v5490_v0  ;;  %v8659_v0 = vld [vmem:[#allocation33_spill] sm:$0xff] }
 0x1fe   : > { %vm8660_vm4 = vnez %v8659_v0 }
 0x200   : > { %v1534_v7 = vpop.f32.mrf.mxu1 }
 0x201   : > { %v6923_v23 = vadd.f32 %v1671_v53, %v1534_v7  ;;  %v8648_v53 = vld [vmem:[#allocation34_spill] sm:$0xff]  ;;  %v8649_v7 = vld [vmem:[#allocation29_spill] sm:$0xff]  ;;  %v6956_v36 = vpop.f32.mrf.mxu2 }
 0x202   : > { %5056 = vmatmul.msk.bf16.gmra.mxu2 %vm6632_vm12, %v6403_v32  ;;  %vm8650_vm9 = vnez %v8649_v7  ;;  %8657 = vst [vmem:[#allocation89_spill] sm:$0xff] %v6956_v36  ;;  %v8664_v36 = vld [vmem:[#allocation12_spill] sm:$0xff] }
 0x203   : > { %v6943_v13 = vpop.f32.mrf.mxu0 }
 0x204   : > { %8651 = vst [vmem:[#allocation87_spill] sm:$0xff] %v6943_v13  ;;  %v8658_v13 = vld [vmem:[#allocation38_spill] sm:$0xff] }
 0x205   : > { %1884 = vmatmul.bf16.vlgmr.msrb.gmra.mxu3 %v8645_v12 }
 0x206   : > { %3503 = vmatmul.bf16.vlgmr.msra.gmra.mxu0 %v8646_v40 }
 0x208   : > { %v1537_v3 = vpop.f32.mrf.mxu1  ;;  %v6935_v51 = vpop.f32.mrf.mxu3 }
 0x209   : > { %8647 = vst [vmem:[#allocation7_spill] sm:$0xff] %v6935_v51  ;;  %v8654_v51 = vld [vmem:[#allocation8_spill] sm:$0xff]  ;;  %v6968_v60 = vpop.f32.mrf.mxu2 }
 0x20a   : > { %8663 = vst [vmem:[#allocation92_spill] sm:$0xff] %v6968_v60 }
 0x20b   : > { %4951 = vmatmul.msk.bf16.gmra.mxu1 %vm8650_vm9, %v8648_v53  ;;  %v6954_v14 = vpop.f32.mrf.mxu0 }
 0x20c   : > { %8656 = vst [vmem:[#allocation8_spill] sm:$0xff] %v6954_v14  ;;  %v5473_v14 = vld [vmem:[%s8320_s3 + $0x1a8] sm:$0xff] }
 0x20d   : > { %3199 = vmatpush.bf16.msra.mxu3 %v5473_v14 }
 0x210   : > { %v1539_v46 = vpop.f32.mrf.mxu1  ;;  %v6945_v2 = vpop.f32.mrf.mxu3 }
 0x211   : > { %8652 = vst [vmem:[#allocation88_spill] sm:$0xff] %v6945_v2  ;;  %v6987_v60 = vpop.f32.mrf.mxu2 }
 0x212   : > { %5059 = vmatmul.msk.bf16.gmra.mxu2 %vm6700_vm10, %v6453_v28  ;;  %8671 = vst [vmem:[#allocation95_spill] sm:$0xff] %v6987_v60  ;;  %v8677_v60 = vld [vmem:[#allocation42_spill] sm:$0xff] }
 0x215   : > { %1889 = vmatmul.bf16.gmra.mxu3 %v8653_v33  ;;  %v6966_v33 = vpop.f32.mrf.mxu0 }
 0x216   : > { %3508 = vmatmul.bf16.gmra.mxu0 %v8654_v51  ;;  %8662 = vst [vmem:[#allocation91_spill] sm:$0xff] %v6966_v33 }
 0x218   : > { %v1542_v7 = vpop.f32.mrf.mxu1  ;;  %v6952_v53 = vpop.f32.mrf.mxu3 }
 0x219   : > { %8655 = vst [vmem:[#allocation6_spill] sm:$0xff] %v6952_v53  ;;  %v8667_v53 = vld [vmem:[#allocation44_spill] sm:$0xff] }
 0x21b   : > { %4954 = vmatmul.msk.bf16.gmra.mxu1 %vm8660_vm4, %v8658_v13  ;;  %v8668_v13 = vld [vmem:[#allocation37_spill] sm:$0xff] }
 0x21c   : > { %vm8669_vm11 = vnez %v8668_v13  ;;  %v8674_v13 = vld [vmem:[#allocation15_spill] sm:$0xff] }
 0x21d   : > { %v6982_v33 = vpop.f32.mrf.mxu0 }
 0x21e   : > { %8670 = vst [vmem:[#allocation94_spill] sm:$0xff] %v6982_v33 }
 0x220   : > { %v1544_v2 = vpop.f32.mrf.mxu1  ;;  %v6961_v15 = vpop.f32.mrf.mxu3 }
 0x221   : > { %8661 = vst [vmem:[#allocation90_spill] sm:$0xff] %v6961_v15 }
 0x222   : > { %5062 = vmatmul.msk.bf16.gmra.mxu2 %vm6741_vm13, %v6517_v24 }
 0x225   : > { %1894 = vmatmul.bf16.gmra.mxu3 %v8646_v40  ;;  %v5489_v40 = vld [vmem:[%s8320_s3 + $0x228] sm:$0xff]  ;;  %v6998_v33 = vpop.f32.mrf.mxu0 }
 0x226   : > { %3513 = vmatmul.bf16.gmra.mxu0 %v8664_v36  ;;  %3827 = vmatpush.bf16.msra.mxu1 %v5489_v40 }
 0x228   : > { %v6975_v0 = vpop.f32.mrf.mxu3  ;;  %v6977_v15 = vpop.f32.mrf.mxu1 }
 0x229   : > { %8665 = vst [vmem:[#allocation12_spill] sm:$0xff] %v6975_v0 }
 0x22a   : > { %8666 = vst [vmem:[#allocation93_spill] sm:$0xff] %v6977_v15 }
 0x22b   : > { %4957 = vmatmul.msk.bf16.gmra.mxu1 %vm8669_vm11, %v8667_v53  ;;  %v7002_v53 = vpop.f32.mrf.mxu2  ;;  %vm8678_vm11 = vnez %v8677_v60 }
 0x22c   : > { %8676 = vst [vmem:[#allocation98_spill] sm:$0xff] %v7002_v53 }
 0x22d   : > { %v7011_v44 = vpop.f32.mrf.mxu0 }
 0x22e   : > { %8680 = vst [vmem:[#allocation100_spill] sm:$0xff] %v7011_v44  ;;  %v8685_v44 = vld [vmem:[#allocation47_spill] sm:$0xff] }
 0x230   : > { %v6989_v41 = vpop.f32.mrf.mxu3  ;;  %v6991_v14 = vpop.f32.mrf.mxu1 }
 0x231   : > { %8672 = vst [vmem:[#allocation96_spill] sm:$0xff] %v6989_v41 }
 0x232   : > { %8673 = vst [vmem:[#allocation97_spill] sm:$0xff] %v6991_v14  ;;  %5065 = vmatmul.msk.bf16.gmra.mxu2 %vm6768_vm1, %v6570_v25 }
 0x235   : > { %1899 = vmatmul.bf16.gmra.mxu3 %v8654_v51 }
 0x236   : > { %3518 = vmatmul.bf16.gmra.mxu0 %v8674_v13 }
 0x238   : > { %v1674_v15 = vpop.f32.mrf.mxu3  ;;  %v7000_v0 = vpop.f32.mrf.mxu1 }
 0x239   : > { %8675 = vst [vmem:[#allocation15_spill] sm:$0xff] %v7000_v0  ;;  %v7004_v40 = vadd.f32 %v1674_v15, %v1537_v3  ;;  %v7018_v0 = vpop.f32.mrf.mxu2  ;;  %v5472_v15 = vld [vmem:[%s8320_s3 + $0x1a0] sm:$0xff] }
 0x23a   : > { %8681 = vst [vmem:[#allocation101_spill] sm:$0xff] %v7018_v0  ;;  %v8682_v3 = vld [vmem:[#allocation18_spill] sm:$0xff]  ;;  %3200 = vmatpush.bf16.msra.mxu3 %v5472_v15 }
 0x23b   : > { %4960 = vmatmul.msk.bf16.gmra.mxu1 %vm8678_vm11, %v6503_v4  ;;  %vm8686_vm11 = vnez %v8685_v44 }
 0x240   : > { %v1676_v14 = vpop.f32.mrf.mxu3  ;;  %v7009_v41 = vpop.f32.mrf.mxu1 }
 0x241   : > { %8679 = vst [vmem:[#allocation99_spill] sm:$0xff] %v7009_v41  ;;  %v7013_v51 = vadd.f32 %v1676_v14, %v1539_v46  ;;  %v7029_v14 = vpop.f32.mrf.mxu0  ;;  %v7034_v0 = vpop.f32.mrf.mxu2 }
 0x242   : > { %5068 = vmatmul.msk.bf16.gmra.mxu2 %vm6814_vm6, %v6867_v16  ;;  %8684 = vst [vmem:[#allocation102_spill] sm:$0xff] %v7029_v14 }
 0x243   : > { %8687 = vst [vmem:[#allocation103_spill] sm:$0xff] %v7034_v0 }
 0x245   : > { %1904 = vmatmul.bf16.gmra.mxu3 %v8664_v36  ;;  %v5488_v36 = vld [vmem:[%s8320_s3 + $0x220] sm:$0xff] }
 0x246   : > { %3523 = vmatmul.bf16.gmra.mxu0 %v8682_v3  ;;  %3828 = vmatpush.bf16.msra.mxu1 %v5488_v36 }
 0x248   : > { %v1679_v53 = vpop.f32.mrf.mxu3  ;;  %v7025_v41 = vpop.f32.mrf.mxu1 }
 0x249   : > { %8683 = vst [vmem:[#allocation18_spill] sm:$0xff] %v7025_v41  ;;  %v7027_v46 = vadd.f32 %v1679_v53, %v1542_v7  ;;  %v7046_v53 = vpop.f32.mrf.mxu0  ;;  %v8690_v7 = vld [vmem:[#allocation23_spill] sm:$0xff]  ;;  %v7050_v14 = vpop.f32.mrf.mxu2 }
 0x24a   : > { %8689 = vst [vmem:[#allocation105_spill] sm:$0xff] %v7046_v53  ;;  %3829 = vmatpush.bf16.msra.mxu1 %v5487_v38  ;;  %v5486_v38 = vld [vmem:[%s8320_s3 + $0x210] sm:$0xff] }
 0x24b   : > { %4963 = vmatmul.msk.bf16.gmra.mxu1 %vm8686_vm11, %v6601_v26  ;;  %8691 = vst [vmem:[#allocation23_spill] sm:$0xff] %v7050_v14  ;;  %vm8693_vm11 = vnez %v8574_v63  ;;  %v5471_v14 = vld [vmem:[%s8320_s3 + $0x198] sm:$0xff]  ;;  %v8698_v63 = vld [vmem:[#allocation27_spill] sm:$0xff] }
 0x24c   : > { %3201 = vmatpush.bf16.msra.mxu3 %v5471_v14 }
 0x24e   : > { %3830 = vmatpush.bf16.msra.mxu1 %v5486_v38  ;;  %v5484_v38 = vld [vmem:[%s8320_s3 + $0x200] sm:$0xff] }
 0x250   : > { %v1681_v60 = vpop.f32.mrf.mxu3  ;;  %v7039_v15 = vpop.f32.mrf.mxu1 }
 0x251   : > { %8688 = vst [vmem:[#allocation104_spill] sm:$0xff] %v7039_v15  ;;  %v7041_v4 = vadd.f32 %v1681_v60, %v1544_v2  ;;  %v7059_v2 = vpop.f32.mrf.mxu0  ;;  %v7065_v53 = vpop.f32.mrf.mxu2 }
 0x252   : > { %5071 = vmatmul.msk.bf16.gmra.mxu2 %vm6863_vm8, %v6910_v57  ;;  %8694 = vst [vmem:[#allocation107_spill] sm:$0xff] %v7059_v2 }
 0x253   : > { %8696 = vst [vmem:[#allocation109_spill] sm:$0xff] %v7065_v53 }
 0x255   : > { %1909 = vmatmul.bf16.gmra.mxu3 %v8674_v13  ;;  %v8697_v13 = vld [vmem:[#allocation10_spill] sm:$0xff] }
 0x256   : > { %3528 = vmatmul.bf16.gmra.mxu0 %v8690_v7 }
 0x258   : > { %v7052_v0 = vpop.f32.mrf.mxu3  ;;  %v7054_v36 = vpop.f32.mrf.mxu1 }
 0x259   : > { %8692 = vst [vmem:[#allocation106_spill] sm:$0xff] %v7054_v36 }
 0x25b   : > { %4966 = vmatmul.msk.bf16.gmra.mxu1 %vm8693_vm11, %v6667_v48  ;;  %vm8701_vm11 = vnez %v8594_v43 }
 0x260   : > { %v7061_v60 = vpop.f32.mrf.mxu3  ;;  %v7063_v15 = vpop.f32.mrf.mxu1 }
 0x261   : > { %8695 = vst [vmem:[#allocation108_spill] sm:$0xff] %v7063_v15  ;;  %v7079_v15 = vpop.f32.mrf.mxu0 }
 0x262   : > { %5074 = vmatmul.msk.bf16.gmra.mxu2 %vm6906_vm0, %v8697_v13  ;;  %8700 = vst [vmem:[#allocation27_spill] sm:$0xff] %v7079_v15  ;;  %vm8706_vm0 = vnez %v8561_v31  ;;  %v8709_v31 = vld [vmem:[#allocation36_spill] sm:$0xff] }
 0x265   : > { %1914 = vmatmul.bf16.gmra.mxu3 %v8682_v3 }
 0x266   : > { %3533 = vmatmul.bf16.gmra.mxu0 %v8698_v63 }
 0x268   : > { %v7075_v2 = vpop.f32.mrf.mxu3  ;;  %v7077_v36 = vpop.f32.mrf.mxu1 }
 0x269   : > { %8699 = vst [vmem:[#allocation10_spill] sm:$0xff] %v7077_v36  ;;  %v7091_v14 = vpop.f32.mrf.mxu0  ;;  %v8704_v36 = vld [vmem:[#allocation31_spill] sm:$0xff] }
 0x26a   : > { %8703 = vst [vmem:[#allocation111_spill] sm:$0xff] %v7091_v14 }
 0x26b   : > { %4969 = vmatmul.msk.bf16.gmra.mxu1 %vm8701_vm11, %v6558_v58  ;;  %v8712_v58 = vld [vmem:[#allocation32_spill] sm:$0xff] }
 0x270   : > { %v7087_v3 = vpop.f32.mrf.mxu3  ;;  %v7089_v53 = vpop.f32.mrf.mxu1 }
 0x271   : > { %8702 = vst [vmem:[#allocation110_spill] sm:$0xff] %v7089_v53  ;;  %v7102_v43 = vpop.f32.mrf.mxu0 }
 0x272   : > { %8707 = vst [vmem:[#allocation112_spill] sm:$0xff] %v7102_v43  ;;  %v5470_v43 = vld [vmem:[%s8320_s3 + $0x190] sm:$0xff] }
 0x273   : > { %3202 = vmatpush.bf16.msra.mxu3 %v5470_v43 }
 0x275   : > { %1919 = vmatmul.bf16.gmra.mxu3 %v8690_v7  ;;  %v5485_v7 = vld [vmem:[%s8320_s3 + $0x208] sm:$0xff] }
 0x276   : > { %3538 = vmatmul.bf16.gmra.mxu0 %v8704_v36  ;;  %3831 = vmatpush.bf16.msra.mxu1 %v5485_v7  ;;  %v8715_v7 = vld [vmem:[#allocation35_spill] sm:$0xff] }
 0x278   : > { %v7095_v15 = vpop.f32.mrf.mxu3  ;;  %v7097_v44 = vpop.f32.mrf.mxu1 }
 0x279   : > { %8705 = vst [vmem:[#allocation31_spill] sm:$0xff] %v7097_v44  ;;  %v7119_v44 = vpop.f32.mrf.mxu0 }
 0x27a   : > { %8710 = vst [vmem:[#allocation36_spill] sm:$0xff] %v7119_v44  ;;  %3832 = vmatpush.bf16.msra.mxu1 %v5484_v38 }
 0x27b   : > { %4972 = vmatmul.msk.bf16.gmra.mxu1 %vm8706_vm0, %v6629_v17  ;;  %vm8713_vm0 = vnez %v8582_v55 }
 0x280   : > { %v7107_v53 = vpop.f32.mrf.mxu3  ;;  %v7109_v14 = vpop.f32.mrf.mxu1 }
 0x281   : > { %8708 = vst [vmem:[#allocation113_spill] sm:$0xff] %v7109_v14  ;;  %v7134_v43 = vpop.f32.mrf.mxu0 }
 0x282   : > { %8716 = vst [vmem:[#allocation32_spill] sm:$0xff] %v7134_v43 }
 0x285   : > { %1924 = vmatmul.bf16.gmra.mxu3 %v8698_v63  ;;  %v8714_v63 = vld [vmem:[#allocation39_spill] sm:$0xff] }
 0x286   : > { %3543 = vmatmul.bf16.gmra.mxu0 %v8709_v31  ;;  %v1622_v41 = vadd.f32 %v8715_v7, %v8714_v63 }
 0x288   : > { %v1885_v14 = vpop.f32.mrf.mxu3  ;;  %v7124_v17 = vpop.f32.mrf.mxu1 }
 0x289   : > { %8711 = vst [vmem:[#allocation114_spill] sm:$0xff] %v7124_v17  ;;  %v7127_v48 = vadd.f32 %v1885_v14, %v8712_v58  ;;  %v8718_v17 = vld [vmem:[#allocation40_spill] sm:$0xff]  ;;  %v8719_v14 = vld [vmem:[#allocation43_spill] sm:$0xff]  ;;  %v7145_v55 = vpop.f32.mrf.mxu0 }
 0x28a   : > { %8720 = vst [vmem:[#allocation35_spill] sm:$0xff] %v7145_v55 }
 0x28b   : > { %4975 = vmatmul.msk.bf16.gmra.mxu1 %vm8713_vm0, %v6697_v35  ;;  %v8721_v35 = vld [vmem:[#allocation20_spill] sm:$0xff] }
 0x290   : > { %v1887_v44 = vpop.f32.mrf.mxu3  ;;  %v7138_v22 = vpop.f32.mrf.mxu1 }
 0x291   : > { %v7136_v26 = vadd.f32 %v1887_v44, %v1622_v41  ;;  %8717 = vst [vmem:[#allocation39_spill] sm:$0xff] %v7138_v22  ;;  %v8723_v44 = vld [vmem:[#allocation46_spill] sm:$0xff]  ;;  %v7155_v43 = vpop.f32.mrf.mxu0 }
 0x292   : > { %8724 = vst [vmem:[#allocation43_spill] sm:$0xff] %v7155_v43 }
 0x295   : > { %1929 = vmatmul.bf16.gmra.mxu3 %v8704_v36  ;;  %v5469_v36 = vld [vmem:[%s8320_s3 + $0x188] sm:$0xff] }
 0x296   : > { %3548 = vmatmul.bf16.gmra.mxu0 %v8718_v17  ;;  %3203 = vmatpush.bf16.msra.mxu3 %v5469_v36 }
 0x298   : > { %v1890_v58 = vpop.f32.mrf.mxu3  ;;  %v7150_v63 = vpop.f32.mrf.mxu1 }
 0x299   : > { %v7143_v38 = vadd.f32 %v1890_v58, %v8719_v14  ;;  %8722 = vst [vmem:[#allocation40_spill] sm:$0xff] %v7150_v63  ;;  %v8726_v14 = vld [vmem:[#allocation48_spill] sm:$0xff]  ;;  %v8731_v63 = vld [vmem:[#allocation50_spill] sm:$0xff] }
 0x29b   : > { %4978 = vmatmul.msk.bf16.gmra.mxu1 %vm6691_vm14, %v8721_v35 }
 0x2a0   : > { %v1892_v41 = vpop.f32.mrf.mxu3  ;;  %v7161_v58 = vpop.f32.mrf.mxu1 }
 0x2a1   : > { %v7153_v7 = vadd.f32 %v1892_v41, %v8723_v44  ;;  %8725 = vst [vmem:[#allocation46_spill] sm:$0xff] %v7161_v58  ;;  %v8727_v41 = vld [vmem:[#allocation45_spill] sm:$0xff]  ;;  %v7170_v44 = vpop.f32.mrf.mxu0  ;;  %v7178_v58 = vpop.f32.mrf.mxu2 }
 0x2a2   : > { %vm8728_vm14 = vnez %v8727_v41  ;;  %8729 = vst [vmem:[#allocation48_spill] sm:$0xff] %v7170_v44  ;;  %v8736_v44 = vld [vmem:[#allocation11_spill] sm:$0xff] }
 0x2a3   : > { %8733 = vst [vmem:[#allocation115_spill] sm:$0xff] %v7178_v58 }
 0x2a5   : > { %1934 = vmatmul.bf16.gmra.mxu3 %v8709_v31 }
 0x2a6   : > { %3553 = vmatmul.bf16.gmra.mxu0 %v6736_v6 }
 0x2a8   : > { %v1895_v39 = vpop.f32.mrf.mxu3  ;;  %v7172_v31 = vpop.f32.mrf.mxu1 }
 0x2a9   : > { %v7165_v55 = vadd.f32 %v1895_v39, %v8726_v14  ;;  %8730 = vst [vmem:[#allocation45_spill] sm:$0xff] %v7172_v31  ;;  %v7181_v39 = vpop.f32.mrf.mxu0  ;;  %v8735_v14 = vld [vmem:[#allocation55_spill] sm:$0xff] }
 0x2aa   : > { %8734 = vst [vmem:[#allocation116_spill] sm:$0xff] %v7181_v39  ;;  %v8737_v31 = vld [vmem:[#allocation19_spill] sm:$0xff] }
 0x2ab   : > { %5266 = vmatmul.msk.bf16.vlgmr.msra.gmra.mxu1 %vm8728_vm14, %v5983_v45  ;;  %vm8738_vm14 = vnez %v8737_v31 }
 0x2b0   : > { %v1897_v43 = vpop.f32.mrf.mxu3  ;;  %v7186_v45 = vpop.f32.mrf.mxu1 }
 0x2b1   : > { %v7175_v22 = vadd.f32 %v1897_v43, %v8731_v63  ;;  %v7191_v43 = vpop.f32.mrf.mxu2  ;;  %v7196_v58 = vpop.f32.mrf.mxu0 }
 0x2b2   : > { %8739 = vst [vmem:[#allocation55_spill] sm:$0xff] %v7191_v43 }
 0x2b3   : > { %8732 = vst [vmem:[#allocation50_spill] sm:$0xff] %v7175_v22 }
 0x2b4   : > { %8741 = vst [vmem:[#allocation11_spill] sm:$0xff] %v7196_v58  ;;  %v8746_v58 = vld [vmem:[#allocation66_spill] sm:$0xff] }
 0x2b5   : > { %1939 = vmatmul.bf16.gmra.mxu3 %v8718_v17  ;;  %v8740_v17 = vld [vmem:[#allocation58_spill] sm:$0xff] }
 0x2b6   : > { %3558 = vmatmul.bf16.gmra.mxu0 %v6530_v1 }
 0x2b8   : > { %v1900_v36 = vpop.f32.mrf.mxu3  ;;  %v7198_v22 = vpop.f32.mrf.mxu1 }
 0x2b9   : > { %v7184_v41 = vadd.f32 %v1900_v36, %v8735_v14  ;;  %8742 = vst [vmem:[#allocation19_spill] sm:$0xff] %v7198_v22  ;;  %v5468_v36 = vld [vmem:[%s8320_s3 + $0x180] sm:$0xff]  ;;  %v7208_v14 = vpop.f32.mrf.mxu2 }
 0x2ba   : > { %3204 = vmatpush.bf16.msra.mxu3 %v5468_v36 }
 0x2bb   : > { %5269 = vmatmul.msk.bf16.gmra.mxu1 %vm8738_vm14, %v8736_v44 }
 0x2c0   : > { %v1902_v63 = vpop.f32.mrf.mxu3 }
 0x2c1   : > { %v7194_v35 = vadd.f32 %v1902_v63, %v8740_v17  ;;  %v8743_v63 = vld [vmem:[#allocation24_spill] sm:$0xff]  ;;  %v7213_v17 = vpop.f32.mrf.mxu0  ;;  %v7220_v22 = vpop.f32.mrf.mxu2 }
 0x2c2   : > { %vm8744_vm14 = vnez %v8743_v63  ;;  %8745 = vst [vmem:[#allocation58_spill] sm:$0xff] %v7213_v17 }
 0x2c5   : > { %1944 = vmatmul.bf16.gmra.mxu3 %v6736_v6  ;;  %v7215_v6 = vpop.f32.mrf.mxu1 }
 0x2c6   : > { %3563 = vmatmul.bf16.gmra.mxu0 %v6811_v56 }
 0x2c8   : > { %v1905_v44 = vpop.f32.mrf.mxu3 }
 0x2c9   : > { %v7206_v31 = vadd.f32 %v1905_v44, %v6665_v29  ;;  %v7224_v29 = vpop.f32.mrf.mxu0  ;;  %v7232_v17 = vpop.f32.mrf.mxu2 }
 0x2ca   : > { %8748 = vst [vmem:[#allocation66_spill] sm:$0xff] %v7224_v29  ;;  %v8767_v29 = vld [vmem:[#allocation9_spill] sm:$0xff] }
 0x2cb   : > { %5272 = vmatmul.msk.bf16.gmra.mxu1 %vm8744_vm14, %v6087_v54  ;;  %vm8769_vm14 = vnez %v8544_v5 }
 0x2cd   : > { %v2628_v36 = vpop.f32.mrf.mxu1 }
 0x2d0   : > { %v1907_v43 = vpop.f32.mrf.mxu3 }
 0x2d1   : > { %v7218_v39 = vadd.f32 %v1907_v43, %v8746_v58 }
 0x2d3   : > { %8747 = vst [vmem:[#allocation24_spill] sm:$0xff] %v7218_v39 }
 0x2d5   : > { %1949 = vmatmul.bf16.gmra.mxu3 %v6530_v1  ;;  %v7237_v1 = vpop.f32.mrf.mxu0  ;;  %v7239_v39 = vpop.f32.mrf.mxu1 }
 0x2d6   : > { %3568 = vmatmul.bf16.gmra.mxu0 %v6860_v49  ;;  %8750 = vst [vmem:[#allocation28_spill] sm:$0xff] %v7237_v1 }
 0x2d7   : > { %8751 = vst [vmem:[#allocation117_spill] sm:$0xff] %v7239_v39 }
 0x2d8   : > { %v1910_v44 = vpop.f32.mrf.mxu3 }
 0x2d9   : > { %v7227_v54 = vadd.f32 %v1910_v44, %v6716_v62  ;;  %v7243_v62 = vpop.f32.mrf.mxu2 }
 0x2db   : > { %5275 = vmatmul.msk.bf16.gmra.mxu1 %vm6253_vm7, %v6125_v30 }
 0x2dd   : > { %v7251_v30 = vpop.f32.mrf.mxu0 }
 0x2de   : > { %8752 = vst [vmem:[#allocation118_spill] sm:$0xff] %v7251_v30 }
 0x2e0   : > { %v1912_v58 = vpop.f32.mrf.mxu3 }
 0x2e1   : > { %v7235_v43 = vadd.f32 %v1912_v58, %v6726_v20  ;;  %v7253_v20 = vpop.f32.mrf.mxu1 }
 0x2e2   : > { %8753 = vst [vmem:[#allocation119_spill] sm:$0xff] %v7253_v20 }
 0x2e5   : > { %1954 = vmatmul.bf16.gmra.mxu3 %v6811_v56  ;;  %v7258_v56 = vpop.f32.mrf.mxu2 }
 0x2e6   : > { %3573 = vmatmul.bf16.gmra.mxu0 %v6903_v21  ;;  %v7261_v21 = vpop.f32.mrf.mxu0 }
 0x2e7   : > { %8754 = vst [vmem:[#allocation120_spill] sm:$0xff] %v7261_v21  ;;  %v8758_v21 = vld [vmem:[#allocation14_spill] sm:$0xff] }
 0x2e8   : > { %v1915_v44 = vpop.f32.mrf.mxu3 }
 0x2e9   : > { %v7246_v63 = vadd.f32 %v1915_v44, %v6750_v61  ;;  %v7263_v61 = vpop.f32.mrf.mxu1 }
 0x2ea   : > { %8755 = vst [vmem:[#allocation121_spill] sm:$0xff] %v7263_v61  ;;  %v8759_v61 = vld [vmem:[#allocation70_spill] sm:$0xff] }
 0x2eb   : > { %5278 = vmatmul.msk.bf16.gmra.mxu1 %vm6313_vm15, %v6186_v50  ;;  %vm8760_vm7 = vnez %v8759_v61 }
 0x2f0   : > { %v1917_v58 = vpop.f32.mrf.mxu3 }
 0x2f1   : > { %v7256_v39 = vadd.f32 %v1917_v58, %v6760_v11  ;;  %v7272_v11 = vpop.f32.mrf.mxu2  ;;  %v7274_v44 = vpop.f32.mrf.mxu1 }
 0x2f2   : > { %8756 = vst [vmem:[#allocation122_spill] sm:$0xff] %v7274_v44 }
 0x2f5   : > { %1959 = vmatmul.bf16.gmra.mxu3 %v6860_v49  ;;  %v8757_v49 = vld [vmem:[#allocation78_spill] sm:$0xff] }
 0x2f6   : > { %3578 = vmatmul.bf16.gmra.mxu0 %v8645_v12 }
 0x2f8   : > { %v1920_v42 = vpop.f32.mrf.mxu3 }
 0x2f9   : > { %v7267_v50 = vadd.f32 %v1920_v42, %v6783_v27  ;;  %v7282_v30 = vpop.f32.mrf.mxu2  ;;  %v8761_v42 = vld [vmem:[#allocation80_spill] sm:$0xff]  ;;  %v7287_v47 = vpop.f32.mrf.mxu1 }
 0x2fa   : > { %8762 = vst [vmem:[#allocation78_spill] sm:$0xff] %v7287_v47 }
 0x2fb   : > { %5281 = vmatmul.msk.bf16.gmra.mxu1 %vm6371_vm5, %v6234_v8  ;;  %v8763_v8 = vld [vmem:[#allocation41_spill] sm:$0xff]  ;;  %vm8768_vm5 = vnez %v8767_v29  ;;  %v8772_v29 = vld [vmem:[#allocation22_spill] sm:$0xff] }
 0x2fc   : > { %vm8764_vm15 = vnez %v8763_v8 }
 0x300   : > { %v1922_v58 = vpop.f32.mrf.mxu3 }
 0x301   : > { %v7277_v20 = vadd.f32 %v1922_v58, %v8757_v49  ;;  %v7292_v44 = vpop.f32.mrf.mxu2  ;;  %v7297_v61 = vpop.f32.mrf.mxu1 }
 0x302   : > { %8765 = vst [vmem:[#allocation14_spill] sm:$0xff] %v7297_v61 }
 0x305   : > { %5125 = vmatmul.msk.bf16.vlgmr.msra.gmra.mxu3 %vm8760_vm7, %v8758_v21  ;;  %v8766_v21 = vld [vmem:[#allocation17_spill] sm:$0xff] }
 0x308   : > { %v1925_v27 = vpop.f32.mrf.mxu3 }
 0x309   : > { %v7285_v1 = vadd.f32 %v1925_v27, %v8761_v42  ;;  %v7305_v47 = vpop.f32.mrf.mxu2 }
 0x30b   : > { %5284 = vmatmul.msk.bf16.gmra.mxu1 %vm8764_vm15, %v6291_v34  ;;  %v7310_v34 = vpop.f32.mrf.mxu1 }
 0x30c   : > { %8770 = vst [vmem:[#allocation70_spill] sm:$0xff] %v7310_v34 }
 0x310   : > { %v1927_v58 = vpop.f32.mrf.mxu3 }
 0x311   : > { %v7295_v49 = vadd.f32 %v1927_v58, %v6844_v52  ;;  %v7315_v58 = vpop.f32.mrf.mxu2 }
 0x312   : > { %8771 = vst [vmem:[#allocation80_spill] sm:$0xff] %v7315_v58 }
 0x315   : > { %5128 = vmatmul.msk.bf16.gmra.mxu3 %vm8768_vm5, %v8766_v21  ;;  %v8773_v21 = vld [vmem:[#allocation13_spill] sm:$0xff] }
 0x316   : > { %vm8774_vm7 = vnez %v8773_v21  ;;  %v8778_v21 = vld [vmem:[#allocation26_spill] sm:$0xff] }
 0x318   : > { %v1930_v27 = vpop.f32.mrf.mxu3 }
 0x319   : > { %v7303_v42 = vadd.f32 %v1930_v27, %v6879_v37  ;;  %v7320_v37 = vpop.f32.mrf.mxu1 }
 0x31a   : > { %8775 = vst [vmem:[#allocation41_spill] sm:$0xff] %v7320_v37  ;;  %v8779_v37 = vld [vmem:[#allocation16_spill] sm:$0xff] }
 0x31b   : > { %5287 = vmatmul.msk.bf16.gmra.mxu1 %vm8769_vm14, %v6350_v9  ;;  %vm8780_vm15 = vnez %v8779_v37 }
 0x320   : > { %v1932_v52 = vpop.f32.mrf.mxu3 }
 0x321   : > { %v7313_v8 = vadd.f32 %v1932_v52, %v6890_v10  ;;  %v2926_v10 = vpop.f32.mrf.mxu2 }
 0x325   : > { %5131 = vmatmul.msk.bf16.gmra.mxu3 %vm8774_vm7, %v8772_v29  ;;  %v7332_v29 = vpop.f32.mrf.mxu1 }
 0x326   : > { %8777 = vst [vmem:[#allocation9_spill] sm:$0xff] %v7332_v29 }
 0x328   : > { %v1935_v27 = vpop.f32.mrf.mxu3 }
 0x329   : > { %v1985_v61 = vadd.f32 %v1935_v27, %v6916_v19 }
 0x32b   : > { %v2380_v5 = vadd.f32 %v6998_v33, %v1985_v61  ;;  %5290 = vmatmul.msk.bf16.gmra.mxu1 %vm6563_vm3, %v6403_v32  ;;  %v8785_v61 = vld [vmem:[#allocation30_spill] sm:$0xff] }
 0x32d   : > { %v2678_v9 = vadd.f32 %v2628_v36, %v2380_v5  ;;  %v7343_v59 = vpop.f32.mrf.mxu1 }
 0x32e   : > { %8783 = vst [vmem:[#allocation13_spill] sm:$0xff] %v7343_v59 }
 0x32f   : > { %v7327_v52 = vadd.f32 %v2926_v10, %v2678_v9  ;;  %v8792_v10 = vld [vmem:[#allocation34_spill] sm:$0xff] }
 0x330   : > { %v1937_v34 = vpop.f32.mrf.mxu3 }
 0x331   : > { %v7330_v58 = vadd.f32 %v1937_v34, %v6923_v23  ;;  %v8786_v34 = vld [vmem:[#allocation21_spill] sm:$0xff] }
 0x332   : > { %vm8787_vm3 = vnez %v8786_v34  ;;  %v8797_v34 = vld [vmem:[#allocation88_spill] sm:$0xff] }
 0x333   : > { %8776 = vst [vmem:[#allocation17_spill] sm:$0xff] %v7330_v58 }
 0x335   : > { %5134 = vmatmul.msk.bf16.gmra.mxu3 %vm8780_vm15, %v8778_v21  ;;  %v7351_v37 = vpop.f32.mrf.mxu1  ;;  %v8806_v21 = vld [vmem:[#allocation44_spill] sm:$0xff] }
 0x336   : > { %8788 = vst [vmem:[#allocation16_spill] sm:$0xff] %v7351_v37 }
 0x338   : > { %v1940_v19 = vpop.f32.mrf.mxu3 }
 0x339   : > { %v7338_v33 = vadd.f32 %v1940_v19, %v7004_v40  ;;  %v8794_v19 = vld [vmem:[#allocation7_spill] sm:$0xff] }
 0x33a   : > { %v1685_v32 = vadd.f32 %v7052_v0, %v8794_v19  ;;  %v8801_v0 = vld [vmem:[#allocation6_spill] sm:$0xff] }
 0x33b   : > { %8781 = vst [vmem:[#allocation22_spill] sm:$0xff] %v7338_v33  ;;  %5293 = vmatmul.msk.bf16.gmra.mxu1 %vm6632_vm12, %v6453_v28  ;;  %v1690_v19 = vadd.f32 %v7075_v2, %v8801_v0  ;;  %v8808_v2 = vld [vmem:[#allocation12_spill] sm:$0xff]  ;;  %v8861_v33 = vld [vmem:[#allocation51_spill] sm:$0xff] }
 0x33c   : > { %v1695_v0 = vadd.f32 %v7095_v15, %v8808_v2  ;;  %v8813_v15 = vld [vmem:[#allocation93_spill] sm:$0xff] }
 0x33d   : > { %v7359_v28 = vpop.f32.mrf.mxu1 }
 0x340   : > { %v1942_v36 = vpop.f32.mrf.mxu3 }
 0x341   : > { %v7346_v23 = vadd.f32 %v1942_v36, %v7013_v51 }
 0x343   : > { %8784 = vst [vmem:[#allocation26_spill] sm:$0xff] %v7346_v23 }
 0x345   : > { %5137 = vmatmul.msk.bf16.gmra.mxu3 %vm8787_vm3, %v8785_v61  ;;  %v7371_v61 = vpop.f32.mrf.mxu1 }
 0x348   : > { %v1945_v27 = vpop.f32.mrf.mxu3 }
 0x349   : > { %v7354_v40 = vadd.f32 %v1945_v27, %v7027_v46 }
 0x34b   : > { %8789 = vst [vmem:[#allocation62_spill] sm:$0xff] %v7354_v40  ;;  %5296 = vmatmul.msk.bf16.gmra.mxu1 %vm6700_vm10, %v6517_v24  ;;  %v8804_v24 = vld [vmem:[#allocation90_spill] sm:$0xff]  ;;  %v8850_v40 = vld [vmem:[#allocation109_spill] sm:$0xff] }
 0x350   : > { %v1947_v9 = vpop.f32.mrf.mxu3 }
 0x351   : > { %v7362_v51 = vadd.f32 %v1947_v9, %v7041_v4  ;;  %v1687_v4 = vadd.f32 %v7061_v60, %v8797_v34  ;;  %v7380_v9 = vpop.f32.mrf.mxu1  ;;  %v1692_v34 = vadd.f32 %v7087_v3, %v8804_v24  ;;  %v8811_v24 = vld [vmem:[#allocation52_spill] sm:$0xff] }
 0x353   : > { %8791 = vst [vmem:[#allocation30_spill] sm:$0xff] %v7362_v51 }
 0x355   : > { %5140 = vmatmul.msk.bf16.gmra.mxu3 %vm8643_vm2, %v8792_v10  ;;  %v8799_v10 = vld [vmem:[#allocation38_spill] sm:$0xff] }
 0x358   : > { %v1950_v36 = vpop.f32.mrf.mxu3 }
 0x359   : > { %v7369_v46 = vadd.f32 %v1950_v36, %v1685_v32  ;;  %v7392_v60 = vpop.f32.mrf.mxu1 }
 0x35b   : > { %8795 = vst [vmem:[#allocation21_spill] sm:$0xff] %v7369_v46  ;;  %5299 = vmatmul.msk.bf16.gmra.mxu1 %vm6741_vm13, %v6570_v25  ;;  %v8847_v46 = vld [vmem:[#allocation23_spill] sm:$0xff]  ;;  %vm8862_vm13 = vnez %v8861_v33 }
 0x360   : > { %v1952_v27 = vpop.f32.mrf.mxu3 }
 0x361   : > { %v7378_v5 = vadd.f32 %v1952_v27, %v1687_v4 }
 0x363   : > { %8798 = vst [vmem:[#allocation69_spill] sm:$0xff] %v7378_v5 }
 0x365   : > { %5143 = vmatmul.msk.bf16.gmra.mxu3 %vm8650_vm9, %v8799_v10 }
 0x368   : > { %v1955_v32 = vpop.f32.mrf.mxu3 }
 0x369   : > { %v7387_v36 = vadd.f32 %v1955_v32, %v1690_v19  ;;  %v7403_v19 = vpop.f32.mrf.mxu1 }
 0x36b   : > { %8802 = vst [vmem:[#allocation34_spill] sm:$0xff] %v7387_v36  ;;  %5302 = vmatmul.msk.bf16.gmra.mxu1 %vm6768_vm1, %v6867_v16  ;;  %v8810_v16 = vld [vmem:[#allocation96_spill] sm:$0xff] }
 0x36c   : > { %v1697_v3 = vadd.f32 %v7107_v53, %v8810_v16 }
 0x370   : > { %v1957_v4 = vpop.f32.mrf.mxu3 }
 0x371   : > { %v7396_v27 = vadd.f32 %v1957_v4, %v1692_v34  ;;  %v2360_v34 = vadd.f32 %v8811_v24, %v7127_v48  ;;  %v7416_v10 = vpop.f32.mrf.mxu1  ;;  %v8818_v48 = vld [vmem:[#allocation89_spill] sm:$0xff] }
 0x373   : > { %8805 = vst [vmem:[#allocation25_spill] sm:$0xff] %v7396_v27  ;;  %v2658_v2 = vadd.f32 %v8813_v15, %v2360_v34  ;;  %v8820_v34 = vld [vmem:[#allocation97_spill] sm:$0xff]  ;;  %v8840_v27 = vld [vmem:[#allocation72_spill] sm:$0xff] }
 0x374   : > { %v2366_v36 = vadd.f32 %v8840_v27, %v7184_v41 }
 0x375   : > { %5146 = vmatmul.msk.bf16.gmra.mxu3 %vm8660_vm4, %v8806_v21  ;;  %v2956_v16 = vadd.f32 %v8818_v48, %v2658_v2  ;;  %v8823_v2 = vld [vmem:[#allocation15_spill] sm:$0xff]  ;;  %v8824_v48 = vld [vmem:[#allocation56_spill] sm:$0xff] }
 0x378   : > { %v1960_v32 = vpop.f32.mrf.mxu3 }
 0x379   : > { %v7405_v25 = vadd.f32 %v1960_v32, %v1695_v0  ;;  %v5499_v0 = vld [vmem:[%s8322_s5 + $0x38] sm:$0xff]  ;;  %v7434_v37 = vpop.f32.mrf.mxu1 }
 0x37a   : > { %v8814_v32 = vld [vmem:[#allocation49_spill] sm:$0xff]  ;;  %4118 = vmatpush.bf16.msra.mxu2 %v5499_v0  ;;  %v8822_v0 = vld [vmem:[#allocation92_spill] sm:$0xff] }
 0x37b   : > { %8809 = vst [vmem:[#allocation7_spill] sm:$0xff] %v7405_v25  ;;  %5305 = vmatmul.msk.bf16.gmra.mxu1 %vm6814_vm6, %v6910_v57  ;;  %vm8816_vm6 = vnez %v8815_v18  ;;  %v8817_v57 = vld [vmem:[#allocation57_spill] sm:$0xff]  ;;  %v8821_v18 = vld [vmem:[#allocation60_spill] sm:$0xff] }
 0x37c   : > { %v2361_v53 = vadd.f32 %v8817_v57, %v7136_v26 }
 0x37e   : > { %v2659_v15 = vadd.f32 %v8820_v34, %v2361_v53 }
 0x380   : > { %v1962_v4 = vpop.f32.mrf.mxu3 }
 0x381   : > { %v7414_v21 = vadd.f32 %v1962_v4, %v1697_v3  ;;  %v8828_v4 = vld [vmem:[#allocation95_spill] sm:$0xff] }
 0x383   : > { %8812 = vst [vmem:[#allocation73_spill] sm:$0xff] %v7414_v21  ;;  %v2957_v21 = vadd.f32 %v8822_v0, %v2659_v15  ;;  %v8829_v15 = vld [vmem:[#allocation99_spill] sm:$0xff]  ;;  %v8831_v0 = vld [vmem:[#allocation98_spill] sm:$0xff] }
 0x385   : > { %5149 = vmatmul.msk.bf16.gmra.mxu3 %vm8816_vm6, %v8814_v32  ;;  %v2362_v32 = vadd.f32 %v8821_v18, %v7143_v38 }
 0x387   : > { %v2660_v57 = vadd.f32 %v8823_v2, %v2362_v32 }
 0x388   : > { %v3206_v3 = vpop.f32.mrf.mxu3 }
 0x389   : > { %v7428_v24 = vadd.f32 %v3206_v3, %v2956_v16  ;;  %v8825_v16 = vld [vmem:[#allocation42_spill] sm:$0xff]  ;;  %v7445_v3 = vpop.f32.mrf.mxu1  ;;  %v2958_v34 = vadd.f32 %v8828_v4, %v2660_v57  ;;  %v8834_v4 = vld [vmem:[#allocation47_spill] sm:$0xff] }
 0x38a   : > { %vm8826_vm12 = vnez %v8825_v16  ;;  %v8832_v57 = vld [vmem:[#allocation18_spill] sm:$0xff]  ;;  %vm8835_vm10 = vnez %v8834_v4  ;;  %v8841_v4 = vld [vmem:[#allocation103_spill] sm:$0xff] }
 0x38b   : > { %5308 = vmatmul.msk.bf16.gmra.mxu1 %vm6863_vm8, %v8697_v13  ;;  %v8827_v13 = vld [vmem:[#allocation65_spill] sm:$0xff] }
 0x38c   : > { %v2363_v53 = vadd.f32 %v8827_v13, %v7153_v7 }
 0x38e   : > { %v2661_v18 = vadd.f32 %v8829_v15, %v2363_v53  ;;  %v8833_v53 = vld [vmem:[#allocation64_spill] sm:$0xff] }
 0x390   : > { %v3208_v59 = vpop.f32.mrf.mxu3  ;;  %v2959_v2 = vadd.f32 %v8831_v0, %v2661_v18  ;;  %v8838_v18 = vld [vmem:[#allocation101_spill] sm:$0xff] }
 0x391   : > { %v7439_v26 = vadd.f32 %v3208_v59, %v2957_v21  ;;  %v7454_v59 = vpop.f32.mrf.mxu0  ;;  %v8830_v21 = vld [vmem:[#allocation67_spill] sm:$0xff] }
 0x392   : > { %v2364_v32 = vadd.f32 %v8830_v21, %v7165_v55  ;;  %v8837_v55 = vld [vmem:[#allocation71_spill] sm:$0xff] }
 0x394   : > { %v2662_v13 = vadd.f32 %v8832_v57, %v2364_v32  ;;  %v8839_v57 = vld [vmem:[#allocation104_spill] sm:$0xff] }
 0x395   : > { %5152 = vmatmul.msk.bf16.gmra.mxu3 %vm8826_vm12, %v8824_v48  ;;  %v7459_v48 = vpop.f32.mrf.mxu1 }
 0x396   : > { %v2960_v21 = vadd.f32 %v8838_v18, %v2662_v13  ;;  %v8842_v13 = vld [vmem:[#allocation106_spill] sm:$0xff] }
 0x398   : > { %v3211_v25 = vpop.f32.mrf.mxu3 }
 0x399   : > { %v7450_v38 = vadd.f32 %v3211_v25, %v2958_v34  ;;  %v5498_v25 = vld [vmem:[%s8322_s5 + $0x30] sm:$0xff]  ;;  %v8836_v34 = vld [vmem:[#allocation50_spill] sm:$0xff]  ;;  %v7473_v0 = vpop.f32.mrf.mxu0 }
 0x39a   : > { %4119 = vmatpush.bf16.msra.mxu2 %v5498_v25  ;;  %v2365_v15 = vadd.f32 %v8837_v55, %v8836_v34  ;;  %v2664_v55 = vadd.f32 %v8842_v13, %v2366_v36  ;;  %v8849_v36 = vld [vmem:[#allocation75_spill] sm:$0xff] }
 0x39b   : > { %3908 = vmatmul.bf16.gmra.mxu1 %v8645_v12  ;;  %v2368_v13 = vadd.f32 %v8849_v36, %v7206_v31  ;;  %v8856_v36 = vld [vmem:[#allocation79_spill] sm:$0xff] }
 0x39c   : > { %v2663_v29 = vadd.f32 %v8839_v57, %v2365_v15  ;;  %v8846_v15 = vld [vmem:[#allocation74_spill] sm:$0xff]  ;;  %v2962_v41 = vadd.f32 %v8847_v46, %v2664_v55  ;;  %v5497_v46 = vld [vmem:[%s8322_s5 + $0x28] sm:$0xff]  ;;  %v8852_v55 = vld [vmem:[#allocation61_spill] sm:$0xff] }
 0x39d   : > { %v7477_v32 = vpop.f32.mrf.mxu1  ;;  %v2367_v57 = vadd.f32 %v8846_v15, %v7194_v35  ;;  %v8851_v35 = vld [vmem:[#allocation10_spill] sm:$0xff] }
 0x39e   : > { %v2666_v15 = vadd.f32 %v8851_v35, %v2368_v13  ;;  %4120 = vmatpush.bf16.msra.mxu2 %v5497_v46  ;;  %v2370_v13 = vadd.f32 %v8856_v36, %v7227_v54  ;;  %v8864_v36 = vld [vmem:[#allocation113_spill] sm:$0xff] }
 0x3a0   : > { %v3213_v16 = vpop.f32.mrf.mxu3 }
 0x3a1   : > { %v7461_v7 = vadd.f32 %v3213_v16, %v2959_v2  ;;  %v7485_v34 = vpop.f32.mrf.mxu0 }
 0x3a5   : > { %5155 = vmatmul.msk.bf16.gmra.mxu3 %vm8835_vm10, %v8833_v53  ;;  %v2961_v53 = vadd.f32 %v8841_v4, %v2663_v29  ;;  %v7488_v18 = vpop.f32.mrf.mxu1  ;;  %v8848_v4 = vld [vmem:[#allocation108_spill] sm:$0xff] }
 0x3a8   : > { %v3216_v2 = vpop.f32.mrf.mxu3 }
 0x3a9   : > { %v7475_v16 = vadd.f32 %v3216_v2, %v2960_v21  ;;  %v8843_v21 = vld [vmem:[#allocation53_spill] sm:$0xff]  ;;  %v8844_v2 = vld [vmem:[#allocation54_spill] sm:$0xff] }
 0x3aa   : > { %vm8845_vm1 = vnez %v8844_v2 }
 0x3ad   : > { %v7501_v51 = vpop.f32.mrf.mxu1 }
 0x3b0   : > { %v3218_v25 = vpop.f32.mrf.mxu3 }
 0x3b1   : > { %v7483_v5 = vadd.f32 %v3218_v25, %v2961_v53  ;;  %v2665_v53 = vadd.f32 %v8848_v4, %v2367_v57  ;;  %v7499_v25 = vpop.f32.mrf.mxu0  ;;  %v8860_v57 = vld [vmem:[#allocation68_spill] sm:$0xff] }
 0x3b3   : > { %v2963_v2 = vadd.f32 %v8850_v40, %v2665_v53 }
 0x3b5   : > { %5158 = vmatmul.msk.bf16.gmra.mxu3 %vm8845_vm1, %v8843_v21  ;;  %v7518_v4 = vpop.f32.mrf.mxu1 }
 0x3b6   : > { %8855 = vst [vmem:[#allocation88_spill] sm:$0xff] %v7518_v4 }
 0x3b8   : > { %v3221_v27 = vpop.f32.mrf.mxu3 }
 0x3b9   : > { %v7496_v29 = vadd.f32 %v3221_v27, %v2962_v41  ;;  %v7515_v41 = vpop.f32.mrf.mxu0  ;;  %v8854_v27 = vld [vmem:[#allocation115_spill] sm:$0xff] }
 0x3ba   : > { %v2964_v31 = vadd.f32 %v8854_v27, %v2666_v15  ;;  %v8863_v15 = vld [vmem:[#allocation81_spill] sm:$0xff] }
 0x3bb   : > { %v2371_v27 = vadd.f32 %v8863_v15, %v7235_v43  ;;  %v8867_v43 = vld [vmem:[#allocation114_spill] sm:$0xff] }
 0x3bd   : > { %v7528_v35 = vpop.f32.mrf.mxu1  ;;  %v2669_v4 = vadd.f32 %v8864_v36, %v2371_v27 }
 0x3be   : > { %8858 = vst [vmem:[#allocation29_spill] sm:$0xff] %v7528_v35 }
 0x3bf   : > { %v2967_v33 = vadd.f32 %v7220_v22, %v2669_v4  ;;  %v8871_v22 = vld [vmem:[#allocation84_spill] sm:$0xff] }
 0x3c0   : > { %v3223_v21 = vpop.f32.mrf.mxu3 }
 0x3c1   : > { %v7506_v23 = vadd.f32 %v3223_v21, %v2963_v2  ;;  %v7524_v2 = vpop.f32.mrf.mxu0 }
 0x3c2   : > { %8857 = vst [vmem:[#allocation38_spill] sm:$0xff] %v7524_v2 }
 0x3c5   : > { %5161 = vmatmul.msk.bf16.gmra.mxu3 %vm8701_vm11, %v8852_v55  ;;  %v8859_v55 = vld [vmem:[#allocation31_spill] sm:$0xff]  ;;  %v7542_v2 = vpop.f32.mrf.mxu1 }
 0x3c6   : > { %v2668_v46 = vadd.f32 %v8859_v55, %v2370_v13  ;;  %8865 = vst [vmem:[#allocation6_spill] sm:$0xff] %v7542_v2  ;;  %v8866_v13 = vld [vmem:[#allocation83_spill] sm:$0xff] }
 0x3c7   : > { %v2372_v55 = vadd.f32 %v8866_v13, %v7246_v63  ;;  %v2373_v63 = vadd.f32 %v8871_v22, %v7256_v39  ;;  %v8874_v39 = vld [vmem:[#allocation40_spill] sm:$0xff] }
 0x3c8   : > { %v3226_v40 = vpop.f32.mrf.mxu3 }
 0x3c9   : > { %v7520_v53 = vadd.f32 %v3226_v40, %v2964_v31  ;;  %v2966_v31 = vadd.f32 %v7208_v14, %v2668_v46  ;;  %v7539_v54 = vpop.f32.mrf.mxu0  ;;  %v2670_v15 = vadd.f32 %v8867_v43, %v2372_v55  ;;  %v5496_v14 = vld [vmem:[%s8322_s5 + $0x20] sm:$0xff]  ;;  %v8872_v55 = vld [vmem:[#allocation39_spill] sm:$0xff]  ;;  %v8873_v43 = vld [vmem:[#allocation85_spill] sm:$0xff] }
 0x3ca   : > { %4121 = vmatpush.bf16.msra.mxu2 %v5496_v14  ;;  %v2374_v2 = vadd.f32 %v8873_v43, %v7267_v50  ;;  %v8877_v43 = vld [vmem:[#allocation87_spill] sm:$0xff] }
 0x3cb   : > { %v2968_v4 = vadd.f32 %v7232_v17, %v2670_v15  ;;  %v8875_v17 = vld [vmem:[#allocation86_spill] sm:$0xff] }
 0x3cc   : > { %v2672_v22 = vadd.f32 %v8874_v39, %v2374_v2  ;;  %v2375_v15 = vadd.f32 %v8875_v17, %v7277_v20 }
 0x3d0   : > { %v7526_v21 = vpop.f32.mrf.mxu3 }
 0x3d1   : > { %v7553_v46 = vpop.f32.mrf.mxu0 }
 0x3d5   : > { %5164 = vmatmul.msk.bf16.gmra.mxu3 %vm8862_vm13, %v8860_v57 }
 0x3d8   : > { %v3231_v40 = vpop.f32.mrf.mxu3 }
 0x3d9   : > { %v7537_v58 = vadd.f32 %v3231_v40, %v2966_v31  ;;  %v8868_v31 = vld [vmem:[#allocation20_spill] sm:$0xff]  ;;  %v7558_v40 = vpop.f32.mrf.mxu1 }
 0x3da   : > { %8870 = vst [vmem:[#allocation76_spill] sm:$0xff] %v7558_v40 }
 0x3e0   : > { %v3233_v57 = vpop.f32.mrf.mxu3 }
 0x3e1   : > { %v7547_v35 = vadd.f32 %v3233_v57, %v2967_v33  ;;  %v2671_v33 = vadd.f32 %v8872_v55, %v2373_v63  ;;  %v7566_v57 = vpop.f32.mrf.mxu0  ;;  %v7571_v14 = vpop.f32.mrf.mxu1  ;;  %v2970_v63 = vadd.f32 %v7258_v56, %v2672_v22  ;;  %v8876_v55 = vld [vmem:[#allocation46_spill] sm:$0xff]  ;;  %v8878_v56 = vld [vmem:[#allocation45_spill] sm:$0xff] }
 0x3e2   : > { %v5495_v22 = vld [vmem:[%s8322_s5 + $0x18] sm:$0xff] }
 0x3e3   : > { %4122 = vmatpush.bf16.msra.mxu2 %v5495_v22 }
 0x3e5   : > { %5167 = vmatmul.msk.bf16.gmra.mxu3 %vm8713_vm0, %v8868_v31  ;;  %v2969_v31 = vadd.f32 %v7243_v62, %v2671_v33  ;;  %v2673_v33 = vadd.f32 %v8876_v55, %v2375_v15  ;;  %v8880_v15 = vld [vmem:[#allocation8_spill] sm:$0xff] }
 0x3e7   : > { %v2971_v2 = vadd.f32 %v7272_v11, %v2673_v33  ;;  %v5507_v33 = vld [vmem:[%s8324_s7 + $0x38] sm:$0xff] }
 0x3e8   : > { %v3236_v36 = vpop.f32.mrf.mxu3  ;;  %4198 = vmatpush.bf16.msrb.mxu3 %v5507_v33 }
 0x3e9   : > { %v7563_v13 = vadd.f32 %v3236_v36, %v2968_v4  ;;  %v7580_v4 = vpop.f32.mrf.mxu0  ;;  %v7584_v62 = vpop.f32.mrf.mxu1 }
 0x3f0   : > { %v3238_v27 = vpop.f32.mrf.mxu3 }
 0x3f1   : > { %v7573_v40 = vadd.f32 %v3238_v27, %v2969_v31  ;;  %v2376_v31 = vadd.f32 %v8877_v43, %v7285_v1  ;;  %v7592_v20 = vpop.f32.mrf.mxu0  ;;  %v7598_v17 = vpop.f32.mrf.mxu1 }
 0x3f2   : > { %8879 = vst [vmem:[#allocation90_spill] sm:$0xff] %v7598_v17 }
 0x3f3   : > { %v2674_v39 = vadd.f32 %v8878_v56, %v2376_v31 }
 0x3f5   : > { %3280 = vmatmul.bf16.gmra.mxu3 %v8645_v12  ;;  %v2972_v1 = vadd.f32 %v7282_v30, %v2674_v39  ;;  %v8883_v39 = vld [vmem:[#allocation19_spill] sm:$0xff] }
 0x3f8   : > { %v3241_v36 = vpop.f32.mrf.mxu3 }
 0x3f9   : > { %v7582_v50 = vadd.f32 %v3241_v36, %v2970_v63  ;;  %v2377_v63 = vadd.f32 %v8880_v15, %v7295_v49  ;;  %v7609_v43 = vpop.f32.mrf.mxu0  ;;  %v7611_v31 = vpop.f32.mrf.mxu1  ;;  %v8884_v15 = vld [vmem:[#allocation94_spill] sm:$0xff] }
 0x3fa   : > { %8881 = vst [vmem:[#allocation44_spill] sm:$0xff] %v7611_v31  ;;  %v7624_v31 = vpop.f32.mrf.mxu2 }
 0x3fb   : > { %v2675_v55 = vadd.f32 %v7186_v45, %v2377_v63  ;;  %v2379_v63 = vadd.f32 %v8884_v15, %v7313_v8 }
 0x3fd   : > { %v2973_v49 = vadd.f32 %v7292_v44, %v2675_v55  ;;  %v8885_v44 = vld [vmem:[#allocation80_spill] sm:$0xff] }
 0x400   : > { %v3243_v12 = vpop.f32.mrf.mxu3 }
 0x401   : > { %v7590_v27 = vadd.f32 %v3243_v12, %v2971_v2  ;;  %v8882_v2 = vld [vmem:[#allocation91_spill] sm:$0xff]  ;;  %v3554_v45 = vpop.f32.mrf.mxu0 }
 0x402   : > { %v2378_v12 = vadd.f32 %v8882_v2, %v7303_v42  ;;  %v2677_v42 = vadd.f32 %v7215_v6, %v2379_v63  ;;  %v7637_v8 = vpop.f32.mrf.mxu2  ;;  %v5506_v63 = vld [vmem:[%s8324_s7 + $0x30] sm:$0xff] }
 0x403   : > { %4199 = vmatpush.bf16.msrb.mxu3 %v5506_v63  ;;  %v8897_v63 = vld [vmem:[#allocation11_spill] sm:$0xff] }
 0x404   : > { %v2676_v22 = vadd.f32 %v8883_v39, %v2378_v12  ;;  %v2975_v55 = vadd.f32 %v8885_v44, %v2677_v42 }
 0x408   : > { %v3246_v11 = vpop.f32.mrf.mxu3 }
 0x409   : > { %v7603_v36 = vadd.f32 %v3246_v11, %v2972_v1  ;;  %v2974_v1 = vadd.f32 %v7305_v47, %v2676_v22  ;;  %v3884_v11 = vpop.f32.mrf.mxu1  ;;  %v7628_v2 = vpop.f32.mrf.mxu0  ;;  %v5494_v47 = vld [vmem:[%s8322_s5 + $0x10] sm:$0xff] }
 0x40a   : > { %8886 = vst [vmem:[#allocation33_spill] sm:$0xff] %v7628_v2  ;;  %4123 = vmatpush.bf16.msra.mxu2 %v5494_v47  ;;  %v7649_v42 = vpop.f32.mrf.mxu2  ;;  %v8895_v47 = vld [vmem:[#allocation116_spill] sm:$0xff] }
 0x410   : > { %v3248_v30 = vpop.f32.mrf.mxu3 }
 0x411   : > { %v7616_v56 = vadd.f32 %v3248_v30, %v2973_v49  ;;  %v7632_v30 = vpop.f32.mrf.mxu1  ;;  %v7640_v6 = vpop.f32.mrf.mxu0 }
 0x412   : > { %8887 = vst [vmem:[#allocation12_spill] sm:$0xff] %v7632_v30  ;;  %v8899_v30 = vld [vmem:[#allocation77_spill] sm:$0xff] }
 0x413   : > { %8888 = vst [vmem:[#allocation96_spill] sm:$0xff] %v7640_v6  ;;  %v8900_v6 = vld [vmem:[#allocation58_spill] sm:$0xff] }
 0x418   : > { %v3251_v33 = vpop.f32.mrf.mxu3 }
 0x419   : > { %v7622_v17 = vadd.f32 %v3251_v33, %v2974_v1  ;;  %v7645_v1 = vpop.f32.mrf.mxu1 }
 0x41a   : > { %8889 = vst [vmem:[#allocation52_spill] sm:$0xff] %v7645_v1  ;;  %v3586_v1 = vadd.f32 %v8897_v63, %v7450_v38 }
 0x41c   : > { %v3916_v38 = vadd.f32 %v7380_v9, %v3586_v1 }
 0x420   : > { %v3253_v49 = vpop.f32.mrf.mxu3 }
 0x421   : > { %v7630_v12 = vadd.f32 %v3253_v49, %v2975_v55  ;;  %v7653_v55 = vpop.f32.mrf.mxu0  ;;  %v7655_v49 = vpop.f32.mrf.mxu1 }
 0x422   : > { %8891 = vst [vmem:[#allocation49_spill] sm:$0xff] %v7653_v55 }
 0x423   : > { %8892 = vst [vmem:[#allocation37_spill] sm:$0xff] %v7655_v49 }
 0x428   : > { %v3256_v39 = vpop.f32.mrf.mxu3 }
 0x429   : > { %v3306_v22 = vadd.f32 %v3256_v39, %v7327_v52  ;;  %v7657_v52 = vpop.f32.mrf.mxu2  ;;  %v3585_v39 = vadd.f32 %v8895_v47, %v7439_v26  ;;  %v7674_v2 = vpop.f32.mrf.mxu1 }
 0x42a   : > { %8893 = vst [vmem:[#allocation57_spill] sm:$0xff] %v7657_v52  ;;  %v3587_v52 = vadd.f32 %v8900_v6, %v7461_v7  ;;  %v5493_v6 = vld [vmem:[%s8322_s5 + $0x8] sm:$0xff] }
 0x42b   : > { %v3604_v15 = vadd.f32 %v3554_v45, %v3306_v22  ;;  %v7663_v22 = vpop.f32.mrf.mxu0  ;;  %v3915_v49 = vadd.f32 %v7371_v61, %v3585_v39  ;;  %v8901_v61 = vld [vmem:[#allocation66_spill] sm:$0xff]  ;;  %4124 = vmatpush.bf16.msra.mxu2 %v5493_v6 }
 0x42d   : > { %v7647_v33 = vadd.f32 %v3884_v11, %v3604_v15  ;;  %v8896_v11 = vld [vmem:[#allocation48_spill] sm:$0xff] }
 0x42e   : > { %v3584_v15 = vadd.f32 %v8896_v11, %v7428_v24  ;;  %v7684_v24 = vld [vmem:[%s8321_s4] ss:$0 sm:$0xff]  ;;  %v8903_v11 = vld [vmem:[#allocation28_spill] sm:$0xff] }
 0x42f   : > { %8890 = vst [vmem:[#allocation93_spill] sm:$0xff] %v7647_v33  ;;  %v8898_v33 = vld [vmem:[#allocation24_spill] sm:$0xff]  ;;  %v7694_v39 = vadd.f32 %v7684_v24, %v3915_v49 }
 0x430   : > { %v7651_v44 = vpop.f32.mrf.mxu3  ;;  %v2369_v55 = vadd.f32 %v8899_v30, %v8898_v33  ;;  %v3914_v47 = vadd.f32 %v7359_v28, %v3584_v15  ;;  %v3588_v30 = vadd.f32 %v8901_v61, %v7475_v16  ;;  %v8902_v33 = vld [vmem:[#allocation110_spill] sm:$0xff]  ;;  %v3917_v28 = vadd.f32 %v7392_v60, %v3587_v52  ;;  %v8905_v61 = vld [vmem:[#allocation55_spill] sm:$0xff] }
 0x431   : > { %v7678_v26 = vpop.f32.mrf.mxu2  ;;  %v3589_v15 = vadd.f32 %v8903_v11, %v7483_v5  ;;  %v7703_v16 = vadd.f32 %v7684_v24, %v3916_v38  ;;  %v8448_v60 = vmax.f32 %v7694_v39, 0.0 }
 0x432   : > { %v2667_v7 = vadd.f32 %v8902_v33, %v2369_v55  ;;  %v7700_v9 = vadd.f32 %v7684_v24, %v3914_v47  ;;  %v3918_v1 = vadd.f32 %v7403_v19, %v3588_v30  ;;  %v8904_v55 = vld [vmem:[#allocation118_spill] sm:$0xff]  ;;  %v7713_v5 = vadd.f32 %v7684_v24, %v3917_v28  ;;  %v8906_v47 = vld [vmem:[#allocation120_spill] sm:$0xff]  ;;  %v7727_v28 = vpop.f32.mrf.mxu1 }
 0x433   : > { %v3590_v63 = vadd.f32 %v8904_v55, %v7496_v29  ;;  %v7709_v33 = vpop.f32.mrf.mxu0  ;;  %v3919_v52 = vadd.f32 %v7416_v10, %v3589_v15  ;;  %v3591_v38 = vadd.f32 %v8906_v47, %v7506_v23  ;;  %v8447_v30 = vmax.f32 %v7703_v16, 0.0  ;;  %v5505_v23 = vld [vmem:[%s8324_s7 + $0x28] sm:$0xff] }
 0x434   : > { %v2965_v49 = vadd.f32 %v8905_v61, %v2667_v7  ;;  %v8451_v29 = vmax.f32 %v7700_v9, 0.0  ;;  %v7724_v7 = vadd.f32 %v7684_v24, %v3918_v1  ;;  %v3592_v10 = vadd.f32 %v7454_v59, %v7520_v53  ;;  %4200 = vmatpush.bf16.msrb.mxu3 %v5505_v23 }
 0x435   : > { %v3920_v11 = vadd.f32 %v7434_v37, %v3590_v63  ;;  %v8444_v1 = vmax.f32 %v7713_v5, 0.0  ;;  %v7742_v37 = vadd.f32 %v7684_v24, %v3919_v52  ;;  %v3921_v55 = vadd.f32 %v7445_v3, %v3591_v38 }
 0x436   : > { %v3295_v19 = vadd.f32 %v7526_v21, %v2965_v49  ;;  %v4014_v21 = vadd.f32 %v8448_v60, %v8451_v29  ;;  %v8443_v63 = vmax.f32 %v7724_v7, 0.0  ;;  %v3922_v49 = vadd.f32 %v7459_v48, %v3592_v10 }
 0x437   : > { %v7750_v61 = vadd.f32 %v7684_v24, %v3920_v11  ;;  %v3594_v47 = vadd.f32 %v7485_v34, %v7537_v58  ;;  %v8442_v3 = vmax.f32 %v7742_v37, 0.0  ;;  %v3595_v11 = vadd.f32 %v7499_v25, %v7547_v35 }
 0x438   : > { %v7659_v45 = vpop.f32.mrf.mxu3  ;;  %v3593_v59 = vadd.f32 %v7473_v0, %v3295_v19  ;;  %v4015_v53 = vadd.f32 %v4014_v21, %v8447_v30  ;;  %v7759_v0 = vadd.f32 %v7684_v24, %v3921_v55  ;;  %v7772_v34 = vadd.f32 %v7684_v24, %v3922_v49 }
 0x439   : > { %8894 = vst [vmem:[#allocation89_spill] sm:$0xff] %v7659_v45  ;;  %v7734_v15 = vpop.f32.mrf.mxu2  ;;  %v8445_v48 = vmax.f32 %v7750_v61, 0.0  ;;  %v3924_v10 = vadd.f32 %v7488_v18, %v3594_v47  ;;  %v3596_v21 = vadd.f32 %v7515_v41, %v7563_v13  ;;  %v8908_v47 = vld [vmem:[#allocation88_spill] sm:$0xff] }
 0x43a   : > { %v4016_v52 = vadd.f32 %v4015_v53, %v8444_v1  ;;  %v3923_v19 = vadd.f32 %v7477_v32, %v3593_v59  ;;  %v8446_v25 = vmax.f32 %v7759_v0, 0.0  ;;  %v7780_v35 = vpop.f32.mrf.mxu1  ;;  %v3925_v59 = vadd.f32 %v7501_v51, %v3595_v11  ;;  %v8907_v53 = vld [vmem:[#allocation38_spill] sm:$0xff]  ;;  %v8910_v51 = vld [vmem:[#allocation100_spill] sm:$0xff] }
 0x43b   : > { %v7766_v23 = vpop.f32.mrf.mxu0  ;;  %v3597_v49 = vadd.f32 %v8907_v53, %v7573_v40  ;;  %v8449_v41 = vmax.f32 %v7772_v34, 0.0  ;;  %v7794_v13 = vadd.f32 %v7684_v24, %v3924_v10  ;;  %v8912_v40 = vld [vmem:[#allocation102_spill] sm:$0xff] }
 0x43c   : > { %v4017_v58 = vadd.f32 %v4016_v52, %v8443_v63  ;;  %v7783_v55 = vadd.f32 %v7684_v24, %v3923_v19  ;;  %v3598_v19 = vadd.f32 %v7539_v54, %v7582_v50  ;;  %v8911_v63 = vld [vmem:[#allocation22_spill] sm:$0xff]  ;;  %v7809_v10 = vadd.f32 %v7684_v24, %v3925_v59 }
 0x43d   : > { %v2382_v53 = vadd.f32 %v8912_v40, %v8911_v63  ;;  %v3599_v54 = vadd.f32 %v7553_v46, %v7590_v27  ;;  %v8914_v50 = vld [vmem:[#allocation26_spill] sm:$0xff]  ;;  %v8918_v27 = vld [vmem:[#allocation119_spill] sm:$0xff] }
 0x43e   : > { %v4018_v32 = vadd.f32 %v4017_v58, %v8442_v3  ;;  %v3926_v58 = vadd.f32 %v8908_v47, %v3596_v21  ;;  %v8909_v3 = vld [vmem:[#allocation17_spill] sm:$0xff] }
 0x43f   : > { %v2381_v11 = vadd.f32 %v8910_v51, %v8909_v3  ;;  %v8913_v21 = vld [vmem:[#allocation29_spill] sm:$0xff]  ;;  %v2680_v60 = vadd.f32 %v8918_v27, %v2382_v53 }
 0x440   : > { %v7676_v45 = vpop.f32.mrf.mxu3  ;;  %v4019_v18 = vadd.f32 %v4018_v32, %v8445_v48  ;;  %v8450_v48 = vmax.f32 %v7783_v55, 0.0  ;;  %v3927_v47 = vadd.f32 %v8913_v21, %v3597_v49  ;;  %v8915_v3 = vld [vmem:[#allocation105_spill] sm:$0xff]  ;;  %v7820_v40 = vadd.f32 %v7684_v24, %v3926_v58  ;;  %v8919_v58 = vld [vmem:[#allocation76_spill] sm:$0xff] }
 0x441   : > { %v7788_v52 = vpop.f32.mrf.mxu2  ;;  %v2383_v51 = vadd.f32 %v8915_v3, %v8914_v50  ;;  %v3600_v49 = vadd.f32 %v7566_v57, %v7603_v36  ;;  %v8917_v21 = vld [vmem:[#allocation117_spill] sm:$0xff] }
 0x442   : > { %v4020_v1 = vadd.f32 %v4019_v18, %v8446_v25  ;;  %v8455_v18 = vmax.f32 %v7794_v13, 0.0  ;;  %v8916_v25 = vld [vmem:[#allocation6_spill] sm:$0xff]  ;;  %v2679_v46 = vadd.f32 %v8917_v21, %v2381_v11  ;;  %v7833_v3 = vadd.f32 %v7684_v24, %v3927_v47  ;;  %v8920_v57 = vld [vmem:[#allocation121_spill] sm:$0xff]  ;;  %v8922_v21 = vld [vmem:[#allocation107_spill] sm:$0xff] }
 0x443   : > { %v3928_v30 = vadd.f32 %v8916_v25, %v3598_v19  ;;  %v7823_v59 = vpop.f32.mrf.mxu0  ;;  %v7836_v25 = vpop.f32.mrf.mxu1  ;;  %v3601_v19 = vadd.f32 %v7580_v4, %v7616_v56  ;;  %v2681_v36 = vadd.f32 %v8920_v57, %v2383_v51  ;;  %v8921_v11 = vld [vmem:[#allocation62_spill] sm:$0xff]  ;;  %v8454_v27 = vmax.f32 %v7820_v40, 0.0 }
 0x444   : > { %v4021_v63 = vadd.f32 %v4020_v1, %v8449_v41  ;;  %v8452_v1 = vmax.f32 %v7809_v10, 0.0  ;;  %v3929_v41 = vadd.f32 %v8919_v58, %v3599_v54  ;;  %v2384_v53 = vadd.f32 %v8922_v21, %v8921_v11  ;;  %v8923_v54 = vld [vmem:[#allocation30_spill] sm:$0xff]  ;;  %v8924_v58 = vld [vmem:[#allocation27_spill] sm:$0xff] }
 0x445   : > { %v7847_v47 = vadd.f32 %v7684_v24, %v3928_v30  ;;  %v2385_v29 = vadd.f32 %v8924_v58, %v8923_v54  ;;  %v3930_v4 = vadd.f32 %v7571_v14, %v3600_v49  ;;  %v3602_v56 = vadd.f32 %v7592_v20, %v7622_v17  ;;  %v8926_v49 = vld [vmem:[#allocation111_spill] sm:$0xff]  ;;  %v8927_v58 = vld [vmem:[#allocation122_spill] sm:$0xff] }
 0x446   : > { %v4022_v50 = vadd.f32 %v4021_v63, %v8450_v48  ;;  %v2977_v51 = vadd.f32 %v7624_v31, %v2679_v46  ;;  %v8453_v30 = vmax.f32 %v7833_v3, 0.0  ;;  %v7863_v11 = vadd.f32 %v7684_v24, %v3929_v41  ;;  %v8925_v31 = vld [vmem:[#allocation21_spill] sm:$0xff] }
 0x447   : > { %v2978_v21 = vadd.f32 %v7637_v8, %v2680_v60  ;;  %v3931_v54 = vadd.f32 %v7584_v62, %v3601_v19  ;;  %v3603_v14 = vadd.f32 %v7609_v43, %v7630_v12  ;;  %v2979_v17 = vadd.f32 %v7649_v42, %v2681_v36  ;;  %v5492_v62 = vld [vmem:[%s8322_s5] sm:$0xff]  ;;  %v8929_v42 = vld [vmem:[#allocation89_spill] sm:$0xff] }
 0x448   : > { %v7718_v6 = vpop.f32.mrf.mxu3  ;;  %v4023_v63 = vadd.f32 %v4022_v50, %v8455_v18  ;;  %v3307_v20 = vadd.f32 %v7651_v44, %v2977_v51  ;;  %v2386_v46 = vadd.f32 %v8926_v49, %v8925_v31  ;;  %v8456_v41 = vmax.f32 %v7847_v47, 0.0  ;;  %v8928_v12 = vld [vmem:[#allocation90_spill] sm:$0xff]  ;;  %v8931_v36 = vld [vmem:[#allocation69_spill] sm:$0xff]  ;;  %v8932_v51 = vld [vmem:[#allocation112_spill] sm:$0xff]  ;;  %4125 = vmatpush.bf16.msra.mxu2 %v5492_v62 }
 0x449   : > { %v7849_v48 = vpop.f32.mrf.mxu2  ;;  %v7881_v43 = vadd.f32 %v7684_v24, %v3930_v4  ;;  %v3932_v8 = vadd.f32 %v8928_v12, %v3602_v56  ;;  %v3308_v44 = vadd.f32 %v8929_v42, %v2978_v21  ;;  %v8930_v60 = vld [vmem:[#allocation78_spill] sm:$0xff]  ;;  %v7894_v4 = vadd.f32 %v7684_v24, %v3931_v54  ;;  %v8934_v12 = vld [vmem:[#allocation33_spill] sm:$0xff] }
 0x44a   : > { %v4024_v50 = vadd.f32 %v4023_v63, %v8452_v1  ;;  %v2682_v1 = vadd.f32 %v8927_v58, %v2384_v53  ;;  %v2683_v19 = vadd.f32 %v8930_v60, %v2385_v29  ;;  %v8457_v53 = vmax.f32 %v7863_v11, 0.0  ;;  %v8933_v58 = vld [vmem:[#allocation44_spill] sm:$0xff]  ;;  %v8935_v42 = vld [vmem:[#allocation34_spill] sm:$0xff] }
 0x44b   : > { %v7891_v49 = vpop.f32.mrf.mxu0  ;;  %v3933_v56 = vadd.f32 %v8933_v58, %v3603_v14  ;;  %v3605_v21 = vadd.f32 %v8934_v12, %v3307_v20  ;;  %v3309_v29 = vadd.f32 %v7676_v45, %v2979_v17  ;;  %v8936_v60 = vld [vmem:[#allocation36_spill] sm:$0xff]  ;;  %v8938_v62 = vld [vmem:[#allocation14_spill] sm:$0xff]  ;;  %v7906_v54 = vpop.f32.mrf.mxu1  ;;  %v7909_v14 = vadd.f32 %v7684_v24, %v3932_v8  ;;  %v8940_v12 = vld [vmem:[#allocation25_spill] sm:$0xff] }
 0x44c   : > { %v4025_v63 = vadd.f32 %v4024_v50, %v8454_v27  ;;  %v2387_v50 = vadd.f32 %v8932_v51, %v8931_v36  ;;  %v2388_v36 = vadd.f32 %v8936_v60, %v8935_v42  ;;  %v8937_v51 = vld [vmem:[#allocation57_spill] sm:$0xff]  ;;  %v2684_v27 = vadd.f32 %v8938_v62, %v2386_v46  ;;  %v8939_v20 = vld [vmem:[#allocation96_spill] sm:$0xff] }
 0x44d   : > { %v3606_v58 = vadd.f32 %v8939_v20, %v3308_v44  ;;  %v2981_v45 = vadd.f32 %v7678_v26, %v2683_v19  ;;  %v8941_v42 = vld [vmem:[#allocation32_spill] sm:$0xff]  ;;  %v7921_v8 = vadd.f32 %v7684_v24, %v3933_v56  ;;  %v8944_v26 = vld [vmem:[#allocation49_spill] sm:$0xff] }
 0x44e   : > { %v4026_v31 = vadd.f32 %v4025_v63, %v8453_v30  ;;  %v2980_v30 = vadd.f32 %v8937_v51, %v2682_v1  ;;  %v2389_v60 = vadd.f32 %v8941_v42, %v8940_v12  ;;  %v8943_v44 = vld [vmem:[#allocation12_spill] sm:$0xff]  ;;  %v3607_v19 = vadd.f32 %v8944_v26, %v3309_v29  ;;  %v8945_v42 = vld [vmem:[#allocation41_spill] sm:$0xff] }
 0x44f   : > { %v3935_v20 = vadd.f32 %v8943_v44, %v3605_v21  ;;  %v2982_v12 = vadd.f32 %v7734_v15, %v2684_v27  ;;  %v8948_v56 = vld [vmem:[#allocation52_spill] sm:$0xff]  ;;  %v8949_v15 = vld [vmem:[#allocation9_spill] sm:$0xff] }
 0x450   : > { %v7761_v38 = vpop.f32.mrf.mxu3  ;;  %v4027_v63 = vadd.f32 %v4026_v31, %v8456_v41  ;;  %v3310_v46 = vadd.f32 %v7718_v6, %v2980_v30  ;;  %v8942_v31 = vld [vmem:[#allocation70_spill] sm:$0xff]  ;;  %v8946_v6 = vmax.f32 %v7881_v43, 0.0  ;;  %v3936_v41 = vadd.f32 %v8948_v56, %v3606_v58  ;;  %v8951_v26 = vld [vmem:[#allocation37_spill] sm:$0xff]  ;;  %v8953_v58 = vld [vmem:[#allocation35_spill] sm:$0xff] }
 0x451   : > { %v2685_v51 = vadd.f32 %v8942_v31, %v2387_v50  ;;  %v2948_v62 = vpop.f32.mrf.mxu2  ;;  %v3311_v18 = vadd.f32 %v7761_v38, %v2981_v45  ;;  %v4000_v50 = vmax.f32 %v7909_v14, 0.0  ;;  %v8947_v31 = vld [vmem:[#allocation93_spill] sm:$0xff]  ;;  %v2687_v27 = vadd.f32 %v8949_v15, %v2389_v60 }
 0x452   : > { %v4028_v1 = vadd.f32 %v4027_v63, %v8457_v53  ;;  %v2686_v63 = vadd.f32 %v8945_v42, %v2388_v36  ;;  %v7933_v53 = vadd.f32 %v7684_v24, %v8947_v31  ;;  %v3608_v21 = vadd.f32 %v7663_v22, %v3310_v46 }
 0x453   : > { %v2983_v38 = vadd.f32 %v7788_v52, %v2685_v51  ;;  %v8950_v36 = vmax.f32 %v7894_v4, 0.0  ;;  %v7944_v44 = vadd.f32 %v7684_v24, %v3935_v20  ;;  %v3937_v42 = vadd.f32 %v8951_v26, %v3607_v19  ;;  %v3576_v60 = vpop.f32.mrf.mxu0 }
 0x454   : > { %v4029_v30 = vadd.f32 %v4028_v1, %v8946_v6  ;;  %v4001_v1 = vmax.f32 %v7921_v8, 0.0  ;;  %v8952_v6 = vld [vmem:[#allocation7_spill] sm:$0xff]  ;;  %v3609_v22 = vadd.f32 %v7709_v33, %v3311_v18  ;;  %v2984_v52 = vadd.f32 %v7849_v48, %v2686_v63  ;;  %v3906_v18 = vpop.f32.mrf.mxu1 }
 0x455   : > { %v2390_v31 = vadd.f32 %v8953_v58, %v8952_v6  ;;  %v4002_v51 = vmax.f32 %v7933_v53, 0.0  ;;  %v7956_v20 = vadd.f32 %v7684_v24, %v3936_v41  ;;  %v3938_v19 = vadd.f32 %v7674_v2, %v3608_v21 }
 0x456   : > { %v4030_v45 = vadd.f32 %v4029_v30, %v8950_v36  ;;  %v2985_v33 = vadd.f32 %v2948_v62, %v2687_v27  ;;  %v7964_v63 = vadd.f32 %v7684_v24, %v3937_v42  ;;  %v8954_v36 = vld [vmem:[#allocation13_spill] sm:$0xff] }
 0x457   : > { %v2688_v2 = vadd.f32 %v8954_v36, %v2390_v31  ;;  %v4004_v21 = vmax.f32 %v7956_v20, 0.0  ;;  %v8955_v27 = vld [vmem:[#allocation73_spill] sm:$0xff] }
 0x458   : > { %v7805_v32 = vpop.f32.mrf.mxu3  ;;  %v4031_v46 = vadd.f32 %v4030_v45, %v4000_v50  ;;  %v8956_v45 = vld [vmem:[#allocation43_spill] sm:$0xff]  ;;  %v4005_v6 = vmax.f32 %v7964_v63, 0.0 }
 0x459   : > { %v3312_v29 = vadd.f32 %v7805_v32, %v2982_v12  ;;  %v2391_v26 = vadd.f32 %v8956_v45, %v8955_v27  ;;  %v5502_v45 = vld [vmem:[%s8324_s7 + $0x10] sm:$0xff] }
 0x45a   : > { %v4032_v48 = vadd.f32 %v4031_v46, %v4001_v1 }
 0x45b   : > { %v3610_v30 = vadd.f32 %v7766_v23, %v3312_v29  ;;  %v5504_v23 = vld [vmem:[%s8324_s7 + $0x20] sm:$0xff]  ;;  %v7976_v29 = vadd.f32 %v7684_v24, %v3938_v19 }
 0x45c   : > { %v4033_v62 = vadd.f32 %v4032_v48, %v4002_v51  ;;  %4201 = vmatpush.bf16.msrb.mxu3 %v5504_v23 }
 0x45d   : > { %v4006_v46 = vmax.f32 %v7976_v29, 0.0 }
 0x460   : > { %v7857_v57 = vpop.f32.mrf.mxu3 }
 0x461   : > { %v3313_v32 = vadd.f32 %v7857_v57, %v2983_v38  ;;  %v4003_v57 = vmax.f32 %v7944_v44, 0.0  ;;  %v3939_v38 = vadd.f32 %v7727_v28, %v3609_v22  ;;  %v3940_v28 = vadd.f32 %v7780_v35, %v3610_v30 }
 0x463   : > { %v3611_v41 = vadd.f32 %v7823_v59, %v3313_v32  ;;  %v4034_v42 = vadd.f32 %v4033_v62, %v4003_v57  ;;  %v7986_v58 = vadd.f32 %v7684_v24, %v3939_v38 }
 0x465   : > { %v3941_v31 = vadd.f32 %v7836_v25, %v3611_v41  ;;  %v4035_v35 = vadd.f32 %v4034_v42, %v4004_v21  ;;  %v8957_v25 = vld [vmem:[#allocation16_spill] sm:$0xff]  ;;  %v4007_v48 = vmax.f32 %v7986_v58, 0.0 }
 0x467   : > { %v8001_v38 = vadd.f32 %v7684_v24, %v3941_v31 }
 0x468   : > { %v3276_v17 = vpop.f32.mrf.mxu3 }
 0x469   : > { %v3314_v56 = vadd.f32 %v3276_v17, %v2984_v52  ;;  %v2951_v17 = vpop.f32.mrf.mxu2 }
 0x46a   : > { %v2986_v32 = vadd.f32 %v2951_v17, %v2688_v2  ;;  %v5503_v17 = vld [vmem:[%s8324_s7 + $0x18] sm:$0xff] }
 0x46b   : > { %v3612_v59 = vadd.f32 %v7891_v49, %v3314_v56  ;;  %v3579_v49 = vpop.f32.mrf.mxu0  ;;  %v4036_v56 = vadd.f32 %v4035_v35, %v4005_v6  ;;  %4202 = vmatpush.bf16.msrb.mxu3 %v5503_v17 }
 0x46d   : > { %v3942_v19 = vadd.f32 %v7906_v54, %v3612_v59  ;;  %v4037_v36 = vadd.f32 %v4036_v56, %v4006_v46 }
 0x46f   : > { %v8007_v54 = vadd.f32 %v7684_v24, %v3942_v19  ;;  %4203 = vmatpush.bf16.msrb.mxu3 %v5502_v45 }
 0x470   : > { %v3278_v12 = vpop.f32.mrf.mxu3 }
 0x471   : > { %v3315_v15 = vadd.f32 %v3278_v12, %v2985_v33  ;;  %v7993_v12 = vadd.f32 %v7684_v24, %v3940_v28  ;;  %v3909_v33 = vpop.f32.mrf.mxu1  ;;  %v2953_v62 = vpop.f32.mrf.mxu2  ;;  %v4038_v28 = vadd.f32 %v4037_v36, %v4007_v48  ;;  %v4010_v31 = vmax.f32 %v8007_v54, 0.0  ;;  %v5500_v36 = vld [vmem:[%s8324_s7] sm:$0xff] }
 0x473   : > { %v3613_v22 = vadd.f32 %v3576_v60, %v3315_v15  ;;  %v2689_v60 = vadd.f32 %v8957_v25, %v2391_v26  ;;  %v4008_v2 = vmax.f32 %v7993_v12, 0.0  ;;  %v3581_v35 = vpop.f32.mrf.mxu0 }
 0x475   : > { %v3943_v41 = vadd.f32 %v3906_v18, %v3613_v22  ;;  %v4009_v18 = vmax.f32 %v8001_v38, 0.0  ;;  %v2987_v27 = vadd.f32 %v2953_v62, %v2689_v60  ;;  %v4039_v42 = vadd.f32 %v4038_v28, %v4008_v2 }
 0x477   : > { %v8016_v59 = vadd.f32 %v7684_v24, %v3943_v41 }
 0x478   : > { %v3281_v52 = vpop.f32.mrf.mxu3 }
 0x479   : > { %v3316_v30 = vadd.f32 %v3281_v52, %v2986_v32  ;;  %v4011_v52 = vmax.f32 %v8016_v59, 0.0  ;;  %v3911_v56 = vpop.f32.mrf.mxu1 }
 0x47b   : > { %v3614_v15 = vadd.f32 %v3579_v49, %v3316_v30  ;;  %v4040_v49 = vadd.f32 %v4039_v42, %v4009_v18  ;;  %v5501_v30 = vld [vmem:[%s8324_s7 + $0x8] sm:$0xff] }
 0x47c   : > { %4204 = vmatpush.bf16.msrb.mxu3 %v5501_v30 }
 0x47d   : > { %v3944_v23 = vadd.f32 %v3909_v33, %v3614_v15  ;;  %v4041_v33 = vadd.f32 %v4040_v49, %v4010_v31  ;;  %v4069_v49 = vld [vmem:[%s8323_s6] sm:$0x1] }
 0x47f   : > { %v8025_v22 = vadd.f32 %v7684_v24, %v3944_v23  ;;  %v4042_v41 = vadd.f32 %v4041_v33, %v4011_v52 }
 0x480   : > { %v3283_v26 = vpop.f32.mrf.mxu3  ;;  %4205 = vmatpush.bf16.msrb.mxu3 %v5500_v36  ;;  %v5514_v36 = vld [vmem:[%s8326_s9 + $0x30] sm:$0xff] }
 0x481   : > { %v3317_v32 = vadd.f32 %v3283_v26, %v2987_v27  ;;  %v4012_v25 = vmax.f32 %v8025_v22, 0.0 }
 0x483   : > { %v3615_v19 = vadd.f32 %v3581_v35, %v3317_v32  ;;  %v4043_v23 = vadd.f32 %v4042_v41, %v4012_v25  ;;  %v5515_v41 = vld [vmem:[%s8326_s9 + $0x38] sm:$0xff] }
 0x484   : > { %4347 = vmatpush.bf16.msrb.mxu2 %v5515_v41 }
 0x485   : > { %v3945_v60 = vadd.f32 %v3911_v56, %v3615_v19 }
 0x487   : > { %v8039_v15 = vadd.f32 %v7684_v24, %v3945_v60 }
 0x488   : > { %4348 = vmatpush.bf16.msrb.mxu2 %v5514_v36 }
 0x489   : > { %v4013_v17 = vmax.f32 %v8039_v15, 0.0 }
 0x48b   : > { %v4044_v62 = vadd.f32 %v4043_v23, %v4013_v17  ;;  %v5513_v23 = vld [vmem:[%s8326_s9 + $0x28] sm:$0xff] }
 0x48c   : > { %4349 = vmatpush.bf16.msrb.mxu2 %v5513_v23 }
 0x48d   : > { %v4045_v28 = vrot.slane %v4044_v62, 4 }
 0x48f   : > { %v4046_v27 = vadd.f32 %v4045_v28, %v4044_v62  ;;  %v5512_v62 = vld [vmem:[%s8326_s9 + $0x20] sm:$0xff]  ;;  %v5511_v28 = vld [vmem:[%s8326_s9 + $0x18] sm:$0xff] }
 0x490   : > { %4350 = vmatpush.bf16.msrb.mxu2 %v5512_v62 }
 0x491   : > { %v4047_v45 = vrot.slane %v4046_v27, 2 }
 0x493   : > { %v4048_v26 = vadd.f32 %v4047_v45, %v4046_v27  ;;  %v5510_v27 = vld [vmem:[%s8326_s9 + $0x10] sm:$0xff]  ;;  %v5509_v45 = vld [vmem:[%s8326_s9 + $0x8] sm:$0xff] }
 0x494   : > { %4351 = vmatpush.bf16.msrb.mxu2 %v5511_v28 }
 0x495   : > { %v4049_v24 = vrot.slane %v4048_v26, 1 }
 0x497   : > { %v4050_v42 = vadd.f32 %v4049_v24, %v4048_v26  ;;  %v4149_v26 = vld [vmem:[%s8325_s8] sm:$0x1] }
 0x498   : > { %4352 = vmatpush.bf16.msrb.mxu2 %v5510_v27 }
 0x499   : > { %v4051_v32 = vmul.f32 0.00390625, %v4050_v42 }
 0x49b   : > { %v4052_v35 = vpack.c.bf16 %v4051_v32, %v4051_v32  ;;  %v5508_v32 = vld [vmem:[%s8326_s9] sm:$0xff] }
 0x49c   : > { %4353 = vmatpush.bf16.msrb.mxu2 %v5509_v45 }
 0x49d   : > { %4126 = vmatmul.bf16.vlgmr.msra.gmra.mxu2 %v4052_v35 }
 0x4a0   : > { %4354 = vmatpush.bf16.msrb.mxu2 %v5508_v32  ;;  %v8959_v32 = vmax.f32 %v7694_v39, 0.0  ;;  %v8963_v39 = vmax.f32 %v7742_v37, 0.0  ;;  %v8967_v37 = vmax.f32 %v7783_v55, 0.0 }
 0x520   : > { %v4127_v19 = vpop.f32.mrf.mxu2 }
 0x521   : > { %v4128_v30 = vadd.f32 %v4127_v19, %v4069_v49 }
 0x523   : > { %v4131_v56 = vmax.f32 %v4128_v30, 0.0 }
 0x525   : > { %v4132_v33 = vpack.c.bf16 %v4131_v56, %v4131_v56 }
 0x527   : > { %4206 = vmatmul.bf16.vlgmr.msrb.gmra.mxu3 %v4132_v33 }
 0x528   : > { %v4129_v60 = vpop.f32.mrf.mxu2 }
 0x5aa   : > { %v4207_v24 = vpop.f32.mrf.mxu3 }
 0x5ab   : > { %v4208_v42 = vadd.f32 %v4207_v24, %v4149_v26  ;;  %v8958_v24 = vmax.f32 %v7700_v9, 0.0  ;;  %v8962_v9 = vmax.f32 %v7724_v7, 0.0  ;;  %v8966_v7 = vmax.f32 %v7772_v34, 0.0 }
 0x5ac   : > { %v8970_v34 = vmax.f32 %v7820_v40, 0.0  ;;  %v8974_v40 = vmax.f32 %v7881_v43, 0.0 }
 0x5ad   : > { %v5373_v35 = vmul.f32 -1.442695, %v4208_v42 }
 0x5af   : > { %5587 = vpow2.f32 %v5373_v35 }
 0x5b2   : > { %v4209_v49 = vpop.f32.mrf.mxu3 }
 0x5b5   : > { %v5588_v19 = vpop.eup %5587 }
 0x5b6   : > { %v4214_v30 = vadd.f32 1.0, %v5588_v19  ;;  %v8960_v19 = vmax.f32 %v7703_v16, 0.0  ;;  %v8964_v16 = vmax.f32 %v7750_v61, 0.0  ;;  %v8968_v61 = vmax.f32 %v7794_v13, 0.0 }
 0x5b8   : > { %5589 = vrcp.f32 %v4214_v30  ;;  %v4226_v41 = vand.u32 2147483648, %v4214_v30  ;;  %v4224_v23 = vand.u32 2147483647, %v4214_v30  ;;  %vm4220_vm2 = vweird.f32 %v4214_v30 }
 0x5ba   : > { %v4227_v28 = vor.u32 1.1754944e-38, %v4226_v41  ;;  %vm4225_vm4 = vcmp.eq.f32.partialorder %v4224_v23, 8.507059e+37 }
 0x5be   : > { %v5590_v56 = vpop.eup %5589 }
 0x5bf   : > { %v4216_v33 = vmul.f32 %v5590_v56, %v4214_v30  ;;  %vm4221_vm8 = vweird.f32 %v5590_v56 }
 0x5c0   : > { %vm4222_vm9 = vmor %vm4220_vm2, %vm4221_vm8 }
 0x5c1   : > { %v4217_v60 = vsub.f32 1.0, %v4216_v33 }
 0x5c3   : > { %v4218_v36 = vmul.f32 %v5590_v56, %v4217_v60 }
 0x5c5   : > { %v4219_v62 = vadd.f32 %v5590_v56, %v4218_v36 }
 0x5c7   : > { %v4223_v27 = vsel %vm4222_vm9, %v5590_v56, %v4219_v62  ;;  %v8961_v56 = vmax.f32 %v7713_v5, 0.0  ;;  %v8965_v5 = vmax.f32 %v7759_v0, 0.0  ;;  %v8969_v0 = vmax.f32 %v7809_v10, 0.0 }
 0x5c8   : > { %v4228_v45 = vsel %vm4225_vm4, %v4227_v28, %v4223_v27 }
 0x5c9   : > { %v8079_v26 = vperm.slane %v4228_v45, 0 }
 0x5cb   : > { %v4231_v42 = vmul.f32 %v8079_v26, %v8958_v24  ;;  %v4232_v35 = vmul.f32 %v8079_v26, %v8959_v32  ;;  %v4233_v30 = vmul.f32 %v8079_v26, %v8960_v19  ;;  %v4234_v33 = vmul.f32 %v8079_v26, %v8961_v56 }
 0x5cc   : > { %v4235_v41 = vmul.f32 %v8079_v26, %v8962_v9  ;;  %v4236_v36 = vmul.f32 %v8079_v26, %v8963_v39  ;;  %v4237_v62 = vmul.f32 %v8079_v26, %v8964_v16  ;;  %v4238_v28 = vmul.f32 %v8079_v26, %v8965_v5 }
 0x5cd   : > { %v4263_v49 = vpack.c.bf16 %v4232_v35, %v4231_v42  ;;  %v4264_v60 = vpack.c.bf16 %v4234_v33, %v4233_v30  ;;  %v4239_v45 = vmul.f32 %v8079_v26, %v8966_v7  ;;  %v4240_v24 = vmul.f32 %v8079_v26, %v8967_v37 }
 0x5ce   : > { %v4265_v23 = vpack.c.bf16 %v4236_v36, %v4235_v41  ;;  %v4266_v27 = vpack.c.bf16 %v4238_v28, %v4237_v62  ;;  %v4241_v32 = vmul.f32 %v8079_v26, %v8968_v61  ;;  %v4242_v35 = vmul.f32 %v8079_v26, %v8969_v0 }
 0x5cf   : > { %4355 = vmatmul.bf16.vlgmr.msrb.gmra.mxu2 %v4263_v49  ;;  %v4267_v42 = vpack.c.bf16 %v4240_v24, %v4239_v45  ;;  %v4243_v55 = vmul.f32 %v8079_v26, %v8970_v34  ;;  %v8971_v19 = vmax.f32 %v7833_v3, 0.0  ;;  %v8972_v56 = vmax.f32 %v7847_v47, 0.0  ;;  %v8139_v47 = vld [vmem:[%s8327_s10] ss:$0 sm:$0xff]  ;;  %v5593_v24 = vld [vmem:[%s5825_s26 + $0x10] sm:$0xff] }
 0x5d0   : > { %v4268_v49 = vpack.c.bf16 %v4242_v35, %v4241_v32  ;;  %v8973_v33 = vmax.f32 %v7863_v11, 0.0  ;;  %v4247_v41 = vmul.f32 %v8079_v26, %v8974_v40  ;;  %v8975_v3 = vmax.f32 %v7894_v4, 0.0  ;;  %v5594_v32 = vld [vmem:[%s5825_s26 + $0x18] sm:$0xff]  ;;  %v5595_v34 = vld [vmem:[%s5825_s26 + $0x20] sm:$0xff] }
 0x5d1   : > { %v4244_v30 = vmul.f32 %v8079_v26, %v8971_v19  ;;  %v4245_v10 = vmul.f32 %v8079_v26, %v8972_v56  ;;  %v4249_v4 = vmul.f32 %v8079_v26, %v4000_v50  ;;  %v4250_v62 = vmul.f32 %v8079_v26, %v4001_v1  ;;  %v5598_v40 = vld [vmem:[%s5825_s26 + $0x38] sm:$0xff] }
 0x5d2   : > { %v4248_v39 = vmul.f32 %v8079_v26, %v8975_v3  ;;  %v4251_v8 = vmul.f32 %v8079_v26, %v4002_v51  ;;  %v4252_v1 = vmul.f32 %v8079_v26, %v4003_v57  ;;  %v4253_v44 = vmul.f32 %v8079_v26, %v4004_v21 }
 0x5d3   : > { %v4269_v13 = vpack.c.bf16 %v4244_v30, %v4243_v55  ;;  %v4272_v45 = vpack.c.bf16 %v4250_v62, %v4249_v4  ;;  %v4254_v57 = vmul.f32 %v8079_v26, %v4005_v6  ;;  %v5596_v30 = vld [vmem:[%s5825_s26 + $0x28] sm:$0xff]  ;;  %v4255_v63 = vmul.f32 %v8079_v26, %v4006_v46 }
 0x5d4   : > { %v4271_v36 = vpack.c.bf16 %v4248_v39, %v4247_v41  ;;  %v4273_v35 = vpack.c.bf16 %v4252_v1, %v4251_v8  ;;  %v4256_v6 = vmul.f32 %v8079_v26, %v4007_v48  ;;  %v4257_v58 = vmul.f32 %v8079_v26, %v4008_v2  ;;  %v5604_v1 = vld [vmem:[%s5825_s26 + $0x68] sm:$0xff] }
 0x5d5   : > { %v4274_v56 = vpack.c.bf16 %v4254_v57, %v4253_v44  ;;  %v4258_v48 = vmul.f32 %v8079_v26, %v4009_v18  ;;  %v4259_v38 = vmul.f32 %v8079_v26, %v4010_v31  ;;  %v4260_v18 = vmul.f32 %v8079_v26, %v4011_v52 }
 0x5d6   : > { %v4275_v3 = vpack.c.bf16 %v4256_v6, %v4255_v63  ;;  %v4261_v59 = vmul.f32 %v8079_v26, %v4012_v25  ;;  %v4262_v52 = vmul.f32 %v8079_v26, %v4013_v17  ;;  %v5605_v25 = vld [vmem:[%s5825_s26 + $0x70] sm:$0xff] }
 0x5d7   : > { %v4276_v4 = vpack.c.bf16 %v4258_v48, %v4257_v58  ;;  %v5613_v58 = vld [vmem:[%s5825_s26 + $0xb0] sm:$0xff] }
 0x5df   : > { %4360 = vmatmul.bf16.gmra.mxu2 %v4264_v60  ;;  %v4246_v60 = vmul.f32 %v8079_v26, %v8973_v33  ;;  %v5597_v33 = vld [vmem:[%s5825_s26 + $0x30] sm:$0xff] }
 0x5e1   : > { %v4270_v9 = vpack.c.bf16 %v4246_v60, %v4245_v10 }
 0x5ef   : > { %4365 = vmatmul.bf16.gmra.mxu2 %v4265_v23  ;;  %v5591_v23 = vld [vmem:[%s5825_s26] sm:$0xff] }
 0x5ff   : > { %4370 = vmatmul.bf16.gmra.mxu2 %v4266_v27  ;;  %v5592_v27 = vld [vmem:[%s5825_s26 + $0x8] sm:$0xff] }
 0x60f   : > { %4375 = vmatmul.bf16.gmra.mxu2 %v4267_v42 }
 0x61f   : > { %4380 = vmatmul.bf16.gmra.mxu2 %v4268_v49 }
 0x62f   : > { %4385 = vmatmul.bf16.gmra.mxu2 %v4269_v13 }
 0x63f   : > { %4390 = vmatmul.bf16.gmra.mxu2 %v4270_v9 }
 0x64f   : > { %4395 = vmatmul.bf16.gmra.mxu2 %v4271_v36  ;;  %v5599_v36 = vld [vmem:[%s5825_s26 + $0x40] sm:$0xff] }
 0x652   : > { %v4356_v11 = vpop.f32.mrf.mxu2 }
 0x653   : > { %v4357_v43 = vadd.f32 %v8139_v47, %v4356_v11 }
 0x655   : > { %v4436_v16 = vadd.f32 %v5591_v23, %v4357_v43  ;;  %v5600_v23 = vld [vmem:[%s5825_s26 + $0x48] sm:$0xff] }
 0x657   : > { %4468 = vst [vmem:[%s8145_s14] sm:$0xff] %v4436_v16 }
 0x65a   : > { %v4358_v5 = vpop.f32.mrf.mxu2 }
 0x65b   : > { %v4359_v28 = vadd.f32 %v8139_v47, %v4358_v5  ;;  %v5601_v5 = vld [vmem:[%s5825_s26 + $0x50] sm:$0xff] }
 0x65d   : > { %v4437_v7 = vadd.f32 %v5592_v27, %v4359_v28 }
 0x65f   : > { %4469 = vst [vmem:[%s8145_s14 + $0x8] sm:$0xff] %v4437_v7  ;;  %4400 = vmatmul.bf16.gmra.mxu2 %v4272_v45  ;;  %v5602_v7 = vld [vmem:[%s5825_s26 + $0x58] sm:$0xff] }
 0x662   : > { %v4361_v37 = vpop.f32.mrf.mxu2 }
 0x663   : > { %v4362_v14 = vadd.f32 %v8139_v47, %v4361_v37  ;;  %v4277_v37 = vpack.c.bf16 %v4260_v18, %v4259_v38  ;;  %v5616_v18 = vld [vmem:[%s5825_s26 + $0xc8] sm:$0xff] }
 0x665   : > { %v4438_v50 = vadd.f32 %v5593_v24, %v4362_v14  ;;  %v5603_v24 = vld [vmem:[%s5825_s26 + $0x60] sm:$0xff] }
 0x667   : > { %4470 = vst [vmem:[%s8145_s14 + $0x10] sm:$0xff] %v4438_v50 }
 0x66a   : > { %v4363_v42 = vpop.f32.mrf.mxu2 }
 0x66b   : > { %v4364_v61 = vadd.f32 %v8139_v47, %v4363_v42 }
 0x66d   : > { %v4439_v0 = vadd.f32 %v5594_v32, %v4364_v61  ;;  %v4278_v61 = vpack.c.bf16 %v4262_v52, %v4261_v59 }
 0x66f   : > { %4471 = vst [vmem:[%s8145_s14 + $0x18] sm:$0xff] %v4439_v0  ;;  %4405 = vmatmul.bf16.gmra.mxu2 %v4273_v35  ;;  %v5606_v0 = vld [vmem:[%s5825_s26 + $0x78] sm:$0xff] }
 0x672   : > { %v4366_v49 = vpop.f32.mrf.mxu2 }
 0x673   : > { %v4367_v53 = vadd.f32 %v8139_v47, %v4366_v49 }
 0x675   : > { %v4440_v51 = vadd.f32 %v5595_v34, %v4367_v53  ;;  %v5607_v34 = vld [vmem:[%s5825_s26 + $0x80] sm:$0xff] }
 0x677   : > { %4472 = vst [vmem:[%s8145_s14 + $0x20] sm:$0xff] %v4440_v51 }
 0x67a   : > { %v4368_v55 = vpop.f32.mrf.mxu2 }
 0x67b   : > { %v4369_v19 = vadd.f32 %v8139_v47, %v4368_v55  ;;  %v5608_v55 = vld [vmem:[%s5825_s26 + $0x88] sm:$0xff] }
 0x67d   : > { %v4441_v13 = vadd.f32 %v5596_v30, %v4369_v19 }
 0x67f   : > { %4473 = vst [vmem:[%s8145_s14 + $0x28] sm:$0xff] %v4441_v13  ;;  %4410 = vmatmul.bf16.gmra.mxu2 %v4274_v56  ;;  %v5609_v56 = vld [vmem:[%s5825_s26 + $0x90] sm:$0xff] }
 0x682   : > { %v4371_v10 = vpop.f32.mrf.mxu2 }
 0x683   : > { %v4372_v20 = vadd.f32 %v8139_v47, %v4371_v10 }
 0x685   : > { %v4442_v21 = vadd.f32 %v5597_v33, %v4372_v20 }
 0x687   : > { %4474 = vst [vmem:[%s8145_s14 + $0x30] sm:$0xff] %v4442_v21  ;;  %v5610_v21 = vld [vmem:[%s5825_s26 + $0x98] sm:$0xff] }
 0x68a   : > { %v4373_v60 = vpop.f32.mrf.mxu2 }
 0x68b   : > { %v4374_v9 = vadd.f32 %v8139_v47, %v4373_v60 }
 0x68d   : > { %v4443_v41 = vadd.f32 %v5598_v40, %v4374_v9  ;;  %v5611_v9 = vld [vmem:[%s5825_s26 + $0xa0] sm:$0xff] }
 0x68f   : > { %4475 = vst [vmem:[%s8145_s14 + $0x38] sm:$0xff] %v4443_v41  ;;  %4415 = vmatmul.bf16.gmra.mxu2 %v4275_v3 }
 0x692   : > { %v4376_v39 = vpop.f32.mrf.mxu2 }
 0x693   : > { %v4377_v29 = vadd.f32 %v8139_v47, %v4376_v39  ;;  %v5612_v39 = vld [vmem:[%s5825_s26 + $0xa8] sm:$0xff] }
 0x695   : > { %v4444_v46 = vadd.f32 %v5599_v36, %v4377_v29 }
 0x697   : > { %4476 = vst [vmem:[%s8145_s14 + $0x40] sm:$0xff] %v4444_v46 }
 0x69a   : > { %v4378_v11 = vpop.f32.mrf.mxu2 }
 0x69b   : > { %v4379_v43 = vadd.f32 %v8139_v47, %v4378_v11 }
 0x69d   : > { %v4445_v16 = vadd.f32 %v5600_v23, %v4379_v43  ;;  %v5614_v23 = vld [vmem:[%s5825_s26 + $0xb8] sm:$0xff] }
 0x69f   : > { %4477 = vst [vmem:[%s8145_s14 + $0x48] sm:$0xff] %v4445_v16  ;;  %4420 = vmatmul.bf16.gmra.mxu2 %v4276_v4 }
 0x6a2   : > { %v4381_v62 = vpop.f32.mrf.mxu2 }
 0x6a3   : > { %v4382_v12 = vadd.f32 %v8139_v47, %v4381_v62 }
 0x6a5   : > { %v4446_v2 = vadd.f32 %v5601_v5, %v4382_v12  ;;  %v5615_v12 = vld [vmem:[%s5825_s26 + $0xc0] sm:$0xff] }
 0x6a7   : > { %4478 = vst [vmem:[%s8145_s14 + $0x50] sm:$0xff] %v4446_v2 }
 0x6aa   : > { %v4383_v28 = vpop.f32.mrf.mxu2 }
 0x6ab   : > { %v4384_v27 = vadd.f32 %v8139_v47, %v4383_v28 }
 0x6ad   : > { %v4447_v45 = vadd.f32 %v5602_v7, %v4384_v27 }
 0x6af   : > { %4479 = vst [vmem:[%s8145_s14 + $0x58] sm:$0xff] %v4447_v45  ;;  %4425 = vmatmul.bf16.gmra.mxu2 %v4277_v37  ;;  %v5617_v45 = vld [vmem:[%s5825_s26 + $0xd0] sm:$0xff] }
 0x6b2   : > { %v4386_v14 = vpop.f32.mrf.mxu2 }
 0x6b3   : > { %v4387_v54 = vadd.f32 %v8139_v47, %v4386_v14 }
 0x6b5   : > { %v4448_v31 = vadd.f32 %v5603_v24, %v4387_v54  ;;  %v5618_v24 = vld [vmem:[%s5825_s26 + $0xd8] sm:$0xff] }
 0x6b7   : > { %4480 = vst [vmem:[%s8145_s14 + $0x60] sm:$0xff] %v4448_v31 }
 0x6ba   : > { %v4388_v50 = vpop.f32.mrf.mxu2 }
 0x6bb   : > { %v4389_v8 = vadd.f32 %v8139_v47, %v4388_v50  ;;  %v5619_v50 = vld [vmem:[%s5825_s26 + $0xe0] sm:$0xff] }
 0x6bd   : > { %v4449_v42 = vadd.f32 %v5604_v1, %v4389_v8 }
 0x6bf   : > { %4481 = vst [vmem:[%s8145_s14 + $0x68] sm:$0xff] %v4449_v42  ;;  %4430 = vmatmul.bf16.gmra.mxu2 %v4278_v61  ;;  %v5620_v61 = vld [vmem:[%s5825_s26 + $0xe8] sm:$0xff] }
 0x6c2   : > { %v4391_v32 = vpop.f32.mrf.mxu2 }
 0x6c3   : > { %v4392_v22 = vadd.f32 %v8139_v47, %v4391_v32 }
 0x6c5   : > { %v4450_v15 = vadd.f32 %v5605_v25, %v4392_v22 }
 0x6c7   : > { %4482 = vst [vmem:[%s8145_s14 + $0x70] sm:$0xff] %v4450_v15  ;;  %v5621_v15 = vld [vmem:[%s5825_s26 + $0xf0] sm:$0xff] }
 0x6ca   : > { %v4393_v17 = vpop.f32.mrf.mxu2 }
 0x6cb   : > { %v4394_v26 = vadd.f32 %v8139_v47, %v4393_v17 }
 0x6cd   : > { %v4451_v35 = vadd.f32 %v5606_v0, %v4394_v26 }
 0x6cf   : > { %4483 = vst [vmem:[%s8145_s14 + $0x78] sm:$0xff] %v4451_v35  ;;  %v5622_v35 = vld [vmem:[%s5825_s26 + $0xf8] sm:$0xff] }
 0x6d2   : > { %v4396_v49 = vpop.f32.mrf.mxu2 }
 0x6d3   : > { %v4397_v53 = vadd.f32 %v8139_v47, %v4396_v49 }
 0x6d5   : > { %v4452_v51 = vadd.f32 %v5607_v34, %v4397_v53 }
 0x6d7   : > { %4484 = vst [vmem:[%s8145_s14 + $0x80] sm:$0xff] %v4452_v51 }
 0x6da   : > { %v4398_v44 = vpop.f32.mrf.mxu2 }
 0x6db   : > { %v4399_v57 = vadd.f32 %v8139_v47, %v4398_v44 }
 0x6dd   : > { %v4453_v19 = vadd.f32 %v5608_v55, %v4399_v57 }
 0x6df   : > { %4485 = vst [vmem:[%s8145_s14 + $0x88] sm:$0xff] %v4453_v19 }
 0x6e2   : > { %v4401_v30 = vpop.f32.mrf.mxu2 }
 0x6e3   : > { %v4402_v13 = vadd.f32 %v8139_v47, %v4401_v30 }
 0x6e5   : > { %v4454_v10 = vadd.f32 %v5609_v56, %v4402_v13 }
 0x6e7   : > { %4486 = vst [vmem:[%s8145_s14 + $0x90] sm:$0xff] %v4454_v10 }
 0x6ea   : > { %v4403_v20 = vpop.f32.mrf.mxu2 }
 0x6eb   : > { %v4404_v33 = vadd.f32 %v8139_v47, %v4403_v20 }
 0x6ed   : > { %v4455_v63 = vadd.f32 %v5610_v21, %v4404_v33 }
 0x6ef   : > { %4487 = vst [vmem:[%s8145_s14 + $0x98] sm:$0xff] %v4455_v63 }
 0x6f2   : > { %v4406_v6 = vpop.f32.mrf.mxu2 }
 0x6f3   : > { %v4407_v60 = vadd.f32 %v8139_v47, %v4406_v6 }
 0x6f5   : > { %v4456_v40 = vadd.f32 %v5611_v9, %v4407_v60 }
 0x6f7   : > { %4488 = vst [vmem:[%s8145_s14 + $0xa0] sm:$0xff] %v4456_v40 }
 0x6fa   : > { %v4408_v41 = vpop.f32.mrf.mxu2 }
 0x6fb   : > { %v4409_v3 = vadd.f32 %v8139_v47, %v4408_v41 }
 0x6fd   : > { %v4457_v29 = vadd.f32 %v5612_v39, %v4409_v3 }
 0x6ff   : > { %4489 = vst [vmem:[%s8145_s14 + $0xa8] sm:$0xff] %v4457_v29 }
 0x702   : > { %v4411_v36 = vpop.f32.mrf.mxu2 }
 0x703   : > { %v4412_v46 = vadd.f32 %v8139_v47, %v4411_v36 }
 0x705   : > { %v4458_v48 = vadd.f32 %v5613_v58, %v4412_v46 }
 0x707   : > { %4490 = vst [vmem:[%s8145_s14 + $0xb0] sm:$0xff] %v4458_v48 }
 0x70a   : > { %v4413_v11 = vpop.f32.mrf.mxu2 }
 0x70b   : > { %v4414_v43 = vadd.f32 %v8139_v47, %v4413_v11 }
 0x70d   : > { %v4459_v16 = vadd.f32 %v5614_v23, %v4414_v43 }
 0x70f   : > { %4491 = vst [vmem:[%s8145_s14 + $0xb8] sm:$0xff] %v4459_v16 }
 0x712   : > { %v4416_v4 = vpop.f32.mrf.mxu2 }
 0x713   : > { %v4417_v62 = vadd.f32 %v8139_v47, %v4416_v4 }
 0x715   : > { %v4460_v5 = vadd.f32 %v5615_v12, %v4417_v62 }
 0x717   : > { %4492 = vst [vmem:[%s8145_s14 + $0xc0] sm:$0xff] %v4460_v5 }
 0x71a   : > { %v4418_v2 = vpop.f32.mrf.mxu2 }
 0x71b   : > { %v4419_v38 = vadd.f32 %v8139_v47, %v4418_v2 }
 0x71d   : > { %v4461_v28 = vadd.f32 %v5616_v18, %v4419_v38 }
 0x71f   : > { %4493 = vst [vmem:[%s8145_s14 + $0xc8] sm:$0xff] %v4461_v28 }
 0x722   : > { %v4421_v27 = vpop.f32.mrf.mxu2 }
 0x723   : > { %v4422_v7 = vadd.f32 %v8139_v47, %v4421_v27 }
 0x725   : > { %v4462_v37 = vadd.f32 %v5617_v45, %v4422_v7 }
 0x727   : > { %4494 = vst [vmem:[%s8145_s14 + $0xd0] sm:$0xff] %v4462_v37 }
 0x72a   : > { %v4423_v14 = vpop.f32.mrf.mxu2 }
 0x72b   : > { %v4424_v54 = vadd.f32 %v8139_v47, %v4423_v14 }
 0x72d   : > { %v4463_v31 = vadd.f32 %v5618_v24, %v4424_v54 }
 0x72f   : > { %4495 = vst [vmem:[%s8145_s14 + $0xd8] sm:$0xff] %v4463_v31 }
 0x732   : > { %v4426_v59 = vpop.f32.mrf.mxu2 }
 0x733   : > { %v4427_v52 = vadd.f32 %v8139_v47, %v4426_v59 }
 0x735   : > { %v4464_v8 = vadd.f32 %v5619_v50, %v4427_v52 }
 0x737   : > { %4496 = vst [vmem:[%s8145_s14 + $0xe0] sm:$0xff] %v4464_v8 }
 0x73a   : > { %v4428_v1 = vpop.f32.mrf.mxu2 }
 0x73b   : > { %v4429_v42 = vadd.f32 %v8139_v47, %v4428_v1 }
 0x73d   : > { %v4465_v32 = vadd.f32 %v5620_v61, %v4429_v42 }
 0x73f   : > { %4497 = vst [vmem:[%s8145_s14 + $0xe8] sm:$0xff] %v4465_v32 }
 0x742   : > { %v4431_v22 = vpop.f32.mrf.mxu2 }
 0x743   : > { %v4432_v25 = vadd.f32 %v8139_v47, %v4431_v22 }
 0x745   : > { %v4466_v17 = vadd.f32 %v5621_v15, %v4432_v25 }
 0x747   : > { %4498 = vst [vmem:[%s8145_s14 + $0xf0] sm:$0xff] %v4466_v17 }
 0x74a   : > { %v4433_v26 = vpop.f32.mrf.mxu2 }
 0x74b   : > { %v4434_v0 = vadd.f32 %v8139_v47, %v4433_v26 }
 0x74d   : > { %v4467_v49 = vadd.f32 %v5622_v35, %v4434_v0 }
 0x74f   : > { %4499 = vst [vmem:[%s8145_s14 + $0xf8] sm:$0xff] %v4467_v49 }
 0x750   : > { %5650 = shalt.err (!%p5647_p3)
}
 0x751   : > { %s5689_s26 = smov 128   ;;  %s5690_s29 = smov 8  }
 0x752   : > { %5541 = dma.vmem_to_hbm [thread:$0]  (%p5789_p5), %s4514_s25, 4096, %s4516_s30, %s4501_s21, %s5689_s26, %s5689_s26, %s5690_s29  }
 0x753 PF: > { %p5547_p4 = scmp.ge.s32.totalorder %s5685_s20, 2  ;;  %s4530_s14 = sand.u32 1, %s5673_s17  }
 0x754   : > { %s4531_s0 = scalar_lea.sflag [#allocation3], %s4530_s14 }
 0x755   : > { %p5544_p7 = pnand %p5547_p4, %p5793_p6 }
 0x757   : > { %p5545_p8 = pneg %p5544_p7 }
 0x759   : > { %5668 = dma.done.wait (%p5545_p8), %s4531_s0, 4096  }
 0x75a   : > { %5670 = vsyncadd (%p5545_p8), %s4531_s0, 4294963200  ;;  %s8976_s12 = sld [smem:[#allocation5_spill]]  ;;  %p21_p9 = scmp.ge.s32.totalorder %s5776_s23, 4  }
 0x75b   : > { %s8977_s17 = smov %s5677_s18  ;;  %s8978_s18 = smov %s5681_s19 }
 0x75c   : > { %s8980_s20 = smov %s5776_s23  ;;  %23 = sbr.rel (!%p21_p9) target bundleno = 5 (0x5), region = 107 }
 0x760   : > { %s8979_s19 = smov %s8976_s12 }
 0x761   :  { %4537 = vsyncpa [#allocation3], 1 }
 0x762   :  { %4539 = vsyncpa [#allocation3 + $0x1], 1 }

</bundles_post_ra>
